<compile_context>
chip_gen: v6e
topology: v6e:2x2x1
jax: 0.10.0
libtpu: 0.0.40
codegen_flags: <defaults>
</compile_context>

<pallas_src>
import functools

import jax
import jax.numpy as jnp
from jax.experimental import pallas as pl
from jax.experimental.pallas import tpu as pltpu

EPS = 1e-5
LANE = 128
VMEM_LIMIT = 48 * 1024 * 1024


def _round_up(x, m):
    return (x + m - 1) // m * m


# ------------------------------ Pallas kernels ------------------------------

def _make_conv_kernel(taps, ho, wo, kc, fuse_bn_relu):
    """Direct-conv (+ batch-stats) kernel over one image.

    taps: static list of (row_shift, col_shift, channel_offset); tap t
          multiplies the shifted (Ho, Wo, kc) window with w_ref[t] (kc, Cpad).
    fuse_bn_relu: the input is the *raw* previous conv output; per-channel
          scale/bias (+ReLU) are applied in-kernel and the zero halo is built
          in a VMEM scratch, avoiding an extra HBM round trip.
    """

    def _conv_body(xv, w_ref, y_ref, sum_ref, sq_ref):
        cpad = y_ref.shape[-1]
        acc = jnp.zeros((ho * wo, cpad), jnp.float32)
        for t, (sy, sx, co) in enumerate(taps):          # static unroll (<= 9)
            a = xv[sy:sy + ho, sx:sx + wo, co:co + kc].reshape(ho * wo, kc)
            acc = acc + jnp.dot(a, w_ref[t], preferred_element_type=jnp.float32)
        y_ref[...] = acc.reshape(1, ho, wo, cpad).astype(y_ref.dtype)
        # Per-image BN partials from the f32 MXU accumulator.
        # TODO(synk): centered / Welford variance if E[x^2]-E[x]^2 cancellation
        # ever matters for real (large-mean) data.
        sum_ref[...] = jnp.sum(acc, axis=0, keepdims=True)[None]
        sq_ref[...] = jnp.sum(acc * acc, axis=0, keepdims=True)[None]

    if not fuse_bn_relu:
        def kernel(x_ref, w_ref, y_ref, sum_ref, sq_ref):
            _conv_body(x_ref[0], w_ref, y_ref, sum_ref, sq_ref)
    else:
        def kernel(x_ref, s_ref, b_ref, w_ref, y_ref, sum_ref, sq_ref, pad_ref):
            # BN1 apply + ReLU on the VMEM-resident tile, then build the
            # zero-halo'd conv input in VMEM scratch (no HBM traffic).
            h = jnp.maximum(
                x_ref[0].astype(jnp.float32) * s_ref[...] + b_ref[...], 0.0)
            pad_ref[...] = jnp.zeros(pad_ref.shape, pad_ref.dtype)
            pad_ref[1:1 + ho, 1:1 + wo, :] = h.astype(pad_ref.dtype)
            _conv_body(pad_ref[...], w_ref, y_ref, sum_ref, sq_ref)

    return kernel


def _bn_add_relu_kernel(cout, y_ref, s_ref, b_ref, r_ref, sr_ref, br_ref, o_ref):
    """BN(main) + BN(residual) + add + ReLU; writes only the cout real lanes."""
    h = y_ref[0].astype(jnp.float32) * s_ref[...] + b_ref[...]
    r = r_ref[0].astype(jnp.float32) * sr_ref[...] + br_ref[...]
    o_ref[0] = jnp.maximum(h + r, 0.0)[:, :, :cout].astype(o_ref.dtype)


# ---------------------------- pallas_call wrappers ---------------------------

def _conv_call(x_in, w, taps, ho, wo, kc, cpad, scale=None, bias=None):
    """Per-image direct conv: raw conv output (bf16) + per-image BN partials."""
    n = x_in.shape[0]
    fused = scale is not None
    ntaps = w.shape[0]
    kernel = _make_conv_kernel(taps, ho, wo, kc, fused)

    in_specs = [pl.BlockSpec((1,) + x_in.shape[1:], lambda i: (i, 0, 0, 0))]
    args = [x_in]
    if fused:
        in_specs += [pl.BlockSpec((1, cpad), lambda i: (0, 0)),
                     pl.BlockSpec((1, cpad), lambda i: (0, 0))]
        args += [scale, bias]
    # Weights: constant index_map -> stay VMEM resident across the grid.
    in_specs.append(pl.BlockSpec((ntaps, kc, cpad), lambda i: (0, 0, 0)))
    args.append(w)

    scratch = ([pltpu.VMEM((ho + 2, wo + 2, cpad), jnp.bfloat16)]
               if fused else [])

    cost = pl.CostEstimate(
        flops=2 * n * ho * wo * kc * cpad * ntaps,
        transcendentals=0,
        bytes_accessed=(x_in.size * x_in.dtype.itemsize + w.size * 2
                        + n * ho * wo * cpad * 2 + 2 * n * cpad * 4))

    return pl.pallas_call(
        kernel,
        out_shape=(jax.ShapeDtypeStruct((n, ho, wo, cpad), jnp.bfloat16),
                   jax.ShapeDtypeStruct((n, 1, cpad), jnp.float32),
                   jax.ShapeDtypeStruct((n, 1, cpad), jnp.float32)),
        grid=(n,),
        in_specs=in_specs,
        out_specs=(pl.BlockSpec((1, ho, wo, cpad), lambda i: (i, 0, 0, 0)),
                   pl.BlockSpec((1, 1, cpad), lambda i: (i, 0, 0)),
                   pl.BlockSpec((1, 1, cpad), lambda i: (i, 0, 0))),
        scratch_shapes=scratch,
        compiler_params=pltpu.CompilerParams(
            dimension_semantics=("parallel",),
            vmem_limit_bytes=VMEM_LIMIT),
        cost_estimate=cost,
    )(*args)


def _bn_add_relu_call(y2, s2, b2, yr, sr, br, cout):
    n, ho, wo, cpad = y2.shape
    kernel = functools.partial(_bn_add_relu_kernel, cout)
    cost = pl.CostEstimate(
        flops=6 * n * ho * wo * cpad,
        transcendentals=0,
        bytes_accessed=(y2.size + yr.size) * 2 + n * ho * wo * cout * 2)
    return pl.pallas_call(
        kernel,
        out_shape=jax.ShapeDtypeStruct((n, ho, wo, cout), jnp.bfloat16),
        grid=(n,),
        in_specs=[pl.BlockSpec((1, ho, wo, cpad), lambda i: (i, 0, 0, 0)),
                  pl.BlockSpec((1, cpad), lambda i: (0, 0)),
                  pl.BlockSpec((1, cpad), lambda i: (0, 0)),
                  pl.BlockSpec((1, ho, wo, cpad), lambda i: (i, 0, 0, 0)),
                  pl.BlockSpec((1, cpad), lambda i: (0, 0)),
                  pl.BlockSpec((1, cpad), lambda i: (0, 0))],
        out_specs=pl.BlockSpec((1, ho, wo, cout), lambda i: (i, 0, 0, 0)),
        compiler_params=pltpu.CompilerParams(
            dimension_semantics=("parallel",),
            vmem_limit_bytes=VMEM_LIMIT),
        cost_estimate=cost,
    )(y2, s2, b2, yr, sr, br)


# --------------------------------- JAX glue ----------------------------------

def _bn_scale_bias(sums, sqs, count, gamma, beta, cpad):
    """Fold batch sum/sumsq + affine params into per-channel scale/bias (f32)."""
    s = jnp.sum(sums[:, 0, :], axis=0)
    q = jnp.sum(sqs[:, 0, :], axis=0)
    mean = s / count
    var = jnp.maximum(q / count - mean * mean, 0.0)
    g = jnp.pad(gamma.reshape(-1), (0, cpad - gamma.size))
    b = jnp.pad(beta.reshape(-1), (0, cpad - beta.size))
    scale = g * jax.lax.rsqrt(var + EPS)
    bias = b - mean * scale
    return (scale.reshape(1, cpad).astype(jnp.float32),
            bias.reshape(1, cpad).astype(jnp.float32))


def res18_block_forward(x_nchw, params):
    """Pallas forward.  x_nchw: (N, Cin, H, W) -> (N, Cout, Ho, Wo)."""
    n, cin, h, w = x_nchw.shape
    cout = params['w1'].shape[-1]
    stride = cout // cin                 # module: stride = cout / cin (1 or 2)
    ho, wo = h // stride, w // stride    # even H, W assumed when stride == 2
    cpad = _round_up(cout, LANE)
    count = n * ho * wo

    # NCHW -> NHWC with a 1px zero halo (single cheap XLA pass; no im2col).
    x = jnp.transpose(x_nchw, (0, 2, 3, 1)).astype(jnp.float32)
    xp = jnp.pad(x, ((0, 0), (1, 1), (1, 1), (0, 0)))

    if stride == 2:
        # Space-to-depth: stride-2 3x3 conv == 9 shifted stride-1 matmuls over
        # the 4 phases stacked along channels (~1x input traffic, not 9x).
        hq, wq = (h + 2) // 2, (w + 2) // 2
        x1_in = (xp.reshape(n, hq, 2, wq, 2, cin)
                   .transpose(0, 1, 3, 2, 4, 5)
                   .reshape(n, hq, wq, 4 * cin).astype(jnp.bfloat16))
        taps1 = [(dy // 2, dx // 2, ((dy % 2) * 2 + (dx % 2)) * cin)
                 for dy in range(3) for dx in range(3)]
    else:
        x1_in = xp.astype(jnp.bfloat16)
        taps1 = [(dy, dx, 0) for dy in range(3) for dx in range(3)]
    taps_s1 = [(dy, dx, 0) for dy in range(3) for dx in range(3)]

    # ---- conv1 (3x3, stride s) + batch stats --------------------------------
    w1 = jnp.pad(params['w1'].reshape(9, cin, cout),
                 ((0, 0), (0, 0), (0, cpad - cout))).astype(jnp.bfloat16)
    y1, s1, q1 = _conv_call(x1_in, w1, taps1, ho, wo, cin, cpad)
    scale1, bias1 = _bn_scale_bias(s1, q1, count,
                                   params['g1'], params['b1'], cpad)

    # ---- conv2 (3x3, stride 1) with BN1 + ReLU fused on its input -----------
    w2 = jnp.pad(params['w2'],
                 ((0, 0), (0, 0), (0, cpad - cout), (0, cpad - cout)))
    w2 = w2.reshape(9, cpad, cpad).astype(jnp.bfloat16)
    y2, s2, q2 = _conv_call(y1, w2, taps_s1, ho, wo, cpad, cpad,
                            scale=scale1, bias=bias1)
    scale2, bias2 = _bn_scale_bias(s2, q2, count,
                                   params['g2'], params['b2'], cpad)

    # ---- shortcut branch -----------------------------------------------------
    if stride == 2:
        # 1x1 stride-2 conv == a single tap of the space-to-depth tensor.
        wsc = jnp.pad(params['wsc'], ((0, 0), (0, cpad - cout)))
        wsc = wsc.reshape(1, cin, cpad).astype(jnp.bfloat16)
        yr, sr, qr = _conv_call(x1_in, wsc, [(0, 0, 3 * cin)],
                                ho, wo, cin, cpad)
        scale_r, bias_r = _bn_scale_bias(sr, qr, count,
                                         params['gsc'], params['bsc'], cpad)
    else:
        # Identity shortcut: bf16 residual, scale=1 / bias=0 in the epilogue.
        yr = jnp.pad(x, ((0, 0), (0, 0), (0, 0),
                         (0, cpad - cout))).astype(jnp.bfloat16)
        scale_r = jnp.ones((1, cpad), jnp.float32)
        bias_r = jnp.zeros((1, cpad), jnp.float32)

    # ---- BN2 + BN_sc + add + ReLU (fused; writes only the cout real lanes) ---
    out = _bn_add_relu_call(y2, scale2, bias2, yr, scale_r, bias_r, cout)
    return jnp.transpose(out, (0, 3, 1, 2)).astype(jnp.float32)


# ------------------------- params & pure-JAX reference -----------------------

def init_params(key, cin, cout):
    k1, k2, k3 = jax.random.split(key, 3)
    std1 = (2.0 / (9 * cin)) ** 0.5
    std2 = (2.0 / (9 * cout)) ** 0.5
    params = {
        'w1': jax.random.normal(k1, (3, 3, cin, cout), jnp.float32) * std1,
        'g1': jnp.ones((1, cout), jnp.float32),
        'b1': jnp.zeros((1, cout), jnp.float32),
        'w2': jax.random.normal(k2, (3, 3, cout, cout), jnp.float32) * std2,
        'g2': jnp.ones((1, cout), jnp.float32),
        'b2': jnp.zeros((1, cout), jnp.float32),
    }
    if cin != cout:
        assert cout == 2 * cin
        stdsc = (2.0 / cin) ** 0.5
        params['wsc'] = jax.random.normal(k3, (cin, cout), jnp.float32) * stdsc
        params['gsc'] = jnp.ones((1, cout), jnp.float32)
        params['bsc'] = jnp.zeros((1, cout), jnp.float32)
    return params


def reference_forward(x_nchw, params, mimic_bf16=False):
    """Pure-JAX reference (lax.conv).  mimic_bf16=True mirrors the kernel's
    bf16 rounding points (matmul operands, stored intermediates, residual and
    final output); mimic_bf16=False is the full-f32 gold reference."""
    cin = x_nchw.shape[1]
    cout = params['w1'].shape[-1]
    s = cout // cin
    lo = (lambda a: a.astype(jnp.bfloat16).astype(jnp.float32)) \
        if mimic_bf16 else (lambda a: a)
    x = jnp.transpose(x_nchw, (0, 2, 3, 1)).astype(jnp.float32)

    def conv(a, wgt, st, pad):
        return jax.lax.conv_general_dilated(
            lo(a), lo(wgt), (st, st), ((pad, pad), (pad, pad)),
            dimension_numbers=('NHWC', 'HWIO', 'NHWC'),
            precision=jax.lax.Precision.HIGHEST)

    def bn(y, g, b):
        mu = jnp.mean(y, axis=(0, 1, 2), keepdims=True)
        var = jnp.mean((y - mu) ** 2, axis=(0, 1, 2), keepdims=True)
        return (lo(y) - mu) * jax.lax.rsqrt(var + EPS) * g.reshape(1, 1, 1, -1) \
            + b.reshape(1, 1, 1, -1)

    h1 = jnp.maximum(bn(conv(x, params['w1'], s, 1),
                        params['g1'], params['b1']), 0.0)
    h2 = bn(conv(h1, params['w2'], 1, 1), params['g2'], params['b2'])
    if s != 1:
        r = bn(conv(x, params['wsc'].reshape(1, 1, cin, cout), 2, 0),
               params['gsc'], params['bsc'])
    else:
        r = lo(x)
    out = jnp.maximum(h2 + r, 0.0)
    return lo(jnp.transpose(out, (0, 3, 1, 2)))


# ----------------------------------- main ------------------------------------

if __name__ == "__main__":
    key = jax.random.PRNGKey(0)
    kx1, kx2, kp1, kp2 = jax.random.split(key, 4)
    fwd = jax.jit(res18_block_forward)

    # downsample case: 4 -> 8 channels, stride-2 conv1 + 1x1/s2 shortcut
    x_ds = jax.random.normal(kx1, (2, 4, 16, 16), jnp.float32)
    params_ds = init_params(kp1, 4, 8)
    out_ds = jax.block_until_ready(fwd(x_ds, params_ds))
    assert out_ds.shape == (2, 8, 8, 8), out_ds.shape
    mim_ds = reference_forward(x_ds, params_ds, mimic_bf16=True)
    gold_ds = reference_forward(x_ds, params_ds, mimic_bf16=False)
    err_mim_ds = float(jnp.max(jnp.abs(out_ds - mim_ds)))
    err_gold_ds = float(jnp.max(jnp.abs(out_ds - gold_ds)))
    assert err_mim_ds < 6e-2, f"downsample (bf16-matched) mismatch: {err_mim_ds}"
    assert err_gold_ds < 1.5e-1, f"downsample (f32 gold) drift: {err_gold_ds}"

    # identity case: 8 -> 8 channels, stride 1, identity shortcut
    x_id = jax.random.normal(kx2, (2, 8, 16, 16), jnp.float32)
    params_id = init_params(kp2, 8, 8)
    out_id = jax.block_until_ready(fwd(x_id, params_id))
    assert out_id.shape == (2, 8, 16, 16), out_id.shape
    mim_id = reference_forward(x_id, params_id, mimic_bf16=True)
    gold_id = reference_forward(x_id, params_id, mimic_bf16=False)
    err_mim_id = float(jnp.max(jnp.abs(out_id - mim_id)))
    err_gold_id = float(jnp.max(jnp.abs(out_id - gold_id)))
    assert err_mim_id < 6e-2, f"identity (bf16-matched) mismatch: {err_mim_id}"
    assert err_gold_id < 1.5e-1, f"identity (f32 gold) drift: {err_gold_id}"

    print("KERNEL_OK")
</pallas_src>

<mosaic_0001>
module attributes {stable_mosaic.version = 11 : i64} {
  func.func @kernel(%arg0: i32, %arg1: memref<1x9x9x16xbf16, #tpu.memory_space<vmem>>, %arg2: memref<9x4x128xbf16, #tpu.memory_space<vmem>>, %arg3: memref<1x8x8x128xbf16, #tpu.memory_space<vmem>>, %arg4: memref<1x1x128xf32, #tpu.memory_space<vmem>>, %arg5: memref<1x1x128xf32, #tpu.memory_space<vmem>>) attributes {dimension_semantics = [#tpu.dimension_semantics<parallel>], iteration_bounds = array<i64: 2>, scalar_prefetch = 0 : i64, scratch_operands = 0 : i64, tpu.core_type = #tpu.core_type<tc>, window_params = [{transform_indices = @transform_0, window_bounds = array<i64: 1, 9, 9, 16>}, {pipeline_mode = #tpu.pipeline_mode<synchronous>, transform_indices = @transform_1, window_bounds = array<i64: 9, 4, 128>}, {transform_indices = @transform_2, window_bounds = array<i64: 1, 8, 8, 128>}, {transform_indices = @transform_3, window_bounds = array<i64: 1, 1, 128>}, {transform_indices = @transform_4, window_bounds = array<i64: 1, 1, 128>}]} {
    %c0 = arith.constant 0 : index
    %c0_0 = arith.constant 0 : index
    %c0_1 = arith.constant 0 : index
    %c0_2 = arith.constant 0 : index
    %0 = vector.load %arg1[%c0, %c0_0, %c0_1, %c0_2] : memref<1x9x9x16xbf16, #tpu.memory_space<vmem>>, vector<1x9x9x16xbf16>
    %1 = vector.shape_cast %0 : vector<1x9x9x16xbf16> to vector<9x9x16xbf16>
    %cst = arith.constant 0.000000e+00 : f32
    %2 = vector.broadcast %cst : f32 to vector<64x128xf32>
    %3 = vector.extract_strided_slice %1 {offsets = [0, 0, 0], sizes = [8, 8, 4], strides = [1, 1, 1]} : vector<9x9x16xbf16> to vector<8x8x4xbf16>
    %4 = vector.shape_cast %3 : vector<8x8x4xbf16> to vector<64x4xbf16>
    %c0_3 = arith.constant 0 : index
    %c0_4 = arith.constant 0 : index
    %c0_5 = arith.constant 0 : index
    %5 = vector.load %arg2[%c0_3, %c0_4, %c0_5] : memref<9x4x128xbf16, #tpu.memory_space<vmem>>, vector<1x4x128xbf16>
    %6 = vector.shape_cast %5 : vector<1x4x128xbf16> to vector<4x128xbf16>
    %cst_6 = arith.constant dense<0.000000e+00> : vector<64x128xf32>
    %7 = tpu.matmul %4, %6, %cst_6 {dimension_numbers = #tpu.dot_dimension_numbers<[1], [0], [0], [1], [0, 0, 1, 1], [], []>} : vector<64x4xbf16>, vector<4x128xbf16>, vector<64x128xf32> -> vector<64x128xf32>
    %8 = arith.addf %2, %7 : vector<64x128xf32>
    %9 = vector.extract_strided_slice %1 {offsets = [0, 0, 4], sizes = [8, 8, 4], strides = [1, 1, 1]} : vector<9x9x16xbf16> to vector<8x8x4xbf16>
    %10 = vector.shape_cast %9 : vector<8x8x4xbf16> to vector<64x4xbf16>
    %c1 = arith.constant 1 : index
    %c0_7 = arith.constant 0 : index
    %c0_8 = arith.constant 0 : index
    %11 = vector.load %arg2[%c1, %c0_7, %c0_8] : memref<9x4x128xbf16, #tpu.memory_space<vmem>>, vector<1x4x128xbf16>
    %12 = vector.shape_cast %11 : vector<1x4x128xbf16> to vector<4x128xbf16>
    %cst_9 = arith.constant dense<0.000000e+00> : vector<64x128xf32>
    %13 = tpu.matmul %10, %12, %cst_9 {dimension_numbers = #tpu.dot_dimension_numbers<[1], [0], [0], [1], [0, 0, 1, 1], [], []>} : vector<64x4xbf16>, vector<4x128xbf16>, vector<64x128xf32> -> vector<64x128xf32>
    %14 = arith.addf %8, %13 : vector<64x128xf32>
    %15 = vector.extract_strided_slice %1 {offsets = [0, 1, 0], sizes = [8, 8, 4], strides = [1, 1, 1]} : vector<9x9x16xbf16> to vector<8x8x4xbf16>
    %16 = vector.shape_cast %15 : vector<8x8x4xbf16> to vector<64x4xbf16>
    %c2 = arith.constant 2 : index
    %c0_10 = arith.constant 0 : index
    %c0_11 = arith.constant 0 : index
    %17 = vector.load %arg2[%c2, %c0_10, %c0_11] : memref<9x4x128xbf16, #tpu.memory_space<vmem>>, vector<1x4x128xbf16>
    %18 = vector.shape_cast %17 : vector<1x4x128xbf16> to vector<4x128xbf16>
    %cst_12 = arith.constant dense<0.000000e+00> : vector<64x128xf32>
    %19 = tpu.matmul %16, %18, %cst_12 {dimension_numbers = #tpu.dot_dimension_numbers<[1], [0], [0], [1], [0, 0, 1, 1], [], []>} : vector<64x4xbf16>, vector<4x128xbf16>, vector<64x128xf32> -> vector<64x128xf32>
    %20 = arith.addf %14, %19 : vector<64x128xf32>
    %21 = vector.extract_strided_slice %1 {offsets = [0, 0, 8], sizes = [8, 8, 4], strides = [1, 1, 1]} : vector<9x9x16xbf16> to vector<8x8x4xbf16>
    %22 = vector.shape_cast %21 : vector<8x8x4xbf16> to vector<64x4xbf16>
    %c3 = arith.constant 3 : index
    %c0_13 = arith.constant 0 : index
    %c0_14 = arith.constant 0 : index
    %23 = vector.load %arg2[%c3, %c0_13, %c0_14] : memref<9x4x128xbf16, #tpu.memory_space<vmem>>, vector<1x4x128xbf16>
    %24 = vector.shape_cast %23 : vector<1x4x128xbf16> to vector<4x128xbf16>
    %cst_15 = arith.constant dense<0.000000e+00> : vector<64x128xf32>
    %25 = tpu.matmul %22, %24, %cst_15 {dimension_numbers = #tpu.dot_dimension_numbers<[1], [0], [0], [1], [0, 0, 1, 1], [], []>} : vector<64x4xbf16>, vector<4x128xbf16>, vector<64x128xf32> -> vector<64x128xf32>
    %26 = arith.addf %20, %25 : vector<64x128xf32>
    %27 = vector.extract_strided_slice %1 {offsets = [0, 0, 12], sizes = [8, 8, 4], strides = [1, 1, 1]} : vector<9x9x16xbf16> to vector<8x8x4xbf16>
    %28 = vector.shape_cast %27 : vector<8x8x4xbf16> to vector<64x4xbf16>
    %c4 = arith.constant 4 : index
    %c0_16 = arith.constant 0 : index
    %c0_17 = arith.constant 0 : index
    %29 = vector.load %arg2[%c4, %c0_16, %c0_17] : memref<9x4x128xbf16, #tpu.memory_space<vmem>>, vector<1x4x128xbf16>
    %30 = vector.shape_cast %29 : vector<1x4x128xbf16> to vector<4x128xbf16>
    %cst_18 = arith.constant dense<0.000000e+00> : vector<64x128xf32>
    %31 = tpu.matmul %28, %30, %cst_18 {dimension_numbers = #tpu.dot_dimension_numbers<[1], [0], [0], [1], [0, 0, 1, 1], [], []>} : vector<64x4xbf16>, vector<4x128xbf16>, vector<64x128xf32> -> vector<64x128xf32>
    %32 = arith.addf %26, %31 : vector<64x128xf32>
    %33 = vector.extract_strided_slice %1 {offsets = [0, 1, 8], sizes = [8, 8, 4], strides = [1, 1, 1]} : vector<9x9x16xbf16> to vector<8x8x4xbf16>
    %34 = vector.shape_cast %33 : vector<8x8x4xbf16> to vector<64x4xbf16>
    %c5 = arith.constant 5 : index
    %c0_19 = arith.constant 0 : index
    %c0_20 = arith.constant 0 : index
    %35 = vector.load %arg2[%c5, %c0_19, %c0_20] : memref<9x4x128xbf16, #tpu.memory_space<vmem>>, vector<1x4x128xbf16>
    %36 = vector.shape_cast %35 : vector<1x4x128xbf16> to vector<4x128xbf16>
    %cst_21 = arith.constant dense<0.000000e+00> : vector<64x128xf32>
    %37 = tpu.matmul %34, %36, %cst_21 {dimension_numbers = #tpu.dot_dimension_numbers<[1], [0], [0], [1], [0, 0, 1, 1], [], []>} : vector<64x4xbf16>, vector<4x128xbf16>, vector<64x128xf32> -> vector<64x128xf32>
    %38 = arith.addf %32, %37 : vector<64x128xf32>
    %39 = vector.extract_strided_slice %1 {offsets = [1, 0, 0], sizes = [8, 8, 4], strides = [1, 1, 1]} : vector<9x9x16xbf16> to vector<8x8x4xbf16>
    %40 = vector.shape_cast %39 : vector<8x8x4xbf16> to vector<64x4xbf16>
    %c6 = arith.constant 6 : index
    %c0_22 = arith.constant 0 : index
    %c0_23 = arith.constant 0 : index
    %41 = vector.load %arg2[%c6, %c0_22, %c0_23] : memref<9x4x128xbf16, #tpu.memory_space<vmem>>, vector<1x4x128xbf16>
    %42 = vector.shape_cast %41 : vector<1x4x128xbf16> to vector<4x128xbf16>
    %cst_24 = arith.constant dense<0.000000e+00> : vector<64x128xf32>
    %43 = tpu.matmul %40, %42, %cst_24 {dimension_numbers = #tpu.dot_dimension_numbers<[1], [0], [0], [1], [0, 0, 1, 1], [], []>} : vector<64x4xbf16>, vector<4x128xbf16>, vector<64x128xf32> -> vector<64x128xf32>
    %44 = arith.addf %38, %43 : vector<64x128xf32>
    %45 = vector.extract_strided_slice %1 {offsets = [1, 0, 4], sizes = [8, 8, 4], strides = [1, 1, 1]} : vector<9x9x16xbf16> to vector<8x8x4xbf16>
    %46 = vector.shape_cast %45 : vector<8x8x4xbf16> to vector<64x4xbf16>
    %c7 = arith.constant 7 : index
    %c0_25 = arith.constant 0 : index
    %c0_26 = arith.constant 0 : index
    %47 = vector.load %arg2[%c7, %c0_25, %c0_26] : memref<9x4x128xbf16, #tpu.memory_space<vmem>>, vector<1x4x128xbf16>
    %48 = vector.shape_cast %47 : vector<1x4x128xbf16> to vector<4x128xbf16>
    %cst_27 = arith.constant dense<0.000000e+00> : vector<64x128xf32>
    %49 = tpu.matmul %46, %48, %cst_27 {dimension_numbers = #tpu.dot_dimension_numbers<[1], [0], [0], [1], [0, 0, 1, 1], [], []>} : vector<64x4xbf16>, vector<4x128xbf16>, vector<64x128xf32> -> vector<64x128xf32>
    %50 = arith.addf %44, %49 : vector<64x128xf32>
    %51 = vector.extract_strided_slice %1 {offsets = [1, 1, 0], sizes = [8, 8, 4], strides = [1, 1, 1]} : vector<9x9x16xbf16> to vector<8x8x4xbf16>
    %52 = vector.shape_cast %51 : vector<8x8x4xbf16> to vector<64x4xbf16>
    %c8 = arith.constant 8 : index
    %c0_28 = arith.constant 0 : index
    %c0_29 = arith.constant 0 : index
    %53 = vector.load %arg2[%c8, %c0_28, %c0_29] : memref<9x4x128xbf16, #tpu.memory_space<vmem>>, vector<1x4x128xbf16>
    %54 = vector.shape_cast %53 : vector<1x4x128xbf16> to vector<4x128xbf16>
    %cst_30 = arith.constant dense<0.000000e+00> : vector<64x128xf32>
    %55 = tpu.matmul %52, %54, %cst_30 {dimension_numbers = #tpu.dot_dimension_numbers<[1], [0], [0], [1], [0, 0, 1, 1], [], []>} : vector<64x4xbf16>, vector<4x128xbf16>, vector<64x128xf32> -> vector<64x128xf32>
    %56 = arith.addf %50, %55 : vector<64x128xf32>
    %57 = vector.shape_cast %56 : vector<64x128xf32> to vector<1x8x8x128xf32>
    %58 = arith.truncf %57 : vector<1x8x8x128xf32> to vector<1x8x8x128xbf16>
    %c0_31 = arith.constant 0 : index
    %c0_32 = arith.constant 0 : index
    %c0_33 = arith.constant 0 : index
    %c0_34 = arith.constant 0 : index
    %59 = vector.load %arg3[%c0_31, %c0_32, %c0_33, %c0_34] : memref<1x8x8x128xbf16, #tpu.memory_space<vmem>>, vector<1x8x8x128xbf16>
    tpu.vector_store %arg3[%c0_31, %c0_32, %c0_33, %c0_34], %58 {strides = array<i32>} : memref<1x8x8x128xbf16, #tpu.memory_space<vmem>>, vector<1x8x8x128xbf16>,
    %cst_35 = arith.constant dense<0.000000e+00> : vector<128xf32>
    %60 = vector.multi_reduction <add>, %56, %cst_35 [0] : vector<64x128xf32> to vector<128xf32>
    %61 = vector.shape_cast %60 : vector<128xf32> to vector<1x128xf32>
    %62 = vector.shape_cast %61 : vector<1x128xf32> to vector<1x1x128xf32>
    %c0_36 = arith.constant 0 : index
    %c0_37 = arith.constant 0 : index
    %c0_38 = arith.constant 0 : index
    %63 = vector.load %arg4[%c0_36, %c0_37, %c0_38] : memref<1x1x128xf32, #tpu.memory_space<vmem>>, vector<1x1x128xf32>
    tpu.vector_store %arg4[%c0_36, %c0_37, %c0_38], %62 {strides = array<i32>} : memref<1x1x128xf32, #tpu.memory_space<vmem>>, vector<1x1x128xf32>,
    %64 = arith.mulf %56, %56 : vector<64x128xf32>
    %cst_39 = arith.constant dense<0.000000e+00> : vector<128xf32>
    %65 = vector.multi_reduction <add>, %64, %cst_39 [0] : vector<64x128xf32> to vector<128xf32>
    %66 = vector.shape_cast %65 : vector<128xf32> to vector<1x128xf32>
    %67 = vector.shape_cast %66 : vector<1x128xf32> to vector<1x1x128xf32>
    %c0_40 = arith.constant 0 : index
    %c0_41 = arith.constant 0 : index
    %c0_42 = arith.constant 0 : index
    %68 = vector.load %arg5[%c0_40, %c0_41, %c0_42] : memref<1x1x128xf32, #tpu.memory_space<vmem>>, vector<1x1x128xf32>
    tpu.vector_store %arg5[%c0_40, %c0_41, %c0_42], %67 {strides = array<i32>} : memref<1x1x128xf32, #tpu.memory_space<vmem>>, vector<1x1x128xf32>,
    return
  }
  func.func @transform_0(%arg0: i32) -> (i32, i32, i32, i32) {
    %c0_i32 = arith.constant 0 : i32
    %c0_i32_0 = arith.constant 0 : i32
    %c0_i32_1 = arith.constant 0 : i32
    %c0_i32_2 = arith.constant 0 : i32
    return %arg0, %c0_i32, %c0_i32_0, %c0_i32_1 : i32, i32, i32, i32
  }
  func.func @transform_1(%arg0: i32) -> (i32, i32, i32) {
    %c0_i32 = arith.constant 0 : i32
    %c0_i32_0 = arith.constant 0 : i32
    %c0_i32_1 = arith.constant 0 : i32
    %c0_i32_2 = arith.constant 0 : i32
    return %c0_i32, %c0_i32_0, %c0_i32_1 : i32, i32, i32
  }
  func.func @transform_2(%arg0: i32) -> (i32, i32, i32, i32) {
    %c0_i32 = arith.constant 0 : i32
    %c0_i32_0 = arith.constant 0 : i32
    %c0_i32_1 = arith.constant 0 : i32
    %c0_i32_2 = arith.constant 0 : i32
    return %arg0, %c0_i32, %c0_i32_0, %c0_i32_1 : i32, i32, i32, i32
  }
  func.func @transform_3(%arg0: i32) -> (i32, i32, i32) {
    %c0_i32 = arith.constant 0 : i32
    %c0_i32_0 = arith.constant 0 : i32
    %c0_i32_1 = arith.constant 0 : i32
    return %arg0, %c0_i32, %c0_i32_0 : i32, i32, i32
  }
  func.func @transform_4(%arg0: i32) -> (i32, i32, i32) {
    %c0_i32 = arith.constant 0 : i32
    %c0_i32_0 = arith.constant 0 : i32
    %c0_i32_1 = arith.constant 0 : i32
    return %arg0, %c0_i32, %c0_i32_0 : i32, i32, i32
  }
}

module attributes {stable_mosaic.version = 11 : i64} {
  func.func @kernel(%arg0: i32, %arg1: memref<1x9x9x16xbf16, #tpu.memory_space<vmem>>, %arg2: memref<1x4x128xbf16, #tpu.memory_space<vmem>>, %arg3: memref<1x8x8x128xbf16, #tpu.memory_space<vmem>>, %arg4: memref<1x1x128xf32, #tpu.memory_space<vmem>>, %arg5: memref<1x1x128xf32, #tpu.memory_space<vmem>>) attributes {dimension_semantics = [#tpu.dimension_semantics<parallel>], iteration_bounds = array<i64: 2>, scalar_prefetch = 0 : i64, scratch_operands = 0 : i64, tpu.core_type = #tpu.core_type<tc>, window_params = [{transform_indices = @transform_0, window_bounds = array<i64: 1, 9, 9, 16>}, {pipeline_mode = #tpu.pipeline_mode<synchronous>, transform_indices = @transform_1, window_bounds = array<i64: 1, 4, 128>}, {transform_indices = @transform_2, window_bounds = array<i64: 1, 8, 8, 128>}, {transform_indices = @transform_3, window_bounds = array<i64: 1, 1, 128>}, {transform_indices = @transform_4, window_bounds = array<i64: 1, 1, 128>}]} {
    %c0 = arith.constant 0 : index
    %c0_0 = arith.constant 0 : index
    %c0_1 = arith.constant 0 : index
    %c0_2 = arith.constant 0 : index
    %0 = vector.load %arg1[%c0, %c0_0, %c0_1, %c0_2] : memref<1x9x9x16xbf16, #tpu.memory_space<vmem>>, vector<1x9x9x16xbf16>
    %1 = vector.shape_cast %0 : vector<1x9x9x16xbf16> to vector<9x9x16xbf16>
    %cst = arith.constant 0.000000e+00 : f32
    %2 = vector.broadcast %cst : f32 to vector<64x128xf32>
    %3 = vector.extract_strided_slice %1 {offsets = [0, 0, 12], sizes = [8, 8, 4], strides = [1, 1, 1]} : vector<9x9x16xbf16> to vector<8x8x4xbf16>
    %4 = vector.shape_cast %3 : vector<8x8x4xbf16> to vector<64x4xbf16>
    %c0_3 = arith.constant 0 : index
    %c0_4 = arith.constant 0 : index
    %c0_5 = arith.constant 0 : index
    %5 = vector.load %arg2[%c0_3, %c0_4, %c0_5] : memref<1x4x128xbf16, #tpu.memory_space<vmem>>, vector<1x4x128xbf16>
    %6 = vector.shape_cast %5 : vector<1x4x128xbf16> to vector<4x128xbf16>
    %cst_6 = arith.constant dense<0.000000e+00> : vector<64x128xf32>
    %7 = tpu.matmul %4, %6, %cst_6 {dimension_numbers = #tpu.dot_dimension_numbers<[1], [0], [0], [1], [0, 0, 1, 1], [], []>} : vector<64x4xbf16>, vector<4x128xbf16>, vector<64x128xf32> -> vector<64x128xf32>
    %8 = arith.addf %2, %7 : vector<64x128xf32>
    %9 = vector.shape_cast %8 : vector<64x128xf32> to vector<1x8x8x128xf32>
    %10 = arith.truncf %9 : vector<1x8x8x128xf32> to vector<1x8x8x128xbf16>
    %c0_7 = arith.constant 0 : index
    %c0_8 = arith.constant 0 : index
    %c0_9 = arith.constant 0 : index
    %c0_10 = arith.constant 0 : index
    %11 = vector.load %arg3[%c0_7, %c0_8, %c0_9, %c0_10] : memref<1x8x8x128xbf16, #tpu.memory_space<vmem>>, vector<1x8x8x128xbf16>
    tpu.vector_store %arg3[%c0_7, %c0_8, %c0_9, %c0_10], %10 {strides = array<i32>} : memref<1x8x8x128xbf16, #tpu.memory_space<vmem>>, vector<1x8x8x128xbf16>,
    %cst_11 = arith.constant dense<0.000000e+00> : vector<128xf32>
    %12 = vector.multi_reduction <add>, %8, %cst_11 [0] : vector<64x128xf32> to vector<128xf32>
    %13 = vector.shape_cast %12 : vector<128xf32> to vector<1x128xf32>
    %14 = vector.shape_cast %13 : vector<1x128xf32> to vector<1x1x128xf32>
    %c0_12 = arith.constant 0 : index
    %c0_13 = arith.constant 0 : index
    %c0_14 = arith.constant 0 : index
    %15 = vector.load %arg4[%c0_12, %c0_13, %c0_14] : memref<1x1x128xf32, #tpu.memory_space<vmem>>, vector<1x1x128xf32>
    tpu.vector_store %arg4[%c0_12, %c0_13, %c0_14], %14 {strides = array<i32>} : memref<1x1x128xf32, #tpu.memory_space<vmem>>, vector<1x1x128xf32>,
    %16 = arith.mulf %8, %8 : vector<64x128xf32>
    %cst_15 = arith.constant dense<0.000000e+00> : vector<128xf32>
    %17 = vector.multi_reduction <add>, %16, %cst_15 [0] : vector<64x128xf32> to vector<128xf32>
    %18 = vector.shape_cast %17 : vector<128xf32> to vector<1x128xf32>
    %19 = vector.shape_cast %18 : vector<1x128xf32> to vector<1x1x128xf32>
    %c0_16 = arith.constant 0 : index
    %c0_17 = arith.constant 0 : index
    %c0_18 = arith.constant 0 : index
    %20 = vector.load %arg5[%c0_16, %c0_17, %c0_18] : memref<1x1x128xf32, #tpu.memory_space<vmem>>, vector<1x1x128xf32>
    tpu.vector_store %arg5[%c0_16, %c0_17, %c0_18], %19 {strides = array<i32>} : memref<1x1x128xf32, #tpu.memory_space<vmem>>, vector<1x1x128xf32>,
    return
  }
  func.func @transform_0(%arg0: i32) -> (i32, i32, i32, i32) {
    %c0_i32 = arith.constant 0 : i32
    %c0_i32_0 = arith.constant 0 : i32
    %c0_i32_1 = arith.constant 0 : i32
    %c0_i32_2 = arith.constant 0 : i32
    return %arg0, %c0_i32, %c0_i32_0, %c0_i32_1 : i32, i32, i32, i32
  }
  func.func @transform_1(%arg0: i32) -> (i32, i32, i32) {
    %c0_i32 = arith.constant 0 : i32
    %c0_i32_0 = arith.constant 0 : i32
    %c0_i32_1 = arith.constant 0 : i32
    %c0_i32_2 = arith.constant 0 : i32
    return %c0_i32, %c0_i32_0, %c0_i32_1 : i32, i32, i32
  }
  func.func @transform_2(%arg0: i32) -> (i32, i32, i32, i32) {
    %c0_i32 = arith.constant 0 : i32
    %c0_i32_0 = arith.constant 0 : i32
    %c0_i32_1 = arith.constant 0 : i32
    %c0_i32_2 = arith.constant 0 : i32
    return %arg0, %c0_i32, %c0_i32_0, %c0_i32_1 : i32, i32, i32, i32
  }
  func.func @transform_3(%arg0: i32) -> (i32, i32, i32) {
    %c0_i32 = arith.constant 0 : i32
    %c0_i32_0 = arith.constant 0 : i32
    %c0_i32_1 = arith.constant 0 : i32
    return %arg0, %c0_i32, %c0_i32_0 : i32, i32, i32
  }
  func.func @transform_4(%arg0: i32) -> (i32, i32, i32) {
    %c0_i32 = arith.constant 0 : i32
    %c0_i32_0 = arith.constant 0 : i32
    %c0_i32_1 = arith.constant 0 : i32
    return %arg0, %c0_i32, %c0_i32_0 : i32, i32, i32
  }
}

module attributes {stable_mosaic.version = 11 : i64} {
  func.func @kernel(%arg0: i32, %arg1: memref<1x8x8x128xbf16, #tpu.memory_space<vmem>>, %arg2: memref<1x128xf32, #tpu.memory_space<vmem>>, %arg3: memref<1x128xf32, #tpu.memory_space<vmem>>, %arg4: memref<9x128x128xbf16, #tpu.memory_space<vmem>>, %arg5: memref<1x8x8x128xbf16, #tpu.memory_space<vmem>>, %arg6: memref<1x1x128xf32, #tpu.memory_space<vmem>>, %arg7: memref<1x1x128xf32, #tpu.memory_space<vmem>>, %arg8: memref<10x10x128xbf16, #tpu.memory_space<vmem>>) attributes {dimension_semantics = [#tpu.dimension_semantics<parallel>], iteration_bounds = array<i64: 2>, scalar_prefetch = 0 : i64, scratch_operands = 1 : i64, tpu.core_type = #tpu.core_type<tc>, window_params = [{transform_indices = @transform_0, window_bounds = array<i64: 1, 8, 8, 128>}, {pipeline_mode = #tpu.pipeline_mode<synchronous>, transform_indices = @transform_1, window_bounds = array<i64: 1, 128>}, {pipeline_mode = #tpu.pipeline_mode<synchronous>, transform_indices = @transform_2, window_bounds = array<i64: 1, 128>}, {pipeline_mode = #tpu.pipeline_mode<synchronous>, transform_indices = @transform_3, window_bounds = array<i64: 9, 128, 128>}, {transform_indices = @transform_4, window_bounds = array<i64: 1, 8, 8, 128>}, {transform_indices = @transform_5, window_bounds = array<i64: 1, 1, 128>}, {transform_indices = @transform_6, window_bounds = array<i64: 1, 1, 128>}]} {
    %c0 = arith.constant 0 : index
    %c0_0 = arith.constant 0 : index
    %c0_1 = arith.constant 0 : index
    %c0_2 = arith.constant 0 : index
    %0 = vector.load %arg1[%c0, %c0_0, %c0_1, %c0_2] : memref<1x8x8x128xbf16, #tpu.memory_space<vmem>>, vector<1x8x8x128xbf16>
    %1 = vector.shape_cast %0 : vector<1x8x8x128xbf16> to vector<8x8x128xbf16>
    %2 = arith.extf %1 : vector<8x8x128xbf16> to vector<8x8x128xf32>
    %c0_3 = arith.constant 0 : index
    %c0_4 = arith.constant 0 : index
    %3 = vector.load %arg2[%c0_3, %c0_4] : memref<1x128xf32, #tpu.memory_space<vmem>>, vector<1x128xf32>
    %4 = vector.shape_cast %3 : vector<1x128xf32> to vector<1x1x128xf32>
    %5 = vector.broadcast %4 : vector<1x1x128xf32> to vector<8x8x128xf32>
    %6 = arith.mulf %2, %5 : vector<8x8x128xf32>
    %c0_5 = arith.constant 0 : index
    %c0_6 = arith.constant 0 : index
    %7 = vector.load %arg3[%c0_5, %c0_6] : memref<1x128xf32, #tpu.memory_space<vmem>>, vector<1x128xf32>
    %8 = vector.shape_cast %7 : vector<1x128xf32> to vector<1x1x128xf32>
    %9 = vector.broadcast %8 : vector<1x1x128xf32> to vector<8x8x128xf32>
    %10 = arith.addf %6, %9 : vector<8x8x128xf32>
    %cst = arith.constant 0.000000e+00 : f32
    %11 = vector.broadcast %cst : f32 to vector<8x8x128xf32>
    %12 = arith.maximumf %10, %11 : vector<8x8x128xf32>
    %cst_7 = arith.constant 0.000000e+00 : bf16
    %13 = vector.broadcast %cst_7 : bf16 to vector<10x10x128xbf16>
    %c0_8 = arith.constant 0 : index
    %c0_9 = arith.constant 0 : index
    %c0_10 = arith.constant 0 : index
    %14 = vector.load %arg8[%c0_8, %c0_9, %c0_10] : memref<10x10x128xbf16, #tpu.memory_space<vmem>>, vector<10x10x128xbf16>
    tpu.vector_store %arg8[%c0_8, %c0_9, %c0_10], %13 {strides = array<i32>} : memref<10x10x128xbf16, #tpu.memory_space<vmem>>, vector<10x10x128xbf16>,
    %15 = arith.truncf %12 : vector<8x8x128xf32> to vector<8x8x128xbf16>
    %c1 = arith.constant 1 : index
    %c1_11 = arith.constant 1 : index
    %c0_12 = arith.constant 0 : index
    %16 = vector.load %arg8[%c1, %c1_11, %c0_12] : memref<10x10x128xbf16, #tpu.memory_space<vmem>>, vector<8x8x128xbf16>
    tpu.vector_store %arg8[%c1, %c1_11, %c0_12], %15 {strides = array<i32>} : memref<10x10x128xbf16, #tpu.memory_space<vmem>>, vector<8x8x128xbf16>,
    %c0_13 = arith.constant 0 : index
    %c0_14 = arith.constant 0 : index
    %c0_15 = arith.constant 0 : index
    %17 = vector.load %arg8[%c0_13, %c0_14, %c0_15] : memref<10x10x128xbf16, #tpu.memory_space<vmem>>, vector<10x10x128xbf16>
    %cst_16 = arith.constant 0.000000e+00 : f32
    %18 = vector.broadcast %cst_16 : f32 to vector<64x128xf32>
    %19 = vector.extract_strided_slice %17 {offsets = [0, 0, 0], sizes = [8, 8, 128], strides = [1, 1, 1]} : vector<10x10x128xbf16> to vector<8x8x128xbf16>
    %20 = vector.shape_cast %19 : vector<8x8x128xbf16> to vector<64x128xbf16>
    %c0_17 = arith.constant 0 : index
    %c0_18 = arith.constant 0 : index
    %c0_19 = arith.constant 0 : index
    %21 = vector.load %arg4[%c0_17, %c0_18, %c0_19] : memref<9x128x128xbf16, #tpu.memory_space<vmem>>, vector<1x128x128xbf16>
    %22 = vector.shape_cast %21 : vector<1x128x128xbf16> to vector<128x128xbf16>
    %cst_20 = arith.constant dense<0.000000e+00> : vector<64x128xf32>
    %23 = tpu.matmul %20, %22, %cst_20 {dimension_numbers = #tpu.dot_dimension_numbers<[1], [0], [0], [1], [0, 0, 1, 1], [], []>} : vector<64x128xbf16>, vector<128x128xbf16>, vector<64x128xf32> -> vector<64x128xf32>
    %24 = arith.addf %18, %23 : vector<64x128xf32>
    %25 = vector.extract_strided_slice %17 {offsets = [0, 1, 0], sizes = [8, 8, 128], strides = [1, 1, 1]} : vector<10x10x128xbf16> to vector<8x8x128xbf16>
    %26 = vector.shape_cast %25 : vector<8x8x128xbf16> to vector<64x128xbf16>
    %c1_21 = arith.constant 1 : index
    %c0_22 = arith.constant 0 : index
    %c0_23 = arith.constant 0 : index
    %27 = vector.load %arg4[%c1_21, %c0_22, %c0_23] : memref<9x128x128xbf16, #tpu.memory_space<vmem>>, vector<1x128x128xbf16>
    %28 = vector.shape_cast %27 : vector<1x128x128xbf16> to vector<128x128xbf16>
    %cst_24 = arith.constant dense<0.000000e+00> : vector<64x128xf32>
    %29 = tpu.matmul %26, %28, %cst_24 {dimension_numbers = #tpu.dot_dimension_numbers<[1], [0], [0], [1], [0, 0, 1, 1], [], []>} : vector<64x128xbf16>, vector<128x128xbf16>, vector<64x128xf32> -> vector<64x128xf32>
    %30 = arith.addf %24, %29 : vector<64x128xf32>
    %31 = vector.extract_strided_slice %17 {offsets = [0, 2, 0], sizes = [8, 8, 128], strides = [1, 1, 1]} : vector<10x10x128xbf16> to vector<8x8x128xbf16>
    %32 = vector.shape_cast %31 : vector<8x8x128xbf16> to vector<64x128xbf16>
    %c2 = arith.constant 2 : index
    %c0_25 = arith.constant 0 : index
    %c0_26 = arith.constant 0 : index
    %33 = vector.load %arg4[%c2, %c0_25, %c0_26] : memref<9x128x128xbf16, #tpu.memory_space<vmem>>, vector<1x128x128xbf16>
    %34 = vector.shape_cast %33 : vector<1x128x128xbf16> to vector<128x128xbf16>
    %cst_27 = arith.constant dense<0.000000e+00> : vector<64x128xf32>
    %35 = tpu.matmul %32, %34, %cst_27 {dimension_numbers = #tpu.dot_dimension_numbers<[1], [0], [0], [1], [0, 0, 1, 1], [], []>} : vector<64x128xbf16>, vector<128x128xbf16>, vector<64x128xf32> -> vector<64x128xf32>
    %36 = arith.addf %30, %35 : vector<64x128xf32>
    %37 = vector.extract_strided_slice %17 {offsets = [1, 0, 0], sizes = [8, 8, 128], strides = [1, 1, 1]} : vector<10x10x128xbf16> to vector<8x8x128xbf16>
    %38 = vector.shape_cast %37 : vector<8x8x128xbf16> to vector<64x128xbf16>
    %c3 = arith.constant 3 : index
    %c0_28 = arith.constant 0 : index
    %c0_29 = arith.constant 0 : index
    %39 = vector.load %arg4[%c3, %c0_28, %c0_29] : memref<9x128x128xbf16, #tpu.memory_space<vmem>>, vector<1x128x128xbf16>
    %40 = vector.shape_cast %39 : vector<1x128x128xbf16> to vector<128x128xbf16>
    %cst_30 = arith.constant dense<0.000000e+00> : vector<64x128xf32>
    %41 = tpu.matmul %38, %40, %cst_30 {dimension_numbers = #tpu.dot_dimension_numbers<[1], [0], [0], [1], [0, 0, 1, 1], [], []>} : vector<64x128xbf16>, vector<128x128xbf16>, vector<64x128xf32> -> vector<64x128xf32>
    %42 = arith.addf %36, %41 : vector<64x128xf32>
    %43 = vector.extract_strided_slice %17 {offsets = [1, 1, 0], sizes = [8, 8, 128], strides = [1, 1, 1]} : vector<10x10x128xbf16> to vector<8x8x128xbf16>
    %44 = vector.shape_cast %43 : vector<8x8x128xbf16> to vector<64x128xbf16>
    %c4 = arith.constant 4 : index
    %c0_31 = arith.constant 0 : index
    %c0_32 = arith.constant 0 : index
    %45 = vector.load %arg4[%c4, %c0_31, %c0_32] : memref<9x128x128xbf16, #tpu.memory_space<vmem>>, vector<1x128x128xbf16>
    %46 = vector.shape_cast %45 : vector<1x128x128xbf16> to vector<128x128xbf16>
    %cst_33 = arith.constant dense<0.000000e+00> : vector<64x128xf32>
    %47 = tpu.matmul %44, %46, %cst_33 {dimension_numbers = #tpu.dot_dimension_numbers<[1], [0], [0], [1], [0, 0, 1, 1], [], []>} : vector<64x128xbf16>, vector<128x128xbf16>, vector<64x128xf32> -> vector<64x128xf32>
    %48 = arith.addf %42, %47 : vector<64x128xf32>
    %49 = vector.extract_strided_slice %17 {offsets = [1, 2, 0], sizes = [8, 8, 128], strides = [1, 1, 1]} : vector<10x10x128xbf16> to vector<8x8x128xbf16>
    %50 = vector.shape_cast %49 : vector<8x8x128xbf16> to vector<64x128xbf16>
    %c5 = arith.constant 5 : index
    %c0_34 = arith.constant 0 : index
    %c0_35 = arith.constant 0 : index
    %51 = vector.load %arg4[%c5, %c0_34, %c0_35] : memref<9x128x128xbf16, #tpu.memory_space<vmem>>, vector<1x128x128xbf16>
    %52 = vector.shape_cast %51 : vector<1x128x128xbf16> to vector<128x128xbf16>
    %cst_36 = arith.constant dense<0.000000e+00> : vector<64x128xf32>
    %53 = tpu.matmul %50, %52, %cst_36 {dimension_numbers = #tpu.dot_dimension_numbers<[1], [0], [0], [1], [0, 0, 1, 1], [], []>} : vector<64x128xbf16>, vector<128x128xbf16>, vector<64x128xf32> -> vector<64x128xf32>
    %54 = arith.addf %48, %53 : vector<64x128xf32>
    %55 = vector.extract_strided_slice %17 {offsets = [2, 0, 0], sizes = [8, 8, 128], strides = [1, 1, 1]} : vector<10x10x128xbf16> to vector<8x8x128xbf16>
    %56 = vector.shape_cast %55 : vector<8x8x128xbf16> to vector<64x128xbf16>
    %c6 = arith.constant 6 : index
    %c0_37 = arith.constant 0 : index
    %c0_38 = arith.constant 0 : index
    %57 = vector.load %arg4[%c6, %c0_37, %c0_38] : memref<9x128x128xbf16, #tpu.memory_space<vmem>>, vector<1x128x128xbf16>
    %58 = vector.shape_cast %57 : vector<1x128x128xbf16> to vector<128x128xbf16>
    %cst_39 = arith.constant dense<0.000000e+00> : vector<64x128xf32>
    %59 = tpu.matmul %56, %58, %cst_39 {dimension_numbers = #tpu.dot_dimension_numbers<[1], [0], [0], [1], [0, 0, 1, 1], [], []>} : vector<64x128xbf16>, vector<128x128xbf16>, vector<64x128xf32> -> vector<64x128xf32>
    %60 = arith.addf %54, %59 : vector<64x128xf32>
    %61 = vector.extract_strided_slice %17 {offsets = [2, 1, 0], sizes = [8, 8, 128], strides = [1, 1, 1]} : vector<10x10x128xbf16> to vector<8x8x128xbf16>
    %62 = vector.shape_cast %61 : vector<8x8x128xbf16> to vector<64x128xbf16>
    %c7 = arith.constant 7 : index
    %c0_40 = arith.constant 0 : index
    %c0_41 = arith.constant 0 : index
    %63 = vector.load %arg4[%c7, %c0_40, %c0_41] : memref<9x128x128xbf16, #tpu.memory_space<vmem>>, vector<1x128x128xbf16>
    %64 = vector.shape_cast %63 : vector<1x128x128xbf16> to vector<128x128xbf16>
    %cst_42 = arith.constant dense<0.000000e+00> : vector<64x128xf32>
    %65 = tpu.matmul %62, %64, %cst_42 {dimension_numbers = #tpu.dot_dimension_numbers<[1], [0], [0], [1], [0, 0, 1, 1], [], []>} : vector<64x128xbf16>, vector<128x128xbf16>, vector<64x128xf32> -> vector<64x128xf32>
    %66 = arith.addf %60, %65 : vector<64x128xf32>
    %67 = vector.extract_strided_slice %17 {offsets = [2, 2, 0], sizes = [8, 8, 128], strides = [1, 1, 1]} : vector<10x10x128xbf16> to vector<8x8x128xbf16>
    %68 = vector.shape_cast %67 : vector<8x8x128xbf16> to vector<64x128xbf16>
    %c8 = arith.constant 8 : index
    %c0_43 = arith.constant 0 : index
    %c0_44 = arith.constant 0 : index
    %69 = vector.load %arg4[%c8, %c0_43, %c0_44] : memref<9x128x128xbf16, #tpu.memory_space<vmem>>, vector<1x128x128xbf16>
    %70 = vector.shape_cast %69 : vector<1x128x128xbf16> to vector<128x128xbf16>
    %cst_45 = arith.constant dense<0.000000e+00> : vector<64x128xf32>
    %71 = tpu.matmul %68, %70, %cst_45 {dimension_numbers = #tpu.dot_dimension_numbers<[1], [0], [0], [1], [0, 0, 1, 1], [], []>} : vector<64x128xbf16>, vector<128x128xbf16>, vector<64x128xf32> -> vector<64x128xf32>
    %72 = arith.addf %66, %71 : vector<64x128xf32>
    %73 = vector.shape_cast %72 : vector<64x128xf32> to vector<1x8x8x128xf32>
    %74 = arith.truncf %73 : vector<1x8x8x128xf32> to vector<1x8x8x128xbf16>
    %c0_46 = arith.constant 0 : index
    %c0_47 = arith.constant 0 : index
    %c0_48 = arith.constant 0 : index
    %c0_49 = arith.constant 0 : index
    %75 = vector.load %arg5[%c0_46, %c0_47, %c0_48, %c0_49] : memref<1x8x8x128xbf16, #tpu.memory_space<vmem>>, vector<1x8x8x128xbf16>
    tpu.vector_store %arg5[%c0_46, %c0_47, %c0_48, %c0_49], %74 {strides = array<i32>} : memref<1x8x8x128xbf16, #tpu.memory_space<vmem>>, vector<1x8x8x128xbf16>,
    %cst_50 = arith.constant dense<0.000000e+00> : vector<128xf32>
    %76 = vector.multi_reduction <add>, %72, %cst_50 [0] : vector<64x128xf32> to vector<128xf32>
    %77 = vector.shape_cast %76 : vector<128xf32> to vector<1x128xf32>
    %78 = vector.shape_cast %77 : vector<1x128xf32> to vector<1x1x128xf32>
    %c0_51 = arith.constant 0 : index
    %c0_52 = arith.constant 0 : index
    %c0_53 = arith.constant 0 : index
    %79 = vector.load %arg6[%c0_51, %c0_52, %c0_53] : memref<1x1x128xf32, #tpu.memory_space<vmem>>, vector<1x1x128xf32>
    tpu.vector_store %arg6[%c0_51, %c0_52, %c0_53], %78 {strides = array<i32>} : memref<1x1x128xf32, #tpu.memory_space<vmem>>, vector<1x1x128xf32>,
    %80 = arith.mulf %72, %72 : vector<64x128xf32>
    %cst_54 = arith.constant dense<0.000000e+00> : vector<128xf32>
    %81 = vector.multi_reduction <add>, %80, %cst_54 [0] : vector<64x128xf32> to vector<128xf32>
    %82 = vector.shape_cast %81 : vector<128xf32> to vector<1x128xf32>
    %83 = vector.shape_cast %82 : vector<1x128xf32> to vector<1x1x128xf32>
    %c0_55 = arith.constant 0 : index
    %c0_56 = arith.constant 0 : index
    %c0_57 = arith.constant 0 : index
    %84 = vector.load %arg7[%c0_55, %c0_56, %c0_57] : memref<1x1x128xf32, #tpu.memory_space<vmem>>, vector<1x1x128xf32>
    tpu.vector_store %arg7[%c0_55, %c0_56, %c0_57], %83 {strides = array<i32>} : memref<1x1x128xf32, #tpu.memory_space<vmem>>, vector<1x1x128xf32>,
    return
  }
  func.func @transform_0(%arg0: i32) -> (i32, i32, i32, i32) {
    %c0_i32 = arith.constant 0 : i32
    %c0_i32_0 = arith.constant 0 : i32
    %c0_i32_1 = arith.constant 0 : i32
    %c0_i32_2 = arith.constant 0 : i32
    return %arg0, %c0_i32, %c0_i32_0, %c0_i32_1 : i32, i32, i32, i32
  }
  func.func @transform_1(%arg0: i32) -> (i32, i32) {
    %c0_i32 = arith.constant 0 : i32
    %c0_i32_0 = arith.constant 0 : i32
    %c0_i32_1 = arith.constant 0 : i32
    return %c0_i32, %c0_i32_0 : i32, i32
  }
  func.func @transform_2(%arg0: i32) -> (i32, i32) {
    %c0_i32 = arith.constant 0 : i32
    %c0_i32_0 = arith.constant 0 : i32
    %c0_i32_1 = arith.constant 0 : i32
    return %c0_i32, %c0_i32_0 : i32, i32
  }
  func.func @transform_3(%arg0: i32) -> (i32, i32, i32) {
    %c0_i32 = arith.constant 0 : i32
    %c0_i32_0 = arith.constant 0 : i32
    %c0_i32_1 = arith.constant 0 : i32
    %c0_i32_2 = arith.constant 0 : i32
    return %c0_i32, %c0_i32_0, %c0_i32_1 : i32, i32, i32
  }
  func.func @transform_4(%arg0: i32) -> (i32, i32, i32, i32) {
    %c0_i32 = arith.constant 0 : i32
    %c0_i32_0 = arith.constant 0 : i32
    %c0_i32_1 = arith.constant 0 : i32
    %c0_i32_2 = arith.constant 0 : i32
    return %arg0, %c0_i32, %c0_i32_0, %c0_i32_1 : i32, i32, i32, i32
  }
  func.func @transform_5(%arg0: i32) -> (i32, i32, i32) {
    %c0_i32 = arith.constant 0 : i32
    %c0_i32_0 = arith.constant 0 : i32
    %c0_i32_1 = arith.constant 0 : i32
    return %arg0, %c0_i32, %c0_i32_0 : i32, i32, i32
  }
  func.func @transform_6(%arg0: i32) -> (i32, i32, i32) {
    %c0_i32 = arith.constant 0 : i32
    %c0_i32_0 = arith.constant 0 : i32
    %c0_i32_1 = arith.constant 0 : i32
    return %arg0, %c0_i32, %c0_i32_0 : i32, i32, i32
  }
}

module attributes {stable_mosaic.version = 11 : i64} {
  func.func @_bn_add_relu_kernel(%arg0: i32, %arg1: memref<1x8x8x128xbf16, #tpu.memory_space<vmem>>, %arg2: memref<1x128xf32, #tpu.memory_space<vmem>>, %arg3: memref<1x128xf32, #tpu.memory_space<vmem>>, %arg4: memref<1x8x8x128xbf16, #tpu.memory_space<vmem>>, %arg5: memref<1x128xf32, #tpu.memory_space<vmem>>, %arg6: memref<1x128xf32, #tpu.memory_space<vmem>>, %arg7: memref<1x8x8x8xbf16, #tpu.memory_space<vmem>>) attributes {dimension_semantics = [#tpu.dimension_semantics<parallel>], iteration_bounds = array<i64: 2>, scalar_prefetch = 0 : i64, scratch_operands = 0 : i64, tpu.core_type = #tpu.core_type<tc>, window_params = [{transform_indices = @transform_0, window_bounds = array<i64: 1, 8, 8, 128>}, {pipeline_mode = #tpu.pipeline_mode<synchronous>, transform_indices = @transform_1, window_bounds = array<i64: 1, 128>}, {pipeline_mode = #tpu.pipeline_mode<synchronous>, transform_indices = @transform_2, window_bounds = array<i64: 1, 128>}, {transform_indices = @transform_3, window_bounds = array<i64: 1, 8, 8, 128>}, {pipeline_mode = #tpu.pipeline_mode<synchronous>, transform_indices = @transform_4, window_bounds = array<i64: 1, 128>}, {pipeline_mode = #tpu.pipeline_mode<synchronous>, transform_indices = @transform_5, window_bounds = array<i64: 1, 128>}, {transform_indices = @transform_6, window_bounds = array<i64: 1, 8, 8, 8>}]} {
    %c0 = arith.constant 0 : index
    %c0_0 = arith.constant 0 : index
    %c0_1 = arith.constant 0 : index
    %c0_2 = arith.constant 0 : index
    %0 = vector.load %arg1[%c0, %c0_0, %c0_1, %c0_2] : memref<1x8x8x128xbf16, #tpu.memory_space<vmem>>, vector<1x8x8x128xbf16>
    %1 = vector.shape_cast %0 : vector<1x8x8x128xbf16> to vector<8x8x128xbf16>
    %2 = arith.extf %1 : vector<8x8x128xbf16> to vector<8x8x128xf32>
    %c0_3 = arith.constant 0 : index
    %c0_4 = arith.constant 0 : index
    %3 = vector.load %arg2[%c0_3, %c0_4] : memref<1x128xf32, #tpu.memory_space<vmem>>, vector<1x128xf32>
    %4 = vector.shape_cast %3 : vector<1x128xf32> to vector<1x1x128xf32>
    %5 = vector.broadcast %4 : vector<1x1x128xf32> to vector<8x8x128xf32>
    %6 = arith.mulf %2, %5 : vector<8x8x128xf32>
    %c0_5 = arith.constant 0 : index
    %c0_6 = arith.constant 0 : index
    %7 = vector.load %arg3[%c0_5, %c0_6] : memref<1x128xf32, #tpu.memory_space<vmem>>, vector<1x128xf32>
    %8 = vector.shape_cast %7 : vector<1x128xf32> to vector<1x1x128xf32>
    %9 = vector.broadcast %8 : vector<1x1x128xf32> to vector<8x8x128xf32>
    %10 = arith.addf %6, %9 : vector<8x8x128xf32>
    %c0_7 = arith.constant 0 : index
    %c0_8 = arith.constant 0 : index
    %c0_9 = arith.constant 0 : index
    %c0_10 = arith.constant 0 : index
    %11 = vector.load %arg4[%c0_7, %c0_8, %c0_9, %c0_10] : memref<1x8x8x128xbf16, #tpu.memory_space<vmem>>, vector<1x8x8x128xbf16>
    %12 = vector.shape_cast %11 : vector<1x8x8x128xbf16> to vector<8x8x128xbf16>
    %13 = arith.extf %12 : vector<8x8x128xbf16> to vector<8x8x128xf32>
    %c0_11 = arith.constant 0 : index
    %c0_12 = arith.constant 0 : index
    %14 = vector.load %arg5[%c0_11, %c0_12] : memref<1x128xf32, #tpu.memory_space<vmem>>, vector<1x128xf32>
    %15 = vector.shape_cast %14 : vector<1x128xf32> to vector<1x1x128xf32>
    %16 = vector.broadcast %15 : vector<1x1x128xf32> to vector<8x8x128xf32>
    %17 = arith.mulf %13, %16 : vector<8x8x128xf32>
    %c0_13 = arith.constant 0 : index
    %c0_14 = arith.constant 0 : index
    %18 = vector.load %arg6[%c0_13, %c0_14] : memref<1x128xf32, #tpu.memory_space<vmem>>, vector<1x128xf32>
    %19 = vector.shape_cast %18 : vector<1x128xf32> to vector<1x1x128xf32>
    %20 = vector.broadcast %19 : vector<1x1x128xf32> to vector<8x8x128xf32>
    %21 = arith.addf %17, %20 : vector<8x8x128xf32>
    %22 = arith.addf %10, %21 : vector<8x8x128xf32>
    %cst = arith.constant 0.000000e+00 : f32
    %23 = vector.broadcast %cst : f32 to vector<8x8x128xf32>
    %24 = arith.maximumf %22, %23 : vector<8x8x128xf32>
    %25 = vector.extract_strided_slice %24 {offsets = [0, 0, 0], sizes = [8, 8, 8], strides = [1, 1, 1]} : vector<8x8x128xf32> to vector<8x8x8xf32>
    %26 = arith.truncf %25 : vector<8x8x8xf32> to vector<8x8x8xbf16>
    %c0_15 = arith.constant 0 : index
    %c0_16 = arith.constant 0 : index
    %c0_17 = arith.constant 0 : index
    %c0_18 = arith.constant 0 : index
    %27 = vector.load %arg7[%c0_15, %c0_16, %c0_17, %c0_18] : memref<1x8x8x8xbf16, #tpu.memory_space<vmem>>, vector<1x8x8x8xbf16>
    %28 = vector.shape_cast %27 : vector<1x8x8x8xbf16> to vector<8x8x8xbf16>
    %29 = vector.shape_cast %26 : vector<8x8x8xbf16> to vector<1x8x8x8xbf16>
    tpu.vector_store %arg7[%c0_15, %c0_16, %c0_17, %c0_18], %29 {strides = array<i32>} : memref<1x8x8x8xbf16, #tpu.memory_space<vmem>>, vector<1x8x8x8xbf16>,
    return
  }
  func.func @transform_0(%arg0: i32) -> (i32, i32, i32, i32) {
    %c0_i32 = arith.constant 0 : i32
    %c0_i32_0 = arith.constant 0 : i32
    %c0_i32_1 = arith.constant 0 : i32
    %c0_i32_2 = arith.constant 0 : i32
    return %arg0, %c0_i32, %c0_i32_0, %c0_i32_1 : i32, i32, i32, i32
  }
  func.func @transform_1(%arg0: i32) -> (i32, i32) {
    %c0_i32 = arith.constant 0 : i32
    %c0_i32_0 = arith.constant 0 : i32
    %c0_i32_1 = arith.constant 0 : i32
    return %c0_i32, %c0_i32_0 : i32, i32
  }
  func.func @transform_2(%arg0: i32) -> (i32, i32) {
    %c0_i32 = arith.constant 0 : i32
    %c0_i32_0 = arith.constant 0 : i32
    %c0_i32_1 = arith.constant 0 : i32
    return %c0_i32, %c0_i32_0 : i32, i32
  }
  func.func @transform_3(%arg0: i32) -> (i32, i32, i32, i32) {
    %c0_i32 = arith.constant 0 : i32
    %c0_i32_0 = arith.constant 0 : i32
    %c0_i32_1 = arith.constant 0 : i32
    %c0_i32_2 = arith.constant 0 : i32
    return %arg0, %c0_i32, %c0_i32_0, %c0_i32_1 : i32, i32, i32, i32
  }
  func.func @transform_4(%arg0: i32) -> (i32, i32) {
    %c0_i32 = arith.constant 0 : i32
    %c0_i32_0 = arith.constant 0 : i32
    %c0_i32_1 = arith.constant 0 : i32
    return %c0_i32, %c0_i32_0 : i32, i32
  }
  func.func @transform_5(%arg0: i32) -> (i32, i32) {
    %c0_i32 = arith.constant 0 : i32
    %c0_i32_0 = arith.constant 0 : i32
    %c0_i32_1 = arith.constant 0 : i32
    return %c0_i32, %c0_i32_0 : i32, i32
  }
  func.func @transform_6(%arg0: i32) -> (i32, i32, i32, i32) {
    %c0_i32 = arith.constant 0 : i32
    %c0_i32_0 = arith.constant 0 : i32
    %c0_i32_1 = arith.constant 0 : i32
    %c0_i32_2 = arith.constant 0 : i32
    return %arg0, %c0_i32, %c0_i32_0, %c0_i32_1 : i32, i32, i32, i32
  }
}

</mosaic_0001>

<bundles_post_ra>
// kernel: res18_block_forward.6
= control target key start
LH: loop header
LB: loop body
LE: loop exit
PB: predicated region body
PF: predicated region fallthrough
CT: control target
= control target key end

     0   :  { %s601_s15 = smov 0   ;;  %s633_s0 = inlined_call_operand.vmem [shape: bf16[2,9,9,16], index: 0, kind: input, shape index: {}]   ;;  %s634_s1 = inlined_call_operand.vmem [shape: bf16[1,4,128], index: 1, kind: input, shape index: {}]   ;;  %s635_s2 = inlined_call_operand.vmem [shape: bf16[2,8,8,128], index: 2, kind: output, shape index: {0}]   ;;  %s636_s3 = inlined_call_operand.vmem [shape: f32[2,1,128], index: 3, kind: output, shape index: {1}]   ;;  %s637_s4 = inlined_call_operand.vmem [shape: f32[2,1,128], index: 4, kind: output, shape index: {2}]  }
   0x1 LB: > { %s492_s16 = sadd.s32 4294967295, %s573_s15   ;;  %p496_p0 = scmp.ge.s32.totalorder %s573_s15, 1  ;;  %s573_s15 = sphi %s601_s15, %s15_s15  }
   0x2   : > { %p167_p1 = scmp.lt.s32.totalorder %s573_s15, 3 }
   0x4   : > { %p168_p2 = pnand %p496_p0, %p167_p1 }
   0x5   : > { %p199_p3 = scmp.lt.s32.totalorder (!%p168_p2), %s492_s16, 1  ;;  %s575_s23 = smov (!%p168_p2), 116  }
   0x6   : > { %171 = sbr.rel (%p168_p2) target bundleno = 363 (0x16b), region = 28 }
   0xb   : > { %v224_v0 = vld [vmem:[%s634_s1] sm:$0x3]  ;;  %vm266_vm0 = vcmask 1041408   ;;  %s639_s16 = smov (!%p199_p3, %s492_s16), 1  ;;  %vm253_vm1 = vcmask 31744  }
   0xc   : > { %551 = vmatprep.subr.msk.bf16.mxu0 %vm266_vm0, %v224_v0  ;;  %v268_v1 = vsel %vm266_vm0, %v224_v0, 0  ;;  %552 = vmatprep.subr.msk.bf16.mxu1 %vm266_vm0, %v224_v0  ;;  %s553_s19 = smul.u32 72, %s639_s16  ;;  %s510_s24 = sshll.u32 %s639_s16, 5 }
   0xd   : > { %540 = vmatpush3.bf16.msra.mxu0 %v268_v1  ;;  %550 = vmatpush3.bf16.msra.mxu1 %v268_v1  ;;  %s208_s27 = scalar_lea.vmem %s635_s2, %s510_s24  ;;  %s211_s30 = scalar_lea.vmem %s636_s3, %s639_s16 }
   0xe   : > { %s203_s22 = scalar_lea.vmem %s633_s0, %s553_s19  ;;  %s214_s7 = scalar_lea.vmem %s637_s4, %s639_s16 }
   0xf   : > { %v563_v2 = vld [vmem:[%s203_s22] ss:$8 sps:$4 sm:$0xff]   ;;  %v565_v4 = vld [vmem:[%s203_s22 + $0x10] ss:$8 sps:$4 sm:$0xff]  }
  0x10   : > { %v564_v3 = vld [vmem:[%s203_s22 + $0x20] ss:$8 sps:$4 sm:$0xff]   ;;  %245 = vrot.lane.b32.xlu0 %v563_v2, %s575_s23  ;;  %v566_v5 = vld [vmem:[%s203_s22 + $0x30] ss:$8 sps:$4 sm:$0xff]  }
  0x11   : > { %249 = vrot.lane.b32.xlu1 %v564_v3, %s575_s23 }
  0x14   : > { %247 = vrot.lane.b32.xlu0 %v565_v4, %s575_s23 }
  0x15   : > { %251 = vrot.lane.b32.xlu1 %v566_v5, %s575_s23 }
  0x82   : > { %v246_v6 = vpop.permute.xlu0 %245 }
  0x83   : > { %541 = vmatprep.mubr.msk.bf16.mxu0 %vm253_vm1, %v246_v6  ;;  %v250_v7 = vpop.permute.xlu1 %249 }
  0x84   : > { %545 = vmatprep.mubr.msk.bf16.mxu1 %vm253_vm1, %v250_v7 }
  0x86   : > { %v248_v8 = vpop.permute.xlu0 %247 }
  0x87   : > { %542 = vmatmul.mubr.msk.bf16.vlgmr.msra.gmra.mxu0 %vm253_vm1, %v248_v8  ;;  %v252_v9 = vpop.permute.xlu1 %251 }
  0x88   : > { %546 = vmatmul.mubr.msk.bf16.vlgmr.msra.gmra.mxu1 %vm253_vm1, %v252_v9 }
 0x147   : > { %v543_v10 = vpop.f32.mrf.mxu0 }
 0x148   : > { %v547_v11 = vpop.f32.mrf.mxu1  ;;  %v367_v25 = vmul.f32 %v543_v10, %v543_v10 }
 0x149   : > { %v304_v12 = vpop.f32.mrf.mxu0  ;;  %v371_v37 = vmul.f32 %v547_v11, %v547_v11 }
 0x14a   : > { %v320_v13 = vpop.f32.mrf.mxu1  ;;  %v365_v19 = vmul.f32 %v304_v12, %v304_v12 }
 0x14b   : > { %v544_v14 = vpop.f32.mrf.mxu0  ;;  %v369_v31 = vmul.f32 %v320_v13, %v320_v13 }
 0x14c   : > { %v519_v15 = vpack.c.bf16 %v544_v14, %v543_v10  ;;  %v548_v16 = vpop.f32.mrf.mxu1  ;;  %v368_v28 = vmul.f32 %v544_v14, %v544_v14 }
 0x14d   : > { %v307_v17 = vpop.f32.mrf.mxu0  ;;  %v529_v18 = vpack.c.bf16 %v548_v16, %v547_v11  ;;  %v372_v40 = vmul.f32 %v548_v16, %v548_v16 }
 0x14e   : > { %531 = vst [vmem:[%s208_s27 + $0x8] sm:$0xff] %v519_v15   ;;  %v514_v20 = vpack.c.bf16 %v307_v17, %v304_v12  ;;  %v351_v21 = vadd.f32 %v307_v17, %v304_v12  ;;  %v366_v22 = vmul.f32 %v307_v17, %v307_v17  ;;  %v323_v23 = vpop.f32.mrf.mxu1 }
 0x14f   : > { %533 = vst [vmem:[%s208_s27 + $0x18] sm:$0xff] %v529_v18   ;;  %v524_v24 = vpack.c.bf16 %v323_v23, %v320_v13  ;;  %v370_v35 = vmul.f32 %v323_v23, %v323_v23 }
 0x150   : > { %515 = vst [vmem:[%s208_s27] sm:$0xff] %v514_v20   ;;  %v352_v26 = vadd.f32 %v543_v10, %v351_v21  ;;  %v373_v27 = vadd.f32 %v366_v22, %v365_v19 }
 0x151   : > { %532 = vst [vmem:[%s208_s27 + $0x10] sm:$0xff] %v524_v24  }
 0x152   : > { %v374_v29 = vadd.f32 %v373_v27, %v367_v25  ;;  %v353_v30 = vadd.f32 %v544_v14, %v352_v26 }
 0x154   : > { %v354_v32 = vadd.f32 %v353_v30, %v320_v13  ;;  %v375_v33 = vadd.f32 %v374_v29, %v368_v28 }
 0x156   : > { %v355_v34 = vadd.f32 %v354_v32, %v323_v23  ;;  %v376_v36 = vadd.f32 %v375_v33, %v369_v31 }
 0x158   : > { %v356_v38 = vadd.f32 %v547_v11, %v355_v34  ;;  %v377_v39 = vadd.f32 %v376_v36, %v370_v35 }
 0x15a   : > { %v357_v41 = vadd.f32 %v548_v16, %v356_v38  ;;  %v378_v42 = vadd.f32 %v377_v39, %v371_v37 }
 0x15c   : > { %v358_v43 = vrot.slane %v357_v41, 4  ;;  %v379_v44 = vadd.f32 %v378_v42, %v372_v40 }
 0x15e   : > { %v359_v45 = vadd.f32 %v358_v43, %v357_v41  ;;  %v380_v46 = vrot.slane %v379_v44, 4 }
 0x160   : > { %v360_v47 = vrot.slane %v359_v45, 2  ;;  %v381_v48 = vadd.f32 %v380_v46, %v379_v44 }
 0x162   : > { %v361_v49 = vadd.f32 %v360_v47, %v359_v45  ;;  %v382_v50 = vrot.slane %v381_v48, 2 }
 0x164   : > { %v362_v51 = vrot.slane %v361_v49, 1  ;;  %v383_v52 = vadd.f32 %v382_v50, %v381_v48 }
 0x166   : > { %v363_v53 = vadd.f32 %v362_v51, %v361_v49  ;;  %v384_v54 = vrot.slane %v383_v52, 1 }
 0x168   : > { %364 = vst [vmem:[%s211_s30] sm:$0x1] %v363_v53  ;;  %v385_v55 = vadd.f32 %v384_v54, %v383_v52 }
 0x16a   : > { %386 = vst [vmem:[%s214_s7] sm:$0x1] %v385_v55 }
 0x16b PF: > { %s15_s15 = sadd.s32 1, %s573_s15  }
 0x16c   : > { %p12_p4 = scmp.ge.s32.totalorder %s15_s15, 4  }
 0x16e   :  { %14 = sbr.rel (!%p12_p4) target bundleno = 1 (0x1), region = 82 }

// kernel: res18_block_forward.4
= control target key start
LH: loop header
LB: loop body
LE: loop exit
PB: predicated region body
PF: predicated region fallthrough
CT: control target
= control target key end

     0   :  { %s1695_s15 = smov 0   ;;  %s2014_s0 = inlined_call_operand.vmem [shape: bf16[2,9,9,16], index: 0, kind: input, shape index: {}]   ;;  %s2015_s1 = inlined_call_operand.vmem [shape: bf16[9,4,128], index: 1, kind: input, shape index: {}]   ;;  %s2016_s2 = inlined_call_operand.vmem [shape: bf16[2,8,8,128], index: 2, kind: output, shape index: {0}]   ;;  %s2017_s3 = inlined_call_operand.vmem [shape: f32[2,1,128], index: 3, kind: output, shape index: {1}]   ;;  %s2018_s4 = inlined_call_operand.vmem [shape: f32[2,1,128], index: 4, kind: output, shape index: {2}]  }
   0x1 LB: > { %s1398_s16 = sadd.s32 4294967295, %s1665_s15   ;;  %p1402_p0 = scmp.ge.s32.totalorder %s1665_s15, 1  ;;  %s1665_s15 = sphi %s1695_s15, %s15_s15  }
   0x2   : > { %p167_p1 = scmp.lt.s32.totalorder %s1665_s15, 3 }
   0x4   : > { %p168_p2 = pnand %p1402_p0, %p167_p1 }
   0x5   : > { %p199_p3 = scmp.lt.s32.totalorder (!%p168_p2), %s1398_s16, 1  ;;  %s1667_s27 = smov (!%p168_p2), 124  }
   0x6   : > { %171 = sbr.rel (%p168_p2) target bundleno = 425 (0x1a9), region = 28  ;;  %s1668_s28 = smov (!%p168_p2), 120  }
   0x7   : > { %s1669_s29 = smov (!%p168_p2), 116  }
   0xb   : > { %v1406_v0 = vld [vmem:[%s2015_s1 + $0x2] sm:$0x3]  ;;  %vm278_vm0 = vcmask 1041408   ;;  %s2022_s16 = smov (!%p199_p3, %s1398_s16), 1  ;;  %v1714_v2 = vld [vmem:[%s2015_s1] sm:$0x3] }
   0xc   : > { %1630 = vmatprep.subr.msk.bf16.mxu1 %vm278_vm0, %v1406_v0  ;;  %1629 = vmatprep.subr.msk.bf16.mxu0 %vm278_vm0, %v1406_v0  ;;  %v280_v1 = vsel %vm278_vm0, %v1406_v0, 0  ;;  %v1719_v3 = vld [vmem:[%s2015_s1 + $0x4] sm:$0x3]  ;;  %s1639_s23 = smul.u32 72, %s2022_s16  ;;  %vm427_vm1 = vsmask.f32 3328  ;;  %s211_s24 = scalar_lea.vmem %s2017_s3, %s2022_s16 }
   0xd   : > { %1628 = vmatpush3.bf16.msra.mxu1 %v280_v1  ;;  %1538 = vmatpush3.bf16.msra.mxu0 %v280_v1  ;;  %vm428_vm2 = vsmask.f32 7440  ;;  %vm265_vm4 = vcmask 31744   ;;  %s1468_s18 = sshll.u32 %s2022_s16, 5 }
   0xe   : > { %1631 = vmatprep.subr.msk.bf16.mxu1 %vm278_vm0, %v1714_v2  ;;  %1632 = vmatprep.subr.msk.bf16.mxu0 %vm278_vm0, %v1719_v3  ;;  %s1729_s26 = scalar_lea.vmem %s2014_s0, %s1639_s23  ;;  %vm1793_vm3 = vmor %vm427_vm1, %vm428_vm2  ;;  %s1997_s21 = scalar_lea.vmem %s2016_s2, %s1468_s18 }
   0xf   : > { %v1732_v4 = vld [vmem:[%s1729_s26 + $0x20] sm:$0xf]  ;;  %v1735_v5 = vld [vmem:[%s1729_s26 + $0x28] sm:$0xf]  ;;  %v1746_v11 = vld [vmem:[%s1729_s26 + $0x30] sm:$0xf] }
  0x10   : > { %v216_v6 = vld [vmem:[%s1729_s26] sm:$0xf]  ;;  %v1740_v7 = vcombine.low %v1732_v4, %v1735_v5  ;;  %v1743_v8 = vld [vmem:[%s1729_s26 + $0x8] sm:$0xf]  ;;  %v1752_v13 = vld [vmem:[%s1729_s26 + $0x38] sm:$0xf]  ;;  %v1885_v47 = vcombine.low %v1735_v5, %v1746_v11 }
  0x11   : > { %v431_v9 = vshrl.u32 %v216_v6, 16  ;;  %v434_v10 = vshll.u32 %v216_v6, 16  ;;  %v1749_v12 = vcombine.low %v216_v6, %v1743_v8  ;;  %v1755_v14 = vld [vmem:[%s1729_s26 + $0x10] sm:$0xf]  ;;  %v1758_v15 = vld [vmem:[%s1729_s26 + $0x18] sm:$0xf]  ;;  %v1764_v16 = vcombine.low %v1746_v11, %v1752_v13 }
  0x12   : > { %261 = vrot.lane.b32.xlu0 %v1740_v7, %s1667_s27  ;;  %v1768_v17 = vcombine.low %v1755_v14, %v1758_v15  ;;  %v217_v18 = vld [vmem:[%s1729_s26 + $0x4] sm:$0x1]  ;;  %v219_v19 = vld [vmem:[%s1729_s26 + $0xc] sm:$0x1]  ;;  %v445_v23 = vshrl.u32 %v1743_v8, 16  ;;  %v448_v24 = vshll.u32 %v1743_v8, 16 }
  0x13   : > { %v433_v20 = vrot.slane %v431_v9, 4  ;;  %v436_v21 = vrot.slane %v434_v10, 5  ;;  %257 = vrot.lane.b32.xlu1 %v1749_v12, %s1667_s27  ;;  %v440_v22 = vshll.u32 %v217_v18, 16  ;;  %v454_v25 = vshll.u32 %v219_v19, 16  ;;  %v221_v26 = vld [vmem:[%s1729_s26 + $0x14] sm:$0x1] }
  0x14   : > { %v223_v27 = vld [vmem:[%s1729_s26 + $0x1c] sm:$0x1]  ;;  %v459_v28 = vshrl.u32 %v1755_v14, 16  ;;  %v462_v29 = vshll.u32 %v1755_v14, 16  ;;  %v468_v30 = vshll.u32 %v221_v26, 16  ;;  %v447_v32 = vrot.slane %v445_v23, 4 }
  0x15   : > { %v437_v31 = vor.u32 %v436_v21, %v433_v20  ;;  %v450_v33 = vrot.slane %v448_v24, 5  ;;  %v1782_v34 = vrot.slane %v440_v22, 5  ;;  %v456_v35 = vrot.slane %v454_v25, 5  ;;  %v225_v42 = vld [vmem:[%s1729_s26 + $0x24] sm:$0x1] }
  0x16   : > { %263 = vrot.lane.b32.xlu0 %v1764_v16, %s1667_s27  ;;  %v461_v36 = vrot.slane %v459_v28, 4  ;;  %v464_v37 = vrot.slane %v462_v29, 5  ;;  %v473_v39 = vshrl.u32 %v1758_v15, 16  ;;  %v476_v40 = vshll.u32 %v1758_v15, 16  ;;  %v227_v58 = vld [vmem:[%s1729_s26 + $0x2c] sm:$0x1] }
  0x17   : > { %259 = vrot.lane.b32.xlu1 %v1768_v17, %s1667_s27  ;;  %v451_v38 = vor.u32 %v450_v33, %v447_v32  ;;  %v482_v41 = vshll.u32 %v223_v27, 16  ;;  %v470_v44 = vrot.slane %v468_v30, 5  ;;  %v487_v45 = vshrl.u32 %v1732_v4, 16  ;;  %v229_v1 = vld [vmem:[%s1729_s26 + $0x34] sm:$0x1] }
  0x18   : > { %v465_v43 = vor.u32 %v464_v37, %v461_v36  ;;  %v490_v46 = vshll.u32 %v1732_v4, 16  ;;  %v438_v48 = vrot.slane %v437_v31, 4  ;;  %v475_v50 = vrot.slane %v473_v39, 4  ;;  %v231_v24 = vld [vmem:[%s1729_s26 + $0x3c] sm:$0x1] }
  0x19   : > { %v452_v49 = vrot.slane %v451_v38, 4  ;;  %v478_v51 = vrot.slane %v476_v40, 5  ;;  %v489_v53 = vrot.slane %v487_v45, 4  ;;  %v496_v55 = vshll.u32 %v225_v42, 16  ;;  %v233_v30 = vld [vmem:[%s1729_s26 + $0x44] sm:$0x1] }
  0x1a   : > { %646 = vrot.lane.b32.xlu0 %v1749_v12, %s1668_s28  ;;  %v466_v52 = vrot.slane %v465_v43, 4  ;;  %v492_v54 = vrot.slane %v490_v46, 5  ;;  %v484_v57 = vrot.slane %v482_v41, 5  ;;  %v501_v59 = vshrl.u32 %v1735_v5, 16  ;;  %v232_v36 = vld [vmem:[%s1729_s26 + $0x40] sm:$0xf] }
  0x1b   : > { %648 = vrot.lane.b32.xlu1 %v1768_v17, %s1668_s28  ;;  %v479_v56 = vor.u32 %v478_v51, %v475_v50  ;;  %v504_v60 = vshll.u32 %v1735_v5, 16  ;;  %v1806_v61 = vsel %vm1793_vm3, %v452_v49, %v456_v35  ;;  %v498_v0 = vrot.slane %v496_v55, 5 }
  0x1c   : > { %v1810_v62 = vsel %vm1793_vm3, %v466_v52, %v470_v44  ;;  %v493_v63 = vor.u32 %v492_v54, %v489_v53  ;;  %v503_v10 = vrot.slane %v501_v59, 4  ;;  %v510_v20 = vshll.u32 %v227_v58, 16 }
  0x1d   : > { %v480_v6 = vrot.slane %v479_v56, 4  ;;  %v1458_v9 = vcombine.low %v1806_v61, %v1810_v62  ;;  %v506_v18 = vrot.slane %v504_v60, 5  ;;  %v515_v21 = vshrl.u32 %v1746_v11, 16 }
  0x1e   : > { %744 = vrot.lane.b32.xlu0 %v1749_v12, %s1669_s29  ;;  %v494_v19 = vrot.slane %v493_v63, 4  ;;  %v518_v22 = vshll.u32 %v1746_v11, 16  ;;  %v524_v25 = vshll.u32 %v229_v1, 16  ;;  %v529_v26 = vshrl.u32 %v1752_v13, 16 }
  0x1f   : > { %746 = vrot.lane.b32.xlu1 %v1768_v17, %s1669_s29  ;;  %v507_v23 = vor.u32 %v506_v18, %v503_v10  ;;  %v443_v27 = vsel %vm1793_vm3, %v438_v48, %v1782_v34  ;;  %v1828_v28 = vsel %vm1793_vm3, %v480_v6, %v484_v57  ;;  %v517_v31 = vrot.slane %v515_v21, 4  ;;  %v1433_v21 = vld [vmem:[%s2015_s1 + $0x8] sm:$0x3] }
  0x20   : > { %v1832_v29 = vsel %vm1793_vm3, %v494_v19, %v498_v0  ;;  %v512_v33 = vrot.slane %v510_v20, 5  ;;  %v520_v37 = vrot.slane %v518_v22, 5  ;;  %v531_v34 = vrot.slane %v529_v26, 4 }
  0x21   : > { %v508_v32 = vrot.slane %v507_v23, 4  ;;  %v1459_v35 = vcombine.low %v1828_v28, %v1832_v29  ;;  %v532_v38 = vshll.u32 %v1752_v13, 16  ;;  %v538_v39 = vshll.u32 %v231_v24, 16  ;;  %v1438_v23 = vld [vmem:[%s2015_s1 + $0xa] sm:$0x3] }
  0x22   : > { %650 = vrot.lane.b32.xlu0 %v1740_v7, %s1668_s28  ;;  %v1133_v40 = vshrl.u32 %v232_v36, 16  ;;  %v521_v41 = vor.u32 %v520_v37, %v517_v31  ;;  %v526_v42 = vrot.slane %v524_v25, 5  ;;  %v1136_v43 = vshll.u32 %v232_v36, 16 }
  0x23   : > { %652 = vrot.lane.b32.xlu1 %v1764_v16, %s1668_s28  ;;  %v1142_v44 = vshll.u32 %v233_v30, 16  ;;  %v534_v45 = vrot.slane %v532_v38, 5  ;;  %v1420_v50 = vcombine.low %v443_v27, %v1806_v61  ;;  %v1421_v51 = vcombine.low %v1810_v62, %v1828_v28 }
  0x24   : > { %v1135_v46 = vrot.slane %v1133_v40, 4  ;;  %v522_v48 = vrot.slane %v521_v41, 4  ;;  %v1138_v49 = vrot.slane %v1136_v43, 5  ;;  %v540_v53 = vrot.slane %v538_v39, 5 }
  0x25   : > { %v535_v52 = vor.u32 %v534_v45, %v531_v34  ;;  %v1852_v54 = vsel %vm1793_vm3, %v508_v32, %v512_v33  ;;  %v1144_v57 = vrot.slane %v1142_v44, 5  ;;  %v1874_v18 = vcombine.low %v1743_v8, %v1755_v14  ;;  %v1457_v32 = vld [vmem:[%s2015_s1 + $0x10] sm:$0x3] }
  0x26   : > { %748 = vrot.lane.b32.xlu0 %v1740_v7, %s1669_s29  ;;  %v1856_v55 = vsel %vm1793_vm3, %v522_v48, %v526_v42  ;;  %v1139_v56 = vor.u32 %v1138_v49, %v1135_v46  ;;  %v1422_v63 = vcombine.low %v1832_v29, %v1852_v54  ;;  %v1879_v19 = vcombine.low %v1758_v15, %v1732_v4  ;;  %v1428_v15 = vld [vmem:[%s2015_s1 + $0x6] sm:$0x3] }
  0x27   : > { %750 = vrot.lane.b32.xlu1 %v1764_v16, %s1669_s29  ;;  %v536_v58 = vrot.slane %v535_v52, 4  ;;  %v1460_v59 = vcombine.low %v1852_v54, %v1856_v55  ;;  %v1890_v20 = vcombine.low %v1752_v13, %v232_v36  ;;  %v360_v5 = vsel %vm278_vm0, %v1714_v2, 0 }
  0x28   : > { %v1140_v60 = vrot.slane %v1139_v56, 4  ;;  %v569_v13 = vsel %vm278_vm0, %v1719_v3, 0  ;;  %v667_v2 = vsel %vm278_vm0, %v1428_v15, 0  ;;  %v765_v22 = vsel %vm278_vm0, %v1433_v21, 0 }
  0x29   : > { %v541_v0 = vsel %vm1793_vm3, %v536_v58, %v540_v53  ;;  %v1166_v38 = vsel %vm278_vm0, %v1457_v32, 0 }
  0x2a   : > { %842 = vrot.lane.b32.xlu0 %v1420_v50, %s1668_s28  ;;  %v1423_v1 = vcombine.low %v1856_v55, %v541_v0  ;;  %v1145_v6 = vsel %vm1793_vm3, %v1140_v60, %v1144_v57 }
  0x2b   : > { %844 = vrot.lane.b32.xlu1 %v1421_v51, %s1668_s28  ;;  %v1869_v10 = vcombine.low %v541_v0, %v1145_v6 }
  0x2e   : > { %846 = vrot.lane.b32.xlu0 %v1422_v63, %s1668_s28 }
  0x2f   : > { %848 = vrot.lane.b32.xlu1 %v1423_v1, %s1668_s28 }
  0x32   : > { %1036 = vrot.lane.b32.xlu0 %v1874_v18, %s1667_s27 }
  0x33   : > { %1038 = vrot.lane.b32.xlu1 %v1879_v19, %s1667_s27 }
  0x36   : > { %1040 = vrot.lane.b32.xlu0 %v1885_v47, %s1667_s27 }
  0x37   : > { %1042 = vrot.lane.b32.xlu1 %v1890_v20, %s1667_s27  ;;  %s214_s27 = scalar_lea.vmem %s2018_s4, %s2022_s16 }
  0x84   : > { %v262_v4 = vpop.permute.xlu0 %261 }
  0x85   : > { %v258_v8 = vpop.permute.xlu1 %257  ;;  %1543 = vmatprep.mubr.msk.bf16.mxu1 %vm265_vm4, %v262_v4 }
  0x86   : > { %1539 = vmatprep.mubr.msk.bf16.mxu0 %vm265_vm4, %v258_v8 }
  0x88   : > { %v264_v11 = vpop.permute.xlu0 %263 }
  0x89   : > { %v260_v14 = vpop.permute.xlu1 %259  ;;  %1544 = vmatmul.mubr.msk.bf16.vlgmr.msra.gmra.mxu1 %vm265_vm4, %v264_v11 }
  0x8a   : > { %1540 = vmatmul.mubr.msk.bf16.vlgmr.msra.gmra.mxu0 %vm265_vm4, %v260_v14  ;;  %1548 = vmatpush3.bf16.msra.mxu1 %v360_v5 }
  0x8b   : > { %1558 = vmatpush3.bf16.msra.mxu0 %v569_v13  ;;  %1549 = vmatprep.mubr.msk.bf16.mxu1 %vm265_vm4, %v1749_v12  ;;  %v1443_v12 = vld [vmem:[%s2015_s1 + $0xc] sm:$0x3] }
  0x8c   : > { %1559 = vmatprep.mubr.msk.bf16.mxu0 %vm265_vm4, %v1420_v50  ;;  %1633 = vmatprep.subr.msk.bf16.mxu1 %vm278_vm0, %v1428_v15  ;;  %v647_v3 = vpop.permute.xlu0 %646  ;;  %v959_v27 = vsel %vm278_vm0, %v1443_v12, 0 }
  0x8d   : > { %1634 = vmatprep.subr.msk.bf16.mxu0 %vm278_vm0, %v1433_v21 }
  0x90   : > { %v745_v24 = vpop.permute.xlu0 %744 }
  0x91   : > { %1550 = vmatmul.mubr.msk.bf16.vlgmr.msra.gmra.mxu1 %vm265_vm4, %v1768_v17  ;;  %v649_v17 = vpop.permute.xlu1 %648 }
  0x92   : > { %1560 = vmatmul.mubr.msk.bf16.vlgmr.msra.gmra.mxu0 %vm265_vm4, %v1421_v51  ;;  %1568 = vmatpush3.bf16.msra.mxu1 %v667_v2 }
  0x93   : > { %1578 = vmatpush3.bf16.msra.mxu0 %v765_v22  ;;  %1553 = vmatprep.mubr.msk.bf16.mxu1 %vm265_vm4, %v1740_v7  ;;  %v863_v7 = vsel %vm278_vm0, %v1438_v23, 0 }
  0x94   : > { %1563 = vmatprep.mubr.msk.bf16.mxu0 %vm265_vm4, %v1422_v63  ;;  %1635 = vmatprep.subr.msk.bf16.mxu1 %vm278_vm0, %v1438_v23  ;;  %v651_v26 = vpop.permute.xlu0 %650 }
  0x95   : > { %1636 = vmatprep.subr.msk.bf16.mxu0 %vm278_vm0, %v1443_v12  ;;  %v747_v25 = vpop.permute.xlu1 %746 }
  0x98   : > { %v749_v31 = vpop.permute.xlu0 %748 }
  0x99   : > { %1554 = vmatmul.mubr.msk.bf16.gmra.mxu1 %vm265_vm4, %v1764_v16  ;;  %v653_v30 = vpop.permute.xlu1 %652  ;;  %v1452_v16 = vld [vmem:[%s2015_s1 + $0xe] sm:$0x3] }
  0x9a   : > { %1564 = vmatmul.mubr.msk.bf16.gmra.mxu0 %vm265_vm4, %v1423_v1  ;;  %1569 = vmatprep.mubr.msk.bf16.mxu1 %vm265_vm4, %v647_v3  ;;  %v1057_v34 = vsel %vm278_vm0, %v1452_v16, 0 }
  0x9b   : > { %1579 = vmatprep.mubr.msk.bf16.mxu0 %vm265_vm4, %v745_v24 }
  0x9c   : > { %v843_v36 = vpop.permute.xlu0 %842 }
  0x9d   : > { %v751_v33 = vpop.permute.xlu1 %750 }
  0xa0   : > { %v847_v39 = vpop.permute.xlu0 %846 }
  0xa1   : > { %1570 = vmatmul.mubr.msk.bf16.vlgmr.msra.gmra.mxu1 %vm265_vm4, %v649_v17  ;;  %v845_v37 = vpop.permute.xlu1 %844 }
  0xa2   : > { %1580 = vmatmul.mubr.msk.bf16.vlgmr.msra.gmra.mxu0 %vm265_vm4, %v747_v25  ;;  %1588 = vmatpush3.bf16.msra.mxu1 %v863_v7 }
  0xa3   : > { %1598 = vmatpush3.bf16.msra.mxu0 %v959_v27  ;;  %1573 = vmatprep.mubr.msk.bf16.mxu1 %vm265_vm4, %v651_v26 }
  0xa4   : > { %1583 = vmatprep.mubr.msk.bf16.mxu0 %vm265_vm4, %v749_v31  ;;  %1637 = vmatprep.subr.msk.bf16.mxu1 %vm278_vm0, %v1452_v16  ;;  %v1037_v41 = vpop.permute.xlu0 %1036 }
  0xa5   : > { %1638 = vmatprep.subr.msk.bf16.mxu0 %vm278_vm0, %v1457_v32  ;;  %v849_v40 = vpop.permute.xlu1 %848 }
  0xa8   : > { %v1041_v43 = vpop.permute.xlu0 %1040 }
  0xa9   : > { %1574 = vmatmul.mubr.msk.bf16.gmra.mxu1 %vm265_vm4, %v653_v30  ;;  %v1039_v42 = vpop.permute.xlu1 %1038 }
  0xaa   : > { %1584 = vmatmul.mubr.msk.bf16.gmra.mxu0 %vm265_vm4, %v751_v33  ;;  %1589 = vmatprep.mubr.msk.bf16.mxu1 %vm265_vm4, %v843_v36 }
  0xab   : > { %1599 = vmatprep.mubr.msk.bf16.mxu0 %vm265_vm4, %v1874_v18 }
  0xad   : > { %v1043_v44 = vpop.permute.xlu1 %1042 }
  0xb1   : > { %1590 = vmatmul.mubr.msk.bf16.vlgmr.msra.gmra.mxu1 %vm265_vm4, %v845_v37 }
  0xb2   : > { %1600 = vmatmul.mubr.msk.bf16.vlgmr.msra.gmra.mxu0 %vm265_vm4, %v1879_v19  ;;  %1608 = vmatpush3.bf16.msra.mxu1 %v1057_v34 }
  0xb3   : > { %1618 = vmatpush3.bf16.msra.mxu0 %v1166_v38  ;;  %1603 = vmatprep.mubr.msk.bf16.mxu0 %vm265_vm4, %v1885_v47 }
  0xb4   : > { %1593 = vmatprep.mubr.msk.bf16.mxu1 %vm265_vm4, %v847_v39 }
  0xb9   : > { %1594 = vmatmul.mubr.msk.bf16.gmra.mxu1 %vm265_vm4, %v849_v40 }
  0xba   : > { %1604 = vmatmul.mubr.msk.bf16.gmra.mxu0 %vm265_vm4, %v1890_v20  ;;  %1609 = vmatprep.mubr.msk.bf16.mxu1 %vm265_vm4, %v1037_v41 }
  0xbb   : > { %1619 = vmatprep.mubr.msk.bf16.mxu0 %vm265_vm4, %v1458_v9 }
  0xc1   : > { %1610 = vmatmul.mubr.msk.bf16.vlgmr.msra.gmra.mxu1 %vm265_vm4, %v1039_v42 }
  0xc2   : > { %1620 = vmatmul.mubr.msk.bf16.vlgmr.msra.gmra.mxu0 %vm265_vm4, %v1459_v35  ;;  %1613 = vmatprep.mubr.msk.bf16.mxu1 %vm265_vm4, %v1041_v43 }
  0xc3   : > { %1623 = vmatprep.mubr.msk.bf16.mxu0 %vm265_vm4, %v1460_v59 }
  0xc9   : > { %1614 = vmatmul.mubr.msk.bf16.gmra.mxu1 %vm265_vm4, %v1043_v44 }
  0xca   : > { %1624 = vmatmul.mubr.msk.bf16.gmra.mxu0 %vm265_vm4, %v1869_v10 }
 0x149   : > { %v1545_v61 = vpop.f32.mrf.mxu1 }
 0x14a   : > { %v1541_v62 = vpop.f32.mrf.mxu0 }
 0x14b   : > { %v332_v9 = vpop.f32.mrf.mxu1 }
 0x14c   : > { %v316_v45 = vpop.f32.mrf.mxu0 }
 0x14d   : > { %v1546_v28 = vpop.f32.mrf.mxu1 }
 0x14e   : > { %v1542_v29 = vpop.f32.mrf.mxu0 }
 0x14f   : > { %v1984_v35 = vpop.f32.mrf.mxu1 }
 0x150   : > { %v319_v46 = vpop.f32.mrf.mxu0 }
 0x151   : > { %v1551_v48 = vpop.f32.mrf.mxu1 }
 0x152   : > { %v1561_v49 = vpop.f32.mrf.mxu0  ;;  %v405_v23 = vadd.f32 %v1551_v48, %v1541_v62 }
 0x153   : > { %v396_v50 = vpop.f32.mrf.mxu1 }
 0x154   : > { %v605_v51 = vpop.f32.mrf.mxu0  ;;  %v397_v12 = vadd.f32 %v396_v50, %v316_v45  ;;  %v638_v27 = vadd.f32 %v1561_v49, %v405_v23 }
 0x155   : > { %v1552_v52 = vpop.f32.mrf.mxu1 }
 0x156   : > { %v1562_v53 = vpop.f32.mrf.mxu0  ;;  %v408_v25 = vadd.f32 %v1552_v52, %v1542_v29  ;;  %v636_v30 = vadd.f32 %v605_v51, %v397_v12 }
 0x157   : > { %v399_v54 = vpop.f32.mrf.mxu1 }
 0x158   : > { %v608_v55 = vpop.f32.mrf.mxu0  ;;  %v400_v31 = vadd.f32 %v399_v54, %v319_v46  ;;  %v639_v33 = vadd.f32 %v1562_v53, %v408_v25 }
 0x159   : > { %v1555_v56 = vpop.f32.mrf.mxu1 }
 0x15a   : > { %v1565_v57 = vpop.f32.mrf.mxu0  ;;  %v421_v38 = vadd.f32 %v1555_v56, %v1545_v61  ;;  %v637_v40 = vadd.f32 %v608_v55, %v400_v31 }
 0x15b   : > { %v412_v58 = vpop.f32.mrf.mxu1 }
 0x15c   : > { %v621_v59 = vpop.f32.mrf.mxu0  ;;  %v413_v43 = vadd.f32 %v412_v58, %v332_v9  ;;  %v642_v50 = vadd.f32 %v1565_v57, %v421_v38 }
 0x15d   : > { %v1556_v60 = vpop.f32.mrf.mxu1 }
 0x15e   : > { %v1566_v63 = vpop.f32.mrf.mxu0  ;;  %v424_v44 = vadd.f32 %v1556_v60, %v1546_v28  ;;  %v640_v61 = vadd.f32 %v621_v59, %v413_v43 }
 0x15f   : > { %v415_v0 = vpop.f32.mrf.mxu1 }
 0x160   : > { %v624_v1 = vpop.f32.mrf.mxu0  ;;  %v416_v46 = vadd.f32 %v415_v0, %v1984_v35  ;;  %v643_v56 = vadd.f32 %v1566_v63, %v424_v44 }
 0x161   : > { %v1571_v6 = vpop.f32.mrf.mxu1 }
 0x162   : > { %v1581_v10 = vpop.f32.mrf.mxu0  ;;  %v736_v36 = vadd.f32 %v1571_v6, %v638_v27  ;;  %v641_v58 = vadd.f32 %v624_v1, %v416_v46 }
 0x163   : > { %v703_v18 = vpop.f32.mrf.mxu1 }
 0x164   : > { %v801_v19 = vpop.f32.mrf.mxu0  ;;  %v734_v37 = vadd.f32 %v703_v18, %v636_v30  ;;  %v834_v45 = vadd.f32 %v1581_v10, %v736_v36 }
 0x165   : > { %v1572_v47 = vpop.f32.mrf.mxu1 }
 0x166   : > { %v1582_v20 = vpop.f32.mrf.mxu0  ;;  %v737_v41 = vadd.f32 %v1572_v47, %v639_v33  ;;  %v832_v29 = vadd.f32 %v801_v19, %v734_v37 }
 0x167   : > { %v706_v4 = vpop.f32.mrf.mxu1 }
 0x168   : > { %v804_v8 = vpop.f32.mrf.mxu0  ;;  %v735_v48 = vadd.f32 %v706_v4, %v637_v40  ;;  %v835_v52 = vadd.f32 %v1582_v20, %v737_v41 }
 0x169   : > { %v1575_v5 = vpop.f32.mrf.mxu1 }
 0x16a   : > { %v1585_v11 = vpop.f32.mrf.mxu0  ;;  %v740_v55 = vadd.f32 %v1575_v5, %v642_v50  ;;  %v833_v47 = vadd.f32 %v804_v8, %v735_v48 }
 0x16b   : > { %v719_v13 = vpop.f32.mrf.mxu1 }
 0x16c   : > { %v1986_v14 = vpop.f32.mrf.mxu0  ;;  %v738_v60 = vadd.f32 %v719_v13, %v640_v61  ;;  %v838_v20 = vadd.f32 %v1585_v11, %v740_v55 }
 0x16d   : > { %v1576_v15 = vpop.f32.mrf.mxu1 }
 0x16e   : > { %v1586_v21 = vpop.f32.mrf.mxu0  ;;  %v741_v10 = vadd.f32 %v1576_v15, %v643_v56  ;;  %v836_v8 = vadd.f32 %v1986_v14, %v738_v60 }
 0x16f   : > { %v722_v2 = vpop.f32.mrf.mxu1 }
 0x170   : > { %v1988_v3 = vpop.f32.mrf.mxu0 }
 0x171   : > { %v1591_v22 = vpop.f32.mrf.mxu1 }
 0x172   : > { %v1601_v17 = vpop.f32.mrf.mxu0  ;;  %v932_v53 = vadd.f32 %v1591_v22, %v834_v45  ;;  %v739_v22 = vadd.f32 %v722_v2, %v641_v58 }
 0x173   : > { %v899_v24 = vpop.f32.mrf.mxu1 }
 0x174   : > { %v995_v26 = vpop.f32.mrf.mxu0  ;;  %v930_v54 = vadd.f32 %v899_v24, %v832_v29  ;;  %v1028_v4 = vadd.f32 %v1601_v17, %v932_v53  ;;  %v839_v24 = vadd.f32 %v1586_v21, %v741_v10 }
 0x175   : > { %v1592_v7 = vpop.f32.mrf.mxu1 }
 0x176   : > { %v1602_v16 = vpop.f32.mrf.mxu0  ;;  %v933_v9 = vadd.f32 %v1592_v7, %v835_v52  ;;  %v1026_v57 = vadd.f32 %v995_v26, %v930_v54  ;;  %v837_v26 = vadd.f32 %v1988_v3, %v739_v22 }
 0x177   : > { %v902_v32 = vpop.f32.mrf.mxu1 }
 0x178   : > { %v998_v34 = vpop.f32.mrf.mxu0  ;;  %v931_v35 = vadd.f32 %v902_v32, %v833_v47  ;;  %v1029_v12 = vadd.f32 %v1602_v16, %v933_v9 }
 0x179   : > { %v1595_v39 = vpop.f32.mrf.mxu1 }
 0x17a   : > { %v1605_v42 = vpop.f32.mrf.mxu0  ;;  %v936_v25 = vadd.f32 %v1595_v39, %v838_v20  ;;  %v1027_v13 = vadd.f32 %v998_v34, %v931_v35 }
 0x17b   : > { %v915_v62 = vpop.f32.mrf.mxu1 }
 0x17c   : > { %v1011_v49 = vpop.f32.mrf.mxu0  ;;  %v934_v7 = vadd.f32 %v915_v62, %v836_v8  ;;  %v1032_v33 = vadd.f32 %v1605_v42, %v936_v25 }
 0x17d   : > { %v1596_v51 = vpop.f32.mrf.mxu1 }
 0x17e   : > { %v1606_v6 = vpop.f32.mrf.mxu0  ;;  %v937_v27 = vadd.f32 %v1596_v51, %v839_v24  ;;  %v1030_v34 = vadd.f32 %v1011_v49, %v934_v7 }
 0x17f   : > { %v918_v18 = vpop.f32.mrf.mxu1 }
 0x180   : > { %v1014_v28 = vpop.f32.mrf.mxu0  ;;  %v935_v36 = vadd.f32 %v918_v18, %v837_v26  ;;  %v1033_v38 = vadd.f32 %v1606_v6, %v937_v27 }
 0x181   : > { %v1611_v19 = vpop.f32.mrf.mxu1 }
 0x182   : > { %v1621_v0 = vpop.f32.mrf.mxu0  ;;  %v1126_v59 = vadd.f32 %v1611_v19, %v1028_v4  ;;  %v1031_v45 = vadd.f32 %v1014_v28, %v935_v36 }
 0x183   : > { %v1093_v23 = vpop.f32.mrf.mxu1 }
 0x184   : > { %v1124_v63 = vadd.f32 %v1093_v23, %v1026_v57  ;;  %v1202_v5 = vpop.f32.mrf.mxu0  ;;  %v1235_v2 = vadd.f32 %v1621_v0, %v1126_v59 }
 0x185   : > { %v1612_v1 = vpop.f32.mrf.mxu1 }
 0x186   : > { %v1127_v15 = vadd.f32 %v1612_v1, %v1029_v12  ;;  %v1622_v17 = vpop.f32.mrf.mxu0  ;;  %v1233_v30 = vadd.f32 %v1202_v5, %v1124_v63  ;;  %v1273_v50 = vmul.f32 %v1235_v2, %v1235_v2 }
 0x187   : > { %v1096_v11 = vpop.f32.mrf.mxu1 }
 0x188   : > { %v1236_v31 = vadd.f32 %v1622_v17, %v1127_v15  ;;  %v1125_v16 = vadd.f32 %v1096_v11, %v1027_v13  ;;  %v1205_v32 = vpop.f32.mrf.mxu0  ;;  %v1271_v41 = vmul.f32 %v1233_v30, %v1233_v30 }
 0x189   : > { %v1615_v14 = vpop.f32.mrf.mxu1 }
 0x18a   : > { %v1477_v21 = vpack.c.bf16 %v1236_v31, %v1235_v2  ;;  %v1234_v37 = vadd.f32 %v1205_v32, %v1125_v16  ;;  %v1625_v3 = vpop.f32.mrf.mxu0  ;;  %v1130_v39 = vadd.f32 %v1615_v14, %v1032_v33  ;;  %v1274_v49 = vmul.f32 %v1236_v31, %v1236_v31 }
 0x18b   : > { %v1109_v40 = vpop.f32.mrf.mxu1 }
 0x18c   : > { %1489 = vst [vmem:[%s1997_s21 + $0x8] sm:$0xff] %v1477_v21   ;;  %v1472_v43 = vpack.c.bf16 %v1234_v37, %v1233_v30  ;;  %v1257_v42 = vadd.f32 %v1234_v37, %v1233_v30  ;;  %v1272_v44 = vmul.f32 %v1234_v37, %v1234_v37  ;;  %v1218_v62 = vpop.f32.mrf.mxu0  ;;  %v1128_v29 = vadd.f32 %v1109_v40, %v1030_v34 }
 0x18d   : > { %v1616_v48 = vpop.f32.mrf.mxu1  ;;  %v1239_v54 = vadd.f32 %v1625_v3, %v1130_v39 }
 0x18e   : > { %1473 = vst [vmem:[%s1997_s21] sm:$0xff] %v1472_v43   ;;  %v1258_v46 = vadd.f32 %v1257_v42, %v1235_v2  ;;  %v1279_v51 = vadd.f32 %v1272_v44, %v1271_v41  ;;  %v1131_v52 = vadd.f32 %v1616_v48, %v1033_v38  ;;  %v1626_v53 = vpop.f32.mrf.mxu0  ;;  %v1237_v6 = vadd.f32 %v1218_v62, %v1128_v29 }
 0x18f   : > { %v1112_v61 = vpop.f32.mrf.mxu1  ;;  %v1277_v20 = vmul.f32 %v1239_v54, %v1239_v54 }
 0x190   : > { %v1280_v56 = vadd.f32 %v1279_v51, %v1273_v50  ;;  %v1259_v55 = vadd.f32 %v1258_v46, %v1236_v31  ;;  %v1240_v18 = vadd.f32 %v1626_v53, %v1131_v52  ;;  %v1129_v47 = vadd.f32 %v1112_v61, %v1031_v45  ;;  %v1221_v10 = vpop.f32.mrf.mxu0 }
 0x191   : > { %v1275_v28 = vmul.f32 %v1237_v6, %v1237_v6 }
 0x192   : > { %v1260_v9 = vadd.f32 %v1259_v55, %v1237_v6  ;;  %v1281_v58 = vadd.f32 %v1280_v56, %v1274_v49  ;;  %v1487_v60 = vpack.c.bf16 %v1240_v18, %v1239_v54  ;;  %v1238_v19 = vadd.f32 %v1221_v10, %v1129_v47 }
 0x193   : > { %v1278_v12 = vmul.f32 %v1240_v18, %v1240_v18 }
 0x194   : > { %v1282_v4 = vadd.f32 %v1281_v58, %v1275_v28  ;;  %1491 = vst [vmem:[%s1997_s21 + $0x18] sm:$0xff] %v1487_v60   ;;  %v1482_v57 = vpack.c.bf16 %v1238_v19, %v1237_v6  ;;  %v1261_v35 = vadd.f32 %v1260_v9, %v1238_v19  ;;  %v1276_v0 = vmul.f32 %v1238_v19, %v1238_v19 }
 0x196   : > { %1490 = vst [vmem:[%s1997_s21 + $0x10] sm:$0xff] %v1482_v57   ;;  %v1262_v22 = vadd.f32 %v1261_v35, %v1239_v54  ;;  %v1283_v23 = vadd.f32 %v1282_v4, %v1276_v0 }
 0x198   : > { %v1263_v59 = vadd.f32 %v1262_v22, %v1240_v18  ;;  %v1284_v63 = vadd.f32 %v1283_v23, %v1277_v20 }
 0x19a   : > { %v1264_v5 = vrot.slane %v1263_v59, 4  ;;  %v1285_v8 = vadd.f32 %v1284_v63, %v1278_v12 }
 0x19c   : > { %v1265_v24 = vadd.f32 %v1264_v5, %v1263_v59  ;;  %v1286_v25 = vrot.slane %v1285_v8, 4 }
 0x19e   : > { %v1266_v1 = vrot.slane %v1265_v24, 2  ;;  %v1287_v13 = vadd.f32 %v1286_v25, %v1285_v8 }
 0x1a0   : > { %v1267_v15 = vadd.f32 %v1266_v1, %v1265_v24  ;;  %v1288_v17 = vrot.slane %v1287_v13, 2 }
 0x1a2   : > { %v1268_v26 = vrot.slane %v1267_v15, 1  ;;  %v1289_v7 = vadd.f32 %v1288_v17, %v1287_v13 }
 0x1a4   : > { %v1269_v27 = vadd.f32 %v1268_v26, %v1267_v15  ;;  %v1290_v11 = vrot.slane %v1289_v7, 1 }
 0x1a6   : > { %1270 = vst [vmem:[%s211_s24] sm:$0x1] %v1269_v27  ;;  %v1291_v2 = vadd.f32 %v1290_v11, %v1289_v7 }
 0x1a8   : > { %1292 = vst [vmem:[%s214_s27] sm:$0x1] %v1291_v2 }
 0x1a9 PF: > { %s15_s15 = sadd.s32 1, %s1665_s15  }
 0x1aa   : > { %p12_p4 = scmp.ge.s32.totalorder %s15_s15, 4  }
 0x1ac   :  { %14 = sbr.rel (!%p12_p4) target bundleno = 1 (0x1), region = 90 }

// kernel: res18_block_forward.7
= control target key start
LH: loop header
LB: loop body
LE: loop exit
PB: predicated region body
PF: predicated region fallthrough
CT: control target
= control target key end

     0   :  { %s573_s21 = smov 0   ;;  %s680_s0 = inlined_call_operand.vmem [shape: bf16[2,8,8,128], index: 0, kind: input, shape index: {}]   ;;  %s681_s1 = inlined_call_operand.vmem [shape: f32[1,128], index: 1, kind: input, shape index: {}]   ;;  %s682_s2 = inlined_call_operand.vmem [shape: f32[1,128], index: 2, kind: input, shape index: {}]   ;;  %s683_s3 = inlined_call_operand.vmem [shape: bf16[2,8,8,128], index: 3, kind: input, shape index: {}]   ;;  %s684_s4 = inlined_call_operand.vmem [shape: f32[1,128], index: 4, kind: input, shape index: {}]   ;;  %s685_s5 = inlined_call_operand.vmem [shape: f32[1,128], index: 5, kind: input, shape index: {}]   ;;  %s686_s6 = inlined_call_operand.vmem [shape: bf16[2,8,8,8], index: 6, kind: output, shape index: {}]  }
   0x1 LB: > { %s464_s22 = sadd.s32 4294967295, %s536_s21   ;;  %p468_p0 = scmp.ge.s32.totalorder %s536_s21, 1  ;;  %s536_s21 = sphi %s573_s21, %s16_s21  }
   0x2   : > { %p222_p1 = scmp.lt.s32.totalorder %s536_s21, 3 }
   0x4   : > { %p223_p2 = pnand %p468_p0, %p222_p1 }
   0x5   : > { %p257_p3 = scmp.lt.s32.totalorder (!%p223_p2), %s464_s22, 1 }
   0x6   : > { %226 = sbr.rel (%p223_p2) target bundleno = 41 (0x29), region = 44 }
   0xb   : > { %s688_s22 = smov (!%p257_p3, %s464_s22), 1  ;;  %v598_v0 = vld [vmem:[%s681_s1] ss:$0 sm:$0xff]  ;;  %vm388_vm0 = vcmask 60416  }
   0xc   : > { %s581_s23 = sshll.u32 %s688_s22, 5  ;;  %v603_v1 = vld [vmem:[%s684_s4] ss:$0 sm:$0xff] }
   0xd   : > { %s587_s26 = scalar_lea.vmem %s680_s0, %s581_s23  ;;  %s593_s29 = scalar_lea.vmem %s683_s3, %s581_s23  ;;  %v612_v10 = vld [vmem:[%s682_s2] ss:$0 sm:$0xff] }
   0xe   : > { %v485_v2 = vld [vmem:[%s587_s26] sm:$0xff]   ;;  %v516_v4 = vld [vmem:[%s587_s26 + $0x8] sm:$0xff]   ;;  %v517_v24 = vld [vmem:[%s587_s26 + $0x10] sm:$0xff]   ;;  %s643_s16 = scalar_lea.vmem %s686_s6, %s581_s23 }
   0xf   : > { %v501_v3 = vld [vmem:[%s593_s29] sm:$0xff]   ;;  %v486_v5 = vunpack.c.l.bf16 %v485_v2  ;;  %v487_v7 = vunpack.c.h.bf16 %v485_v2  ;;  %v519_v9 = vld [vmem:[%s593_s29 + $0x8] sm:$0xff]   ;;  %v490_v12 = vunpack.c.l.bf16 %v516_v4  ;;  %v491_v14 = vunpack.c.h.bf16 %v516_v4  ;;  %v520_v25 = vld [vmem:[%s593_s29 + $0x10] sm:$0xff]  }
  0x10   : > { %v502_v6 = vunpack.c.l.bf16 %v501_v3  ;;  %v503_v8 = vunpack.c.h.bf16 %v501_v3  ;;  %v617_v11 = vld [vmem:[%s685_s5] ss:$0 sm:$0xff]  ;;  %v506_v13 = vunpack.c.l.bf16 %v519_v9  ;;  %v507_v15 = vunpack.c.h.bf16 %v519_v9  ;;  %v518_v50 = vld [vmem:[%s587_s26 + $0x18] sm:$0xff]  }
  0x11   : > { %v295_v16 = vmul.f32 %v486_v5, %v598_v0  ;;  %v296_v18 = vmul.f32 %v487_v7, %v598_v0  ;;  %v297_v20 = vmul.f32 %v490_v12, %v598_v0  ;;  %v298_v22 = vmul.f32 %v491_v14, %v598_v0  ;;  %v521_v51 = vld [vmem:[%s593_s29 + $0x18] sm:$0xff]  }
  0x12   : > { %v341_v17 = vmul.f32 %v502_v6, %v603_v1  ;;  %v342_v19 = vmul.f32 %v503_v8, %v603_v1  ;;  %v343_v21 = vmul.f32 %v506_v13, %v603_v1  ;;  %v344_v23 = vmul.f32 %v507_v15, %v603_v1 }
  0x13   : > { %v310_v26 = vadd.f32 %v612_v10, %v295_v16  ;;  %v311_v28 = vadd.f32 %v612_v10, %v296_v18  ;;  %v312_v30 = vadd.f32 %v612_v10, %v297_v20  ;;  %v313_v32 = vadd.f32 %v612_v10, %v298_v22 }
  0x14   : > { %v356_v27 = vadd.f32 %v617_v11, %v341_v17  ;;  %v357_v29 = vadd.f32 %v617_v11, %v342_v19  ;;  %v358_v31 = vadd.f32 %v617_v11, %v343_v21  ;;  %v359_v33 = vadd.f32 %v617_v11, %v344_v23 }
  0x15   : > { %v494_v36 = vunpack.c.l.bf16 %v517_v24  ;;  %v510_v37 = vunpack.c.l.bf16 %v520_v25  ;;  %v495_v40 = vunpack.c.h.bf16 %v517_v24  ;;  %v511_v41 = vunpack.c.h.bf16 %v520_v25 }
  0x16   : > { %v364_v34 = vadd.f32 %v356_v27, %v310_v26  ;;  %v365_v35 = vadd.f32 %v357_v29, %v311_v28  ;;  %v366_v38 = vadd.f32 %v358_v31, %v312_v30  ;;  %v367_v39 = vadd.f32 %v359_v33, %v313_v32 }
  0x17   : > { %v299_v44 = vmul.f32 %v494_v36, %v598_v0  ;;  %v345_v45 = vmul.f32 %v510_v37, %v603_v1  ;;  %v300_v48 = vmul.f32 %v495_v40, %v598_v0  ;;  %v346_v49 = vmul.f32 %v511_v41, %v603_v1 }
  0x18   : > { %v372_v42 = vmax.f32 %v364_v34, 0.0  ;;  %v373_v43 = vmax.f32 %v365_v35, 0.0  ;;  %v374_v46 = vmax.f32 %v366_v38, 0.0  ;;  %v375_v47 = vmax.f32 %v367_v39, 0.0 }
  0x19   : > { %v314_v54 = vadd.f32 %v612_v10, %v299_v44  ;;  %v360_v55 = vadd.f32 %v617_v11, %v345_v45  ;;  %v315_v58 = vadd.f32 %v612_v10, %v300_v48  ;;  %v361_v59 = vadd.f32 %v617_v11, %v346_v49 }
  0x1a   : > { %v380_v52 = vpack.c.bf16 %v372_v42, %v372_v42  ;;  %v381_v53 = vpack.c.bf16 %v373_v43, %v373_v43  ;;  %v382_v56 = vpack.c.bf16 %v374_v46, %v374_v46  ;;  %v383_v57 = vpack.c.bf16 %v375_v47, %v375_v47 }
  0x1b   : > { %v368_v60 = vadd.f32 %v360_v55, %v314_v54  ;;  %v498_v61 = vunpack.c.l.bf16 %v518_v50  ;;  %v514_v62 = vunpack.c.l.bf16 %v521_v51  ;;  %v499_v63 = vunpack.c.h.bf16 %v518_v50 }
  0x1c   : > { %389 = vst.msk [vmem:[%s643_s16] sm:$0xf] %vm388_vm0, %v380_v52  ;;  %390 = vst.msk [vmem:[%s643_s16 + $0x4] sm:$0xf] %vm388_vm0, %v381_v53  ;;  %v369_v2 = vadd.f32 %v361_v59, %v315_v58  ;;  %v515_v3 = vunpack.c.h.bf16 %v521_v51 }
  0x1d   : > { %391 = vst.msk [vmem:[%s643_s16 + $0x8] sm:$0xf] %vm388_vm0, %v382_v56  ;;  %392 = vst.msk [vmem:[%s643_s16 + $0xc] sm:$0xf] %vm388_vm0, %v383_v57  ;;  %v376_v4 = vmax.f32 %v368_v60, 0.0  ;;  %v301_v5 = vmul.f32 %v498_v61, %v598_v0  ;;  %v347_v6 = vmul.f32 %v514_v62, %v603_v1  ;;  %v302_v7 = vmul.f32 %v499_v63, %v598_v0 }
  0x1e   : > { %v377_v8 = vmax.f32 %v369_v2, 0.0  ;;  %v348_v9 = vmul.f32 %v515_v3, %v603_v1 }
  0x1f   : > { %v384_v12 = vpack.c.bf16 %v376_v4, %v376_v4  ;;  %v316_v13 = vadd.f32 %v612_v10, %v301_v5  ;;  %v362_v14 = vadd.f32 %v617_v11, %v347_v6  ;;  %v317_v15 = vadd.f32 %v612_v10, %v302_v7 }
  0x20   : > { %v385_v16 = vpack.c.bf16 %v377_v8, %v377_v8  ;;  %v363_v17 = vadd.f32 %v617_v11, %v348_v9 }
  0x21   : > { %393 = vst.msk [vmem:[%s643_s16 + $0x10] sm:$0xf] %vm388_vm0, %v384_v12  ;;  %v370_v18 = vadd.f32 %v362_v14, %v316_v13 }
  0x22   : > { %394 = vst.msk [vmem:[%s643_s16 + $0x14] sm:$0xf] %vm388_vm0, %v385_v16  ;;  %v371_v0 = vadd.f32 %v363_v17, %v317_v15 }
  0x23   : > { %v378_v19 = vmax.f32 %v370_v18, 0.0 }
  0x24   : > { %v379_v20 = vmax.f32 %v371_v0, 0.0 }
  0x25   : > { %v386_v1 = vpack.c.bf16 %v378_v19, %v378_v19 }
  0x26   : > { %v387_v21 = vpack.c.bf16 %v379_v20, %v379_v20 }
  0x27   : > { %395 = vst.msk [vmem:[%s643_s16 + $0x18] sm:$0xf] %vm388_vm0, %v386_v1 }
  0x28   : > { %396 = vst.msk [vmem:[%s643_s16 + $0x1c] sm:$0xf] %vm388_vm0, %v387_v21 }
  0x29 PF: > { %s16_s21 = sadd.s32 1, %s536_s21  }
  0x2a   : > { %p13_p4 = scmp.ge.s32.totalorder %s16_s21, 4  }
  0x2c   :  { %15 = sbr.rel (!%p13_p4) target bundleno = 1 (0x1), region = 77 }

// kernel: res18_block_forward.5
= control target key start
LH: loop header
LB: loop body
LE: loop exit
PB: predicated region body
PF: predicated region fallthrough
CT: control target
= control target key end

     0   :  { %s2982_s21 = smov 0   ;;  %s3681_s0 = inlined_call_operand.vmem [shape: bf16[2,8,8,128], index: 0, kind: input, shape index: {}]   ;;  %s3682_s1 = inlined_call_operand.vmem [shape: f32[1,128], index: 1, kind: input, shape index: {}]   ;;  %s3683_s2 = inlined_call_operand.vmem [shape: f32[1,128], index: 2, kind: input, shape index: {}]   ;;  %s3684_s3 = inlined_call_operand.vmem [shape: bf16[9,128,128], index: 3, kind: input, shape index: {}]   ;;  %s3685_s4 = inlined_call_operand.vmem [shape: bf16[2,8,8,128], index: 4, kind: output, shape index: {0}]   ;;  %s3686_s5 = inlined_call_operand.vmem [shape: f32[2,1,128], index: 5, kind: output, shape index: {1}]   ;;  %s3687_s6 = inlined_call_operand.vmem [shape: f32[2,1,128], index: 6, kind: output, shape index: {2}]  }
   0x1 LB: > { %s2203_s22 = sadd.s32 4294967295, %s2944_s21   ;;  %p2207_p0 = scmp.ge.s32.totalorder %s2944_s21, 1  ;;  %s2944_s21 = sphi %s2982_s21, %s17_s21  }
   0x2   : > { %p217_p1 = scmp.lt.s32.totalorder %s2944_s21, 3 }
   0x4   : > { %p218_p2 = pnand %p2207_p0, %p217_p1 }
   0x6   : > { %221 = sbr.rel (%p218_p2) target bundleno = 415 (0x19f), region = 36 }
   0xb   : > { %v2862_v0 = vld [vmem:[%s3684_s3 + $0x38] sm:$0xff]   ;;  %p2995_p3 = scmp.lt.s32.totalorder %s2203_s22, 1  ;;  %v2863_v1 = vld [vmem:[%s3684_s3 + $0x30] sm:$0xff]   ;;  %v2946_v3 = vmov 0   ;;  %v2865_v4 = vld [vmem:[%s3684_s3 + $0x28] sm:$0xff]   ;;  %vm457_vm0 = vcmask 1043456  }
   0xc   : > { %2645 = vmatprep.subr.bf16.mxu1 %v2862_v0  ;;  %v2864_v2 = vld [vmem:[%s3684_s3 + $0x78] sm:$0xff]   ;;  %324 = vst [vmem:[#allocation2] sm:$0xf] %v2946_v3  ;;  %326 = vst [vmem:[#allocation2 + $0x8] sm:$0xf] %v2946_v3  ;;  %v2866_v5 = vld [vmem:[%s3684_s3 + $0x70] sm:$0xff]  }
   0xd   : > { %325 = vst [vmem:[#allocation2 + $0x4] sm:$0x1] %v2946_v3  ;;  %327 = vst [vmem:[#allocation2 + $0xc] sm:$0x1] %v2946_v3  ;;  %2646 = vmatpush3.bf16.msra.mxu1 %v2862_v0  ;;  %2621 = vmatprep.subr.bf16.mxu0 %v2864_v2  ;;  %s3718_s22 = smov (!%p2995_p3, %s2203_s22), 1  ;;  %v2868_v6 = vld [vmem:[%s3684_s3 + $0x68] sm:$0xff]  }
   0xe   : > { %328 = vst [vmem:[#allocation2 + $0x10] sm:$0xf] %v2946_v3  ;;  %329 = vst [vmem:[#allocation2 + $0x14] sm:$0x1] %v2946_v3  ;;  %2647 = vmatprep.subr.bf16.mxu1 %v2863_v1  ;;  %2622 = vmatpush3.bf16.msra.mxu0 %v2864_v2  ;;  %v2867_v7 = vld [vmem:[%s3684_s3 + $0x20] sm:$0xff]   ;;  %s2461_s14 = sshll.u32 %s3718_s22, 5  ;;  %s265_s8 = scalar_lea.vmem %s3686_s5, %s3718_s22 }
   0xf   : > { %330 = vst [vmem:[#allocation2 + $0x18] sm:$0xf] %v2946_v3  ;;  %331 = vst [vmem:[#allocation2 + $0x1c] sm:$0x1] %v2946_v3  ;;  %2623 = vmatprep.subr.bf16.mxu0 %v2866_v5  ;;  %v2870_v8 = vld [vmem:[%s3684_s3 + $0x60] sm:$0xff]   ;;  %v2869_v9 = vld [vmem:[%s3684_s3 + $0x18] sm:$0xff]   ;;  %s3035_s23 = scalar_lea.vmem %s3681_s0, %s2461_s14  ;;  %s3654_s30 = scalar_lea.vmem %s3685_s4, %s2461_s14 }
  0x10   : > { %332 = vst [vmem:[#allocation2 + $0x20] sm:$0xf] %v2946_v3  ;;  %333 = vst [vmem:[#allocation2 + $0x24] sm:$0x1] %v2946_v3  ;;  %v2872_v10 = vld [vmem:[%s3684_s3 + $0x58] sm:$0xff]   ;;  %v2472_v11 = vld [vmem:[%s3035_s23] sm:$0xff]   ;;  %s268_s11 = scalar_lea.vmem %s3687_s6, %s3718_s22 }
  0x11   : > { %334 = vst [vmem:[#allocation2 + $0x28] sm:$0xf] %v2946_v3  ;;  %335 = vst [vmem:[#allocation2 + $0x2c] sm:$0x1] %v2946_v3  ;;  %2648 = vmatpush3.bf16.msra.mxu1 %v2863_v1  ;;  %v3044_v12 = vld [vmem:[%s3682_s1] ss:$0 sm:$0xff]  ;;  %v2473_v14 = vunpack.c.l.bf16 %v2472_v11  ;;  %v2474_v15 = vunpack.c.h.bf16 %v2472_v11 }
  0x12   : > { %336 = vst [vmem:[#allocation2 + $0x30] sm:$0xf] %v2946_v3  ;;  %337 = vst [vmem:[#allocation2 + $0x34] sm:$0x1] %v2946_v3  ;;  %2649 = vmatprep.subr.bf16.mxu1 %v2865_v4  ;;  %2624 = vmatpush3.bf16.msra.mxu0 %v2866_v5  ;;  %v2871_v13 = vld [vmem:[%s3684_s3 + $0x10] sm:$0xff]   ;;  %v2507_v20 = vld [vmem:[%s3035_s23 + $0x8] sm:$0xff]  }
  0x13   : > { %338 = vst [vmem:[#allocation2 + $0x38] sm:$0xf] %v2946_v3  ;;  %339 = vst [vmem:[#allocation2 + $0x3c] sm:$0x1] %v2946_v3  ;;  %2625 = vmatprep.subr.bf16.mxu0 %v2868_v6  ;;  %v3052_v16 = vld [vmem:[%s3683_s2] ss:$0 sm:$0xff]  ;;  %v293_v19 = vmul.f32 %v2473_v14, %v3044_v12  ;;  %v294_v21 = vmul.f32 %v2474_v15, %v3044_v12  ;;  %v2477_v22 = vunpack.c.l.bf16 %v2507_v20  ;;  %v2478_v29 = vunpack.c.h.bf16 %v2507_v20 }
  0x14   : > { %340 = vst [vmem:[#allocation2 + $0x40] sm:$0xf] %v2946_v3  ;;  %341 = vst [vmem:[#allocation2 + $0x44] sm:$0x1] %v2946_v3  ;;  %v3054_v17 = vld [vmem:[#allocation2] sm:$0xf] }
  0x15   : > { %342 = vst [vmem:[#allocation2 + $0x48] sm:$0xf] %v2946_v3  ;;  %343 = vst [vmem:[#allocation2 + $0x4c] sm:$0x1] %v2946_v3  ;;  %2650 = vmatpush3.bf16.msra.mxu1 %v2865_v4  ;;  %v2874_v18 = vld [vmem:[%s3684_s3 + $0x50] sm:$0xff]   ;;  %v2873_v23 = vld [vmem:[%s3684_s3 + $0x8] sm:$0xff]   ;;  %v308_v24 = vadd.f32 %v3052_v16, %v293_v19  ;;  %v309_v26 = vadd.f32 %v3052_v16, %v294_v21  ;;  %v295_v28 = vmul.f32 %v2477_v22, %v3044_v12 }
  0x16   : > { %2651 = vmatprep.subr.bf16.mxu1 %v2867_v7  ;;  %2626 = vmatpush3.bf16.msra.mxu0 %v2868_v6  ;;  %v551_v25 = vshrl.u32 %v3054_v17, 16  ;;  %v554_v27 = vshll.u32 %v3054_v17, 16  ;;  %v2876_v30 = vld [vmem:[%s3684_s3 + $0x48] sm:$0xff]   ;;  %vm458_vm1 = vsmask.f32 7938  ;;  %vm463_vm2 = vcmask 1040384  }
  0x17   : > { %2627 = vmatprep.subr.bf16.mxu0 %v2870_v8  ;;  %v316_v31 = vmax.f32 %v308_v24, 0.0  ;;  %v317_v32 = vmax.f32 %v309_v26, 0.0  ;;  %v310_v33 = vadd.f32 %v3052_v16, %v295_v28  ;;  %v2875_v34 = vld [vmem:[%s3684_s3] sm:$0xff]   ;;  %vm464_vm3 = vsmask.f32 256  ;;  %v3081_v43 = vld [vmem:[%s3684_s3 + $0xf8] sm:$0xff]   ;;  %vm3090_vm4 = vmand %vm457_vm0, %vm458_vm1 }
  0x18   : > { %v553_v37 = vrot.slane %v551_v25, 4  ;;  %v556_v39 = vrot.slane %v554_v27, 5  ;;  %v296_v40 = vmul.f32 %v2478_v29, %v3044_v12  ;;  %v2880_v46 = vld [vmem:[%s3684_s3 + $0x40] sm:$0xff]   ;;  %v460_v47 = vld [vmem:[#allocation2 + $0x8] sm:$0xf]  ;;  %v3097_v56 = vld [vmem:[%s3684_s3 + $0xb8] sm:$0xff]  }
  0x19   : > { %2652 = vmatpush3.bf16.msra.mxu1 %v2867_v7  ;;  %v2463_v35 = vpack.c.bf16 %v316_v31, %v316_v31  ;;  %v2464_v36 = vpack.c.bf16 %v317_v32, %v317_v32  ;;  %v318_v38 = vmax.f32 %v310_v33, 0.0  ;;  %v469_v49 = vld [vmem:[#allocation2 + $0x10] sm:$0xf]  ;;  %v466_v50 = vld [vmem:[#allocation2 + $0xc] sm:$0x1]  ;;  %vm3101_vm5 = vmand %vm463_vm2, %vm464_vm3  ;;  %vm953_vm9 = vcmask 1042432  }
  0x1a   : > { %2653 = vmatprep.subr.bf16.mxu1 %v2869_v9  ;;  %2628 = vmatpush3.bf16.msra.mxu0 %v2870_v8  ;;  %v472_v51 = vld [vmem:[#allocation2 + $0x14] sm:$0x1]  ;;  %v3086_v52 = vld [vmem:[#allocation2 + $0x4] sm:$0x1]  ;;  %v311_v60 = vadd.f32 %v3052_v16, %v296_v40  ;;  %v475_v63 = vld [vmem:[#allocation2 + $0x18] sm:$0xf]  ;;  %v557_v4 = vor.u32 %v556_v39, %v553_v37 }
  0x1b   : > { %2629 = vmatprep.subr.bf16.mxu0 %v2872_v10  ;;  %v377_v41 = vshrl.u32 %v2463_v35, 16  ;;  %v380_v42 = vshll.u32 %v2463_v35, 16  ;;  %v385_v44 = vshrl.u32 %v2464_v36, 16  ;;  %v388_v45 = vshll.u32 %v2464_v36, 16  ;;  %v478_v2 = vld [vmem:[#allocation2 + $0x1c] sm:$0x1] }
  0x1c   : > { %v2465_v48 = vpack.c.bf16 %v318_v38, %v318_v38  ;;  %v560_v5 = vshll.u32 %v3086_v52, 16  ;;  %v319_v14 = vmax.f32 %v311_v60, 0.0  ;;  %vm547_vm6 = vsmask.f32 3328  ;;  %v3128_v26 = vld [vmem:[%s3035_s23 + $0x18] sm:$0xff]   ;;  %v2903_v59 = vld [vmem:[%s3684_s3 + $0x160] sm:$0xff]  }
  0x1d   : > { %2654 = vmatpush3.bf16.msra.mxu1 %v2869_v9  ;;  %v379_v53 = vrot.slane %v377_v41, 7  ;;  %v387_v55 = vrot.slane %v385_v44, 7  ;;  %vm548_vm7 = vsmask.f32 7440  ;;  %v558_v21 = vrot.slane %v557_v4, 4  ;;  %v2900_v54 = vld [vmem:[%s3684_s3 + $0x138] sm:$0xff]  }
  0x1e   : > { %2655 = vmatprep.subr.bf16.mxu1 %v2871_v13  ;;  %2630 = vmatpush3.bf16.msra.mxu0 %v2872_v10  ;;  %v393_v57 = vshrl.u32 %v2465_v48, 16  ;;  %v396_v58 = vshll.u32 %v2465_v48, 16  ;;  %v2466_v20 = vpack.c.bf16 %v319_v14, %v319_v14  ;;  %v562_v22 = vrot.slane %v560_v5, 5  ;;  %vm3122_vm8 = vmor %vm547_vm6, %vm548_vm7  ;;  %v2934_v24 = vld [vmem:[%s3684_s3 + $0x218] sm:$0xff]  }
  0x1f   : > { %2631 = vmatprep.subr.bf16.mxu0 %v2874_v18  ;;  %v382_v61 = vor.u32 %v380_v42, %v379_v53  ;;  %v390_v62 = vor.u32 %v388_v45, %v387_v55  ;;  %v383_v0 = vrot.slane %v379_v53, 4  ;;  %v391_v1 = vrot.slane %v387_v55, 4  ;;  %v481_v55 = vld [vmem:[#allocation2 + $0x20] sm:$0xf] }
  0x20   : > { %v395_v3 = vrot.slane %v393_v57, 7  ;;  %v401_v27 = vshrl.u32 %v2466_v20, 16  ;;  %v563_v31 = vsel %vm3122_vm8, %v558_v21, %v562_v22  ;;  %v2485_v32 = vunpack.c.l.bf16 %v3128_v26  ;;  %v2885_v21 = vld [vmem:[%s3684_s3 + $0xe0] sm:$0xff]  }
  0x21   : > { %2656 = vmatpush3.bf16.msra.mxu1 %v2871_v13  ;;  %v461_v6 = vsel %vm3090_vm4, %v382_v61, %v460_v47  ;;  %v470_v7 = vsel %vm3090_vm4, %v390_v62, %v469_v49  ;;  %v467_v8 = vsel %vm3101_vm5, %v383_v0, %v466_v50  ;;  %v473_v9 = vsel %vm3101_vm5, %v391_v1, %v472_v51  ;;  %v2508_v13 = vld [vmem:[%s3035_s23 + $0x10] sm:$0xff]   ;;  %v2883_v1 = vld [vmem:[%s3684_s3 + $0xe8] sm:$0xff]  }
  0x22   : > { %2657 = vmatprep.subr.bf16.mxu1 %v2873_v23  ;;  %2632 = vmatpush3.bf16.msra.mxu0 %v2874_v18  ;;  %462 = vst [vmem:[#allocation2 + $0x8] sm:$0xf] %v461_v6  ;;  %v398_v10 = vor.u32 %v396_v58, %v395_v3  ;;  %471 = vst [vmem:[#allocation2 + $0x10] sm:$0xf] %v470_v7  ;;  %v399_v11 = vrot.slane %v395_v3, 4  ;;  %v2481_v15 = vunpack.c.l.bf16 %v2508_v13  ;;  %v403_v47 = vrot.slane %v401_v27, 7 }
  0x23   : > { %2633 = vmatprep.subr.bf16.mxu0 %v2876_v30  ;;  %468 = vst [vmem:[#allocation2 + $0xc] sm:$0x1] %v467_v8  ;;  %474 = vst [vmem:[#allocation2 + $0x14] sm:$0x1] %v473_v9  ;;  %v404_v48 = vshll.u32 %v2466_v20, 16  ;;  %v2881_v50 = vld [vmem:[%s3684_s3 + $0xf0] sm:$0xff]   ;;  %v299_v57 = vmul.f32 %v2485_v32, %v3044_v12 }
  0x24   : > { %v476_v18 = vsel %vm3090_vm4, %v398_v10, %v475_v63  ;;  %v479_v19 = vsel %vm3101_vm5, %v399_v11, %v478_v2  ;;  %v297_v25 = vmul.f32 %v2481_v15, %v3044_v12  ;;  %v487_v27 = vld [vmem:[#allocation2 + $0x28] sm:$0xf]  ;;  %vm954_vm10 = vcmask 1046532  }
  0x25   : > { %2658 = vmatpush3.bf16.msra.mxu1 %v2873_v23  ;;  %477 = vst [vmem:[#allocation2 + $0x18] sm:$0xf] %v476_v18  ;;  %480 = vst [vmem:[#allocation2 + $0x1c] sm:$0x1] %v479_v19  ;;  %v2482_v23 = vunpack.c.h.bf16 %v2508_v13  ;;  %v406_v8 = vor.u32 %v404_v48, %v403_v47  ;;  %v314_v13 = vadd.f32 %v3052_v16, %v299_v57  ;;  %v493_v48 = vld [vmem:[#allocation2 + $0x30] sm:$0xf] }
  0x26   : > { %2659 = vmatprep.subr.bf16.mxu1 %v2875_v34  ;;  %2634 = vmatpush3.bf16.msra.mxu0 %v2876_v30  ;;  %v312_v38 = vadd.f32 %v3052_v16, %v297_v25  ;;  %v484_v25 = vld [vmem:[#allocation2 + $0x24] sm:$0x1]  ;;  %vm3293_vm11 = vmor %vm953_vm9, %vm954_vm10 }
  0x27   : > { %2635 = vmatprep.subr.bf16.mxu0 %v2880_v46  ;;  %v298_v33 = vmul.f32 %v2482_v23, %v3044_v12  ;;  %v482_v18 = vsel %vm3090_vm4, %v406_v8, %v481_v55  ;;  %v322_v32 = vmax.f32 %v314_v13, 0.0  ;;  %v2887_v55 = vld [vmem:[%s3684_s3 + $0xd8] sm:$0xff]  }
  0x28   : > { %v320_v4 = vmax.f32 %v312_v38, 0.0  ;;  %483 = vst [vmem:[#allocation2 + $0x20] sm:$0xf] %v482_v18  ;;  %v490_v38 = vld [vmem:[#allocation2 + $0x2c] sm:$0x1] }
  0x29   : > { %2660 = vmatpush3.bf16.msra.mxu1 %v2875_v34  ;;  %v3130_v28 = vld [vmem:[#allocation2 + $0x8] sm:$0xf]  ;;  %v3132_v29 = vld [vmem:[#allocation2 + $0x10] sm:$0xf]  ;;  %v313_v58 = vadd.f32 %v3052_v16, %v298_v33  ;;  %v502_v8 = vld [vmem:[#allocation2 + $0x3c] sm:$0x1] }
  0x2a   : > { %2693 = vmatprep.subr.bf16.mxu1 %v3081_v43  ;;  %2636 = vmatpush3.bf16.msra.mxu0 %v2880_v46  ;;  %v3134_v30 = vld [vmem:[#allocation2 + $0xc] sm:$0x1]  ;;  %v2250_v34 = vcombine.low %v3054_v17, %v3130_v28  ;;  %v3142_v35 = vld [vmem:[#allocation2 + $0x14] sm:$0x1]  ;;  %v565_v36 = vshrl.u32 %v3130_v28, 16  ;;  %v568_v37 = vshll.u32 %v3130_v28, 16  ;;  %v2467_v11 = vpack.c.bf16 %v320_v4, %v320_v4 }
  0x2b   : > { %2669 = vmatprep.subr.bf16.mxu0 %v3097_v56  ;;  %v574_v39 = vshll.u32 %v3134_v30, 16  ;;  %v579_v40 = vshrl.u32 %v3132_v29, 16  ;;  %v582_v41 = vshll.u32 %v3132_v29, 16  ;;  %v588_v42 = vshll.u32 %v3142_v35, 16 }
  0x2c   : > { %2661 = vmatprep.mubr.bf16.mxu1 %v2250_v34  ;;  %v3151_v44 = vld [vmem:[#allocation2 + $0x18] sm:$0xf]  ;;  %v567_v45 = vrot.slane %v565_v36, 4  ;;  %v570_v46 = vrot.slane %v568_v37, 5  ;;  %v3160_v53 = vld [vmem:[#allocation2 + $0x1c] sm:$0x1] }
  0x2d   : > { %v3155_v49 = vcombine.low %v3132_v29, %v3151_v44  ;;  %v581_v51 = vrot.slane %v579_v40, 4  ;;  %v576_v61 = vrot.slane %v574_v39, 5  ;;  %v584_v62 = vrot.slane %v582_v41, 5 }
  0x2e   : > { %v571_v60 = vor.u32 %v570_v46, %v567_v45  ;;  %v593_v63 = vshrl.u32 %v3151_v44, 16  ;;  %v590_v0 = vrot.slane %v588_v42, 5  ;;  %v596_v2 = vshll.u32 %v3151_v44, 16  ;;  %v2884_v46 = vld [vmem:[%s3684_s3 + $0xb0] sm:$0xff]  }
  0x2f   : > { %2662 = vmatmul.mubr.bf16.vlgmr.msra.gmra.mxu1 %v3155_v49  ;;  %v602_v3 = vshll.u32 %v3160_v53, 16  ;;  %v585_v6 = vor.u32 %v584_v62, %v581_v51  ;;  %v321_v19 = vmax.f32 %v313_v58, 0.0  ;;  %v409_v22 = vshrl.u32 %v2467_v11, 16  ;;  %v499_v62 = vld [vmem:[#allocation2 + $0x38] sm:$0xf] }
  0x30   : > { %2694 = vmatpush3.bf16.msra.mxu1 %v3081_v43  ;;  %v572_v5 = vrot.slane %v571_v60, 4  ;;  %v595_v7 = vrot.slane %v593_v63, 4  ;;  %v598_v9 = vrot.slane %v596_v2, 5  ;;  %v412_v23 = vshll.u32 %v2467_v11, 16 }
  0x31   : > { %2695 = vmatprep.subr.bf16.mxu1 %v2881_v50  ;;  %v604_v10 = vrot.slane %v602_v3, 5  ;;  %v586_v15 = vrot.slane %v585_v6, 4  ;;  %v2468_v33 = vpack.c.bf16 %v321_v19, %v321_v19  ;;  %v407_v34 = vrot.slane %v403_v47, 4 }
  0x32   : > { %v3175_v14 = vsel %vm3122_vm8, %v572_v5, %v576_v61  ;;  %v599_v20 = vor.u32 %v598_v9, %v595_v7  ;;  %v411_v37 = vrot.slane %v409_v22, 7  ;;  %v2469_v39 = vpack.c.bf16 %v322_v32, %v322_v32 }
  0x33   : > { %v2238_v43 = vcombine.low %v563_v31, %v3175_v14  ;;  %v3185_v36 = vsel %vm3122_vm8, %v586_v15, %v590_v0  ;;  %v417_v40 = vshrl.u32 %v2468_v33, 16  ;;  %v420_v41 = vshll.u32 %v2468_v33, 16  ;;  %v496_v0 = vld [vmem:[#allocation2 + $0x34] sm:$0x1] }
  0x34   : > { %2696 = vmatpush3.bf16.msra.mxu1 %v2881_v50  ;;  %v600_v31 = vrot.slane %v599_v20, 4  ;;  %v485_v42 = vsel %vm3101_vm5, %v407_v34, %v484_v25  ;;  %v414_v47 = vor.u32 %v412_v23, %v411_v37  ;;  %v415_v50 = vrot.slane %v411_v37, 4  ;;  %v2889_v15 = vld [vmem:[%s3684_s3 + $0xd0] sm:$0xff]   ;;  %v2888_v25 = vld [vmem:[%s3684_s3 + $0xa0] sm:$0xff]  }
  0x35   : > { %2637 = vmatprep.mubr.bf16.mxu0 %v2238_v43  ;;  %2697 = vmatprep.subr.bf16.mxu1 %v2883_v1  ;;  %486 = vst [vmem:[#allocation2 + $0x24] sm:$0x1] %v485_v42  ;;  %v419_v57 = vrot.slane %v417_v40, 7  ;;  %v425_v58 = vshrl.u32 %v2469_v39, 16  ;;  %v428_v60 = vshll.u32 %v2469_v39, 16  ;;  %v2486_v2 = vunpack.c.h.bf16 %v3128_v26  ;;  %v2886_v26 = vld [vmem:[%s3684_s3 + $0xa8] sm:$0xff]  }
  0x36   : > { %v3191_v45 = vsel %vm3122_vm8, %v600_v31, %v604_v10  ;;  %v488_v61 = vsel %vm3090_vm4, %v414_v47, %v487_v27  ;;  %v491_v63 = vsel %vm3101_vm5, %v415_v50, %v490_v38  ;;  %v958_v23 = vrot.slane %v3086_v52, 5  ;;  %v2891_v40 = vld [vmem:[%s3684_s3 + $0x98] sm:$0xff]   ;;  %v2899_v52 = vld [vmem:[%s3684_s3 + $0x170] sm:$0xff]  }
  0x37   : > { %v3198_v51 = vcombine.low %v3185_v36, %v3191_v45  ;;  %489 = vst [vmem:[#allocation2 + $0x28] sm:$0xf] %v488_v61  ;;  %v422_v3 = vor.u32 %v420_v41, %v419_v57  ;;  %v427_v4 = vrot.slane %v425_v58, 7  ;;  %492 = vst [vmem:[#allocation2 + $0x2c] sm:$0x1] %v491_v63  ;;  %v423_v5 = vrot.slane %v419_v57, 4 }
  0x38   : > { %2698 = vmatpush3.bf16.msra.mxu1 %v2883_v1  ;;  %v3209_v1 = vld [vmem:[#allocation2 + $0x20] sm:$0xf]  ;;  %v300_v43 = vmul.f32 %v2486_v2, %v3044_v12  ;;  %v2892_v12 = vld [vmem:[%s3684_s3 + $0xc8] sm:$0xff]   ;;  %v2264_v33 = vrot.slane %v3132_v29, 9  ;;  %v962_v34 = vrot.slane %v3134_v30, 5  ;;  %v2265_v47 = vrot.slane %v3151_v44, 9 }
  0x39   : > { %2699 = vmatprep.subr.bf16.mxu1 %v2885_v21  ;;  %2638 = vmatmul.mubr.bf16.vlgmr.msra.gmra.mxu0 %v3198_v51  ;;  %v607_v6 = vshrl.u32 %v3209_v1, 16  ;;  %v610_v7 = vshll.u32 %v3209_v1, 16  ;;  %v430_v9 = vor.u32 %v428_v60, %v427_v4  ;;  %v494_v10 = vsel %vm3090_vm4, %v422_v3, %v493_v48 }
  0x3a   : > { %2670 = vmatpush3.bf16.msra.mxu0 %v3097_v56  ;;  %v431_v11 = vrot.slane %v427_v4, 4  ;;  %v497_v13 = vsel %vm3101_vm5, %v423_v5, %v496_v0  ;;  %v2262_v56 = vrot.slane %v3054_v17, 9  ;;  %495 = vst [vmem:[#allocation2 + $0x30] sm:$0xf] %v494_v10  ;;  %v315_v38 = vadd.f32 %v3052_v16, %v300_v43  ;;  %v2895_v16 = vld [vmem:[%s3684_s3 + $0xc0] sm:$0xff]  }
  0x3b   : > { %2671 = vmatprep.subr.bf16.mxu0 %v2884_v46  ;;  %v609_v18 = vrot.slane %v607_v6, 4  ;;  %v612_v19 = vrot.slane %v610_v7, 5  ;;  %498 = vst [vmem:[#allocation2 + $0x34] sm:$0x1] %v497_v13  ;;  %v500_v20 = vsel %vm3090_vm4, %v430_v9, %v499_v62  ;;  %v966_v48 = vrot.slane %v3142_v35, 5 }
  0x3c   : > { %2700 = vmatpush3.bf16.msra.mxu1 %v2885_v21  ;;  %v3228_v21 = vld [vmem:[#allocation2 + $0x24] sm:$0x1]  ;;  %v503_v22 = vsel %vm3101_vm5, %v431_v11, %v502_v8  ;;  %501 = vst [vmem:[#allocation2 + $0x38] sm:$0xf] %v500_v20  ;;  %v2263_v0 = vrot.slane %v3130_v28, 9  ;;  %v323_v2 = vmax.f32 %v315_v38, 0.0  ;;  %v2314_v8 = vcombine.low %v3130_v28, %v3132_v29 }
  0x3d   : > { %2701 = vmatprep.subr.bf16.mxu1 %v2887_v55  ;;  %504 = vst [vmem:[#allocation2 + $0x3c] sm:$0x1] %v503_v22  ;;  %v613_v27 = vor.u32 %v612_v19, %v609_v18  ;;  %v616_v32 = vshll.u32 %v3228_v21, 16  ;;  %v2894_v19 = vld [vmem:[%s3684_s3 + $0x90] sm:$0xff]   ;;  %v2266_v17 = vrot.slane %v3209_v1, 9 }
  0x3e   : > { %2672 = vmatpush3.bf16.msra.mxu0 %v2884_v46  ;;  %v3242_v31 = vld [vmem:[#allocation2 + $0x28] sm:$0xf]  ;;  %v3244_v37 = vld [vmem:[#allocation2 + $0x2c] sm:$0x1] }
  0x3f   : > { %2673 = vmatprep.subr.bf16.mxu0 %v2886_v26  ;;  %v3249_v39 = vcombine.low %v3209_v1, %v3242_v31  ;;  %v621_v41 = vshrl.u32 %v3242_v31, 16  ;;  %v624_v42 = vshll.u32 %v3242_v31, 16  ;;  %v630_v46 = vshll.u32 %v3244_v37, 16 }
  0x40   : > { %2702 = vmatpush3.bf16.msra.mxu1 %v2887_v55  ;;  %v614_v55 = vrot.slane %v613_v27, 4  ;;  %v618_v57 = vrot.slane %v616_v32, 5 }
  0x41   : > { %2703 = vmatprep.subr.bf16.mxu1 %v2889_v15  ;;  %v3262_v50 = vld [vmem:[#allocation2 + $0x30] sm:$0xf]  ;;  %v623_v58 = vrot.slane %v621_v41, 4  ;;  %v626_v60 = vrot.slane %v624_v42, 5  ;;  %2665 = vmatprep.mubr.bf16.mxu1 %v3249_v39  ;;  %v632_v5 = vrot.slane %v630_v46, 5  ;;  %v2896_v41 = vld [vmem:[%s3684_s3 + $0x88] sm:$0xff]  }
  0x42   : > { %2674 = vmatpush3.bf16.msra.mxu0 %v2886_v26  ;;  %v3265_v61 = vld [vmem:[#allocation2 + $0x34] sm:$0x1]  ;;  %v635_v62 = vshrl.u32 %v3262_v50, 16  ;;  %v638_v63 = vshll.u32 %v3262_v50, 16  ;;  %v3284_v13 = vsel %vm3122_vm8, %v614_v55, %v618_v57  ;;  %v2470_v57 = vpack.c.bf16 %v323_v2, %v323_v2 }
  0x43   : > { %2675 = vmatprep.subr.bf16.mxu0 %v2888_v25  ;;  %v3270_v3 = vld [vmem:[#allocation2 + $0x38] sm:$0xf]  ;;  %v627_v4 = vor.u32 %v626_v60, %v623_v58  ;;  %v644_v7 = vshll.u32 %v3265_v61, 16  ;;  %v959_v58 = vsel %vm3293_vm11, %v2262_v56, %v958_v23  ;;  %v2315_v60 = vcombine.low %v3151_v44, %v3209_v1 }
  0x44   : > { %2704 = vmatpush3.bf16.msra.mxu1 %v2889_v15  ;;  %v3272_v6 = vld [vmem:[#allocation2 + $0x3c] sm:$0x1]  ;;  %v3279_v26 = vcombine.low %v3262_v50, %v3270_v3  ;;  %v637_v9 = vrot.slane %v635_v62, 4  ;;  %v640_v10 = vrot.slane %v638_v63, 5  ;;  %v649_v11 = vshrl.u32 %v3270_v3, 16 }
  0x45   : > { %2705 = vmatprep.subr.bf16.mxu1 %v2892_v12  ;;  %v628_v15 = vrot.slane %v627_v4, 4  ;;  %v652_v18 = vshll.u32 %v3270_v3, 16  ;;  %v658_v28 = vshll.u32 %v3272_v6, 16  ;;  %v646_v32 = vrot.slane %v644_v7, 5  ;;  %v505_v63 = vld [vmem:[#allocation2 + $0x40] sm:$0xf] }
  0x46   : > { %2676 = vmatpush3.bf16.msra.mxu0 %v2888_v25  ;;  %2666 = vmatmul.mubr.bf16.gmra.mxu1 %v3279_v26  ;;  %v641_v20 = vor.u32 %v640_v10, %v637_v9  ;;  %v651_v22 = vrot.slane %v649_v11, 4  ;;  %v2897_v25 = vld [vmem:[%s3684_s3 + $0x178] sm:$0xff]   ;;  %v436_v56 = vshll.u32 %v2470_v57, 16  ;;  %v2316_v62 = vcombine.low %v3242_v31, %v3262_v50  ;;  %v508_v10 = vld [vmem:[#allocation2 + $0x44] sm:$0x1] }
  0x47   : > { %2677 = vmatprep.subr.bf16.mxu0 %v2891_v40  ;;  %v3304_v27 = vsel %vm3122_vm8, %v628_v15, %v632_v5  ;;  %v654_v38 = vrot.slane %v652_v18, 5  ;;  %2709 = vmatprep.mubr.bf16.mxu1 %v2314_v8  ;;  %v660_v55 = vrot.slane %v658_v28, 5  ;;  %v2267_v1 = vrot.slane %v3242_v31, 9  ;;  %v2901_v31 = vld [vmem:[%s3684_s3 + $0x168] sm:$0xff]  }
  0x48   : > { %2706 = vmatpush3.bf16.msra.mxu1 %v2892_v12  ;;  %v970_v12 = vrot.slane %v3160_v53, 5  ;;  %v3311_v42 = vcombine.low %v3284_v13, %v3304_v27  ;;  %v642_v46 = vrot.slane %v641_v20, 4  ;;  %v978_v7 = vrot.slane %v3244_v37, 5  ;;  %v2902_v20 = vld [vmem:[%s3684_s3 + $0x130] sm:$0xff]  }
  0x49   : > { %2707 = vmatprep.subr.bf16.mxu1 %v2895_v16  ;;  %v655_v53 = vor.u32 %v654_v38, %v651_v22  ;;  %v967_v37 = vsel %vm3293_vm11, %v2264_v33, %v966_v48  ;;  %v2268_v33 = vrot.slane %v3262_v50, 9  ;;  %v2269_v28 = vrot.slane %v3270_v3, 9  ;;  %v2905_v50 = vld [vmem:[%s3684_s3 + $0x158] sm:$0xff]  }
  0x4a   : > { %2678 = vmatpush3.bf16.msra.mxu0 %v2891_v40  ;;  %v3323_v40 = vsel %vm3293_vm11, %v2263_v0, %v962_v34  ;;  %2641 = vmatprep.mubr.bf16.mxu0 %v3311_v42  ;;  %v3334_v30 = vsel %vm3122_vm8, %v642_v46, %v646_v32  ;;  %v974_v34 = vrot.slane %v3228_v21, 5  ;;  %v2898_v0 = vld [vmem:[%s3684_s3 + $0x80] sm:$0xff]   ;;  %v3371_v18 = vsel %vm3293_vm11, %v2265_v47, %v970_v12  ;;  %v2904_v32 = vld [vmem:[%s3684_s3 + $0x128] sm:$0xff]  }
  0x4b   : > { %2679 = vmatprep.subr.bf16.mxu0 %v2894_v19  ;;  %v656_v23 = vrot.slane %v655_v53, 4  ;;  %v2286_v5 = vcombine.low %v959_v58, %v3323_v40  ;;  %v3385_v35 = vsel %vm3293_vm11, %v2267_v1, %v978_v7  ;;  %v3388_v44 = vcombine.low %v967_v37, %v3371_v18  ;;  %v2913_v53 = vld [vmem:[%s3684_s3 + $0x1f8] sm:$0xff]  }
  0x4c   : > { %2708 = vmatpush3.bf16.msra.mxu1 %v2895_v16  ;;  %v433_v16 = vshrl.u32 %v2470_v57, 16  ;;  %v3381_v29 = vsel %vm3293_vm11, %v2266_v17, %v974_v34  ;;  %v982_v47 = vrot.slane %v3265_v61, 5  ;;  %v2371_v22 = vcombine.low %v3323_v40, %v967_v37  ;;  %v2910_v57 = vld [vmem:[%s3684_s3 + $0x110] sm:$0xff]  }
  0x4d   : > { %2741 = vmatprep.subr.bf16.mxu1 %v2897_v25  ;;  %v3345_v4 = vsel %vm3122_vm8, %v656_v23, %v660_v55  ;;  %v3394_v48 = vcombine.low %v3381_v29, %v3385_v35  ;;  %v2342_v46 = vcombine.low %v3175_v14, %v3185_v36  ;;  %v2909_v55 = vld [vmem:[%s3684_s3 + $0x148] sm:$0xff]   ;;  %v2908_v14 = vld [vmem:[%s3684_s3 + $0x118] sm:$0xff]   ;;  %v2911_v36 = vld [vmem:[%s3684_s3 + $0x140] sm:$0xff]  }
  0x4e   : > { %2680 = vmatpush3.bf16.msra.mxu0 %v2894_v19  ;;  %v435_v2 = vrot.slane %v433_v16, 7  ;;  %v3350_v21 = vcombine.low %v3334_v30, %v3345_v4  ;;  %v986_v19 = vrot.slane %v3272_v6, 5  ;;  %v983_v6 = vsel %vm3293_vm11, %v2268_v33, %v982_v47  ;;  %v2915_v34 = vld [vmem:[%s3684_s3 + $0x1f0] sm:$0xff]   ;;  %v2924_v33 = vld [vmem:[%s3684_s3 + $0x198] sm:$0xff]  }
  0x4f   : > { %2681 = vmatprep.subr.bf16.mxu0 %v2896_v41  ;;  %2710 = vmatmul.mubr.bf16.vlgmr.msra.gmra.mxu1 %v2315_v60  ;;  %v2372_v60 = vcombine.low %v3371_v18, %v3381_v29  ;;  %v2373_v16 = vcombine.low %v3385_v35, %v983_v6  ;;  %v2918_v18 = vld [vmem:[%s3684_s3 + $0x1b0] sm:$0xff]  }
  0x50   : > { %v438_v8 = vor.u32 %v436_v56, %v435_v2  ;;  %v439_v9 = vrot.slane %v435_v2, 4  ;;  %2742 = vmatpush3.bf16.msra.mxu1 %v2897_v25  ;;  %2713 = vmatprep.mubr.bf16.mxu1 %v2316_v62  ;;  %v3413_v25 = vsel %vm3293_vm11, %v2269_v28, %v986_v19  ;;  %v2917_v2 = vld [vmem:[%s3684_s3 + $0x1e8] sm:$0xff]  }
  0x51   : > { %2642 = vmatmul.mubr.bf16.gmra.mxu0 %v3350_v21  ;;  %2743 = vmatprep.subr.bf16.mxu1 %v2899_v52  ;;  %v3421_v38 = vcombine.low %v983_v6, %v3413_v25  ;;  %v3511_v19 = vld [vmem:[#allocation2 + $0x4c] sm:$0x1]  ;;  %v2929_v6 = vld [vmem:[%s3684_s3 + $0x238] sm:$0xff]  }
  0x52   : > { %v506_v11 = vsel %vm3090_vm4, %v438_v8, %v505_v63  ;;  %v509_v15 = vsel %vm3101_vm5, %v439_v9, %v508_v10  ;;  %2682 = vmatpush3.bf16.msra.mxu0 %v2896_v41  ;;  %2685 = vmatprep.mubr.bf16.mxu0 %v2286_v5  ;;  %v2907_v41 = vld [vmem:[%s3684_s3 + $0x150] sm:$0xff]   ;;  %v2916_v8 = vld [vmem:[%s3684_s3 + $0x1b8] sm:$0xff]   ;;  %v2343_v10 = vcombine.low %v3191_v45, %v3284_v13 }
  0x53   : > { %507 = vst [vmem:[#allocation2 + $0x40] sm:$0xf] %v506_v11  ;;  %510 = vst [vmem:[#allocation2 + $0x44] sm:$0x1] %v509_v15  ;;  %2683 = vmatprep.subr.bf16.mxu0 %v2898_v0  ;;  %v2344_v11 = vcombine.low %v3304_v27, %v3334_v30  ;;  %v2921_v45 = vld [vmem:[%s3684_s3 + $0x1d8] sm:$0xff]   ;;  %v2920_v27 = vld [vmem:[%s3684_s3 + $0x1a8] sm:$0xff]  }
  0x54   : > { %2744 = vmatpush3.bf16.msra.mxu1 %v2899_v52  ;;  %v2912_v52 = vld [vmem:[%s3684_s3 + $0x108] sm:$0xff]  }
  0x55   : > { %2745 = vmatprep.subr.bf16.mxu1 %v2901_v31 }
  0x56   : > { %2684 = vmatpush3.bf16.msra.mxu0 %v2898_v0  ;;  %v2914_v0 = vld [vmem:[%s3684_s3 + $0x100] sm:$0xff]  }
  0x57   : > { %2717 = vmatprep.subr.bf16.mxu0 %v2900_v54 }
  0x58   : > { %2746 = vmatpush3.bf16.msra.mxu1 %v2901_v31  ;;  %v2919_v31 = vld [vmem:[%s3684_s3 + $0x1e0] sm:$0xff]  }
  0x59   : > { %2686 = vmatmul.mubr.bf16.vlgmr.msra.gmra.mxu0 %v3388_v44  ;;  %2747 = vmatprep.subr.bf16.mxu1 %v2903_v59 }
  0x5a   : > { %v3405_v61 = vld [vmem:[#allocation2 + $0x40] sm:$0xf]  ;;  %2718 = vmatpush3.bf16.msra.mxu0 %v2900_v54  ;;  %2689 = vmatprep.mubr.bf16.mxu0 %v3394_v48  ;;  %v528_v17 = vld [vmem:[#allocation2 + $0x44] sm:$0x1]  ;;  %v2923_v54 = vld [vmem:[%s3684_s3 + $0x1d0] sm:$0xff]  }
  0x5b   : > { %v2317_v12 = vcombine.low %v3270_v3, %v3405_v61  ;;  %2719 = vmatprep.subr.bf16.mxu0 %v2902_v20  ;;  %v2906_v3 = vld [vmem:[%s3684_s3 + $0x120] sm:$0xff]   ;;  %v1291_v58 = vshrl.u32 %v3405_v61, 16  ;;  %v1294_v40 = vshll.u32 %v3405_v61, 16  ;;  %v2354_v56 = vrot.slane %v3405_v61, 9 }
  0x5c   : > { %2748 = vmatpush3.bf16.msra.mxu1 %v2903_v59  ;;  %v1454_v23 = vrot.slane %v528_v17, 5  ;;  %v1300_v7 = vshll.u32 %v528_v17, 16  ;;  %v2922_v59 = vld [vmem:[%s3684_s3 + $0x1a0] sm:$0xff]  }
  0x5d   : > { %2749 = vmatprep.subr.bf16.mxu1 %v2905_v50  ;;  %2714 = vmatmul.mubr.bf16.gmra.mxu1 %v2317_v12  ;;  %v1293_v62 = vrot.slane %v1291_v58, 4  ;;  %v1296_v63 = vrot.slane %v1294_v40, 5 }
  0x5e   : > { %2720 = vmatpush3.bf16.msra.mxu0 %v2902_v20  ;;  %2757 = vmatprep.mubr.bf16.mxu1 %v2371_v22  ;;  %v3464_v1 = vsel %vm3293_vm11, %v2354_v56, %v1454_v23  ;;  %v1302_v37 = vrot.slane %v1300_v7, 5  ;;  %v2927_v20 = vld [vmem:[%s3684_s3 + $0x1c0] sm:$0xff]   ;;  %v1755_v22 = vshll.u32 %v3511_v19, 16 }
  0x5f   : > { %2721 = vmatprep.subr.bf16.mxu0 %v2904_v32  ;;  %v1297_v5 = vor.u32 %v1296_v63, %v1293_v62  ;;  %v2374_v9 = vcombine.low %v3413_v25, %v3464_v1  ;;  %v2928_v25 = vld [vmem:[%s3684_s3 + $0x188] sm:$0xff]  }
  0x60   : > { %2750 = vmatpush3.bf16.msra.mxu1 %v2905_v50 }
  0x61   : > { %2690 = vmatmul.mubr.bf16.gmra.mxu0 %v3421_v38  ;;  %2751 = vmatprep.subr.bf16.mxu1 %v2907_v41  ;;  %v1298_v15 = vrot.slane %v1297_v5, 4 }
  0x62   : > { %2722 = vmatpush3.bf16.msra.mxu0 %v2904_v32  ;;  %2733 = vmatprep.mubr.bf16.mxu0 %v2342_v46  ;;  %v1757_v32 = vrot.slane %v1755_v22, 5  ;;  %v2930_v46 = vld [vmem:[%s3684_s3 + $0x180] sm:$0xff]  }
  0x63   : > { %2723 = vmatprep.subr.bf16.mxu0 %v2906_v3  ;;  %v1303_v13 = vsel %vm3122_vm8, %v1298_v15, %v1302_v37 }
  0x64   : > { %2752 = vmatpush3.bf16.msra.mxu1 %v2907_v41  ;;  %v2345_v30 = vcombine.low %v3345_v4, %v1303_v13  ;;  %v2925_v4 = vld [vmem:[%s3684_s3 + $0x1c8] sm:$0xff]   ;;  %v2931_v41 = vld [vmem:[%s3684_s3 + $0x230] sm:$0xff]  }
  0x65   : > { %2753 = vmatprep.subr.bf16.mxu1 %v2909_v55 }
  0x66   : > { %2724 = vmatpush3.bf16.msra.mxu0 %v2906_v3 }
  0x67   : > { %2725 = vmatprep.subr.bf16.mxu0 %v2908_v14 }
  0x68   : > { %2754 = vmatpush3.bf16.msra.mxu1 %v2909_v55  ;;  %v2932_v55 = vld [vmem:[%s3684_s3 + $0x228] sm:$0xff]  }
  0x69   : > { %2755 = vmatprep.subr.bf16.mxu1 %v2911_v36 }
  0x6a   : > { %2726 = vmatpush3.bf16.msra.mxu0 %v2908_v14 }
  0x6b   : > { %2727 = vmatprep.subr.bf16.mxu0 %v2910_v57 }
  0x6c   : > { %2756 = vmatpush3.bf16.msra.mxu1 %v2911_v36  ;;  %v2937_v36 = vld [vmem:[%s3684_s3 + $0x200] sm:$0xff]  }
  0x6d   : > { %2789 = vmatprep.subr.bf16.mxu1 %v2913_v53 }
  0x6e   : > { %2728 = vmatpush3.bf16.msra.mxu0 %v2910_v57 }
  0x6f   : > { %2729 = vmatprep.subr.bf16.mxu0 %v2912_v52  ;;  %2758 = vmatmul.mubr.bf16.vlgmr.msra.gmra.mxu1 %v2372_v60 }
  0x70   : > { %2790 = vmatpush3.bf16.msra.mxu1 %v2913_v53  ;;  %2761 = vmatprep.mubr.bf16.mxu1 %v2373_v16 }
  0x71   : > { %2791 = vmatprep.subr.bf16.mxu1 %v2915_v34 }
  0x72   : > { %2730 = vmatpush3.bf16.msra.mxu0 %v2912_v52 }
  0x73   : > { %2731 = vmatprep.subr.bf16.mxu0 %v2914_v0 }
  0x74   : > { %2792 = vmatpush3.bf16.msra.mxu1 %v2915_v34 }
  0x75   : > { %2793 = vmatprep.subr.bf16.mxu1 %v2917_v2 }
  0x76   : > { %2732 = vmatpush3.bf16.msra.mxu0 %v2914_v0 }
  0x77   : > { %2765 = vmatprep.subr.bf16.mxu0 %v2916_v8  ;;  %2762 = vmatmul.mubr.bf16.gmra.mxu1 %v2374_v9 }
  0x78   : > { %2794 = vmatpush3.bf16.msra.mxu1 %v2917_v2  ;;  %2805 = vmatprep.mubr.bf16.mxu1 %v3198_v51  ;;  %v3494_v51 = vld [vmem:[#allocation2 + $0x48] sm:$0xf] }
  0x79   : > { %2734 = vmatmul.mubr.bf16.vlgmr.msra.gmra.mxu0 %v2343_v10  ;;  %2795 = vmatprep.subr.bf16.mxu1 %v2919_v31  ;;  %v1746_v29 = vshrl.u32 %v3494_v51, 16  ;;  %v1749_v35 = vshll.u32 %v3494_v51, 16 }
  0x7a   : > { %2766 = vmatpush3.bf16.msra.mxu0 %v2916_v8  ;;  %2737 = vmatprep.mubr.bf16.mxu0 %v2344_v11 }
  0x7b   : > { %2767 = vmatprep.subr.bf16.mxu0 %v2918_v18  ;;  %v1748_v47 = vrot.slane %v1746_v29, 4  ;;  %v1751_v28 = vrot.slane %v1749_v35, 5 }
  0x7c   : > { %2796 = vmatpush3.bf16.msra.mxu1 %v2919_v31 }
  0x7d   : > { %2797 = vmatprep.subr.bf16.mxu1 %v2921_v45  ;;  %v1752_v50 = vor.u32 %v1751_v28, %v1748_v47 }
  0x7e   : > { %2768 = vmatpush3.bf16.msra.mxu0 %v2918_v18 }
  0x7f   : > { %2769 = vmatprep.subr.bf16.mxu0 %v2920_v27  ;;  %v1753_v12 = vrot.slane %v1752_v50, 4 }
  0x80   : > { %2798 = vmatpush3.bf16.msra.mxu1 %v2921_v45 }
  0x81   : > { %2738 = vmatmul.mubr.bf16.gmra.mxu0 %v2345_v30  ;;  %2799 = vmatprep.subr.bf16.mxu1 %v2923_v54  ;;  %v1758_v3 = vsel %vm3122_vm8, %v1753_v12, %v1757_v32 }
  0x82   : > { %2770 = vmatpush3.bf16.msra.mxu0 %v2920_v27  ;;  %2781 = vmatprep.mubr.bf16.mxu0 %v3155_v49  ;;  %v2926_v49 = vld [vmem:[%s3684_s3 + $0x190] sm:$0xff]   ;;  %v2424_v14 = vcombine.low %v1303_v13, %v1758_v3 }
  0x83   : > { %2771 = vmatprep.subr.bf16.mxu0 %v2922_v59 }
  0x84   : > { %2800 = vmatpush3.bf16.msra.mxu1 %v2923_v54 }
  0x85   : > { %2801 = vmatprep.subr.bf16.mxu1 %v2925_v4 }
  0x86   : > { %2772 = vmatpush3.bf16.msra.mxu0 %v2922_v59 }
  0x87   : > { %2773 = vmatprep.subr.bf16.mxu0 %v2924_v33 }
  0x88   : > { %2802 = vmatpush3.bf16.msra.mxu1 %v2925_v4 }
  0x89   : > { %2803 = vmatprep.subr.bf16.mxu1 %v2927_v20 }
  0x8a   : > { %2774 = vmatpush3.bf16.msra.mxu0 %v2924_v33 }
  0x8b   : > { %2775 = vmatprep.subr.bf16.mxu0 %v2926_v49 }
  0x8c   : > { %2804 = vmatpush3.bf16.msra.mxu1 %v2927_v20 }
  0x8d   : > { %2837 = vmatprep.subr.bf16.mxu1 %v2929_v6 }
  0x8e   : > { %2776 = vmatpush3.bf16.msra.mxu0 %v2926_v49 }
  0x8f   : > { %2777 = vmatprep.subr.bf16.mxu0 %v2928_v25  ;;  %2806 = vmatmul.mubr.bf16.vlgmr.msra.gmra.mxu1 %v3311_v42  ;;  %v2933_v42 = vld [vmem:[%s3684_s3 + $0x220] sm:$0xff]  }
  0x90   : > { %2845 = vmatpush3.bf16.msra.mxu1 %v2929_v6  ;;  %2809 = vmatprep.mubr.bf16.mxu1 %v3350_v21  ;;  %v2399_v21 = vcombine.low %v3405_v61, %v3494_v51  ;;  %v1903_v61 = vrot.slane %v3511_v19, 5 }
  0x91   : > { %2838 = vmatprep.subr.bf16.mxu1 %v2931_v41 }
  0x92   : > { %2778 = vmatpush3.bf16.msra.mxu0 %v2928_v25 }
  0x93   : > { %2779 = vmatprep.subr.bf16.mxu0 %v2930_v46 }
  0x94   : > { %2846 = vmatpush3.bf16.msra.mxu1 %v2931_v41 }
  0x95   : > { %2839 = vmatprep.subr.bf16.mxu1 %v2932_v55 }
  0x96   : > { %2780 = vmatpush3.bf16.msra.mxu0 %v2930_v46 }
  0x97   : > { %2813 = vmatprep.subr.bf16.mxu0 %v2929_v6  ;;  %2810 = vmatmul.mubr.bf16.gmra.mxu1 %v2424_v14 }
  0x98   : > { %2847 = vmatpush3.bf16.msra.mxu1 %v2932_v55  ;;  %2833 = vmatprep.mubr.bf16.mxu1 %v3421_v38  ;;  %v2935_v38 = vld [vmem:[%s3684_s3 + $0x210] sm:$0xff]  }
  0x99   : > { %2782 = vmatmul.mubr.bf16.vlgmr.msra.gmra.mxu0 %v3249_v39  ;;  %2840 = vmatprep.subr.bf16.mxu1 %v2933_v42  ;;  %v2936_v39 = vld [vmem:[%s3684_s3 + $0x208] sm:$0xff]  }
  0x9a   : > { %2814 = vmatpush3.bf16.msra.mxu0 %v2929_v6  ;;  %2785 = vmatprep.mubr.bf16.mxu0 %v3279_v26  ;;  %v2433_v26 = vrot.slane %v3494_v51, 9 }
  0x9b   : > { %2815 = vmatprep.subr.bf16.mxu0 %v2931_v41 }
  0x9c   : > { %2848 = vmatpush3.bf16.msra.mxu1 %v2933_v42  ;;  %v1904_v57 = vsel %vm3293_vm11, %v2433_v26, %v1903_v61 }
  0x9d   : > { %2841 = vmatprep.subr.bf16.mxu1 %v2934_v24 }
  0x9e   : > { %2816 = vmatpush3.bf16.msra.mxu0 %v2931_v41 }
  0x9f   : > { %2817 = vmatprep.subr.bf16.mxu0 %v2932_v55 }
  0xa0   : > { %2849 = vmatpush3.bf16.msra.mxu1 %v2934_v24 }
  0xa1   : > { %2786 = vmatmul.mubr.bf16.gmra.mxu0 %v2399_v21  ;;  %2842 = vmatprep.subr.bf16.mxu1 %v2935_v38 }
  0xa2   : > { %2818 = vmatpush3.bf16.msra.mxu0 %v2932_v55  ;;  %2829 = vmatprep.mubr.bf16.mxu0 %v3388_v44  ;;  %v2450_v44 = vcombine.low %v3464_v1, %v1904_v57 }
  0xa3   : > { %2819 = vmatprep.subr.bf16.mxu0 %v2933_v42 }
  0xa4   : > { %2850 = vmatpush3.bf16.msra.mxu1 %v2935_v38 }
  0xa5   : > { %2843 = vmatprep.subr.bf16.mxu1 %v2936_v39 }
  0xa6   : > { %2820 = vmatpush3.bf16.msra.mxu0 %v2933_v42 }
  0xa7   : > { %2821 = vmatprep.subr.bf16.mxu0 %v2934_v24 }
  0xa8   : > { %2851 = vmatpush3.bf16.msra.mxu1 %v2936_v39 }
  0xa9   : > { %2844 = vmatprep.subr.bf16.mxu1 %v2937_v36 }
  0xaa   : > { %2822 = vmatpush3.bf16.msra.mxu0 %v2934_v24 }
  0xab   : > { %2823 = vmatprep.subr.bf16.mxu0 %v2935_v38 }
  0xac   : > { %2852 = vmatpush3.bf16.msra.mxu1 %v2937_v36 }
  0xae   : > { %2824 = vmatpush3.bf16.msra.mxu0 %v2935_v38 }
  0xaf   : > { %2825 = vmatprep.subr.bf16.mxu0 %v2936_v39  ;;  %2834 = vmatmul.mubr.bf16.vlgmr.msra.gmra.mxu1 %v2450_v44 }
  0xb2   : > { %2826 = vmatpush3.bf16.msra.mxu0 %v2936_v39 }
  0xb3   : > { %2827 = vmatprep.subr.bf16.mxu0 %v2937_v36 }
  0xb6   : > { %2828 = vmatpush3.bf16.msra.mxu0 %v2937_v36 }
  0xb9   : > { %2830 = vmatmul.mubr.bf16.vlgmr.msra.gmra.mxu0 %v3394_v48 }
  0xef   : > { %v3566_v53 = vpop.f32.mrf.mxu1 }
  0xf1   : > { %v3568_v58 = vpop.f32.mrf.mxu1 }
  0xf3   : > { %v3570_v43 = vpop.f32.mrf.mxu1 }
  0xf5   : > { %v3574_v60 = vpop.f32.mrf.mxu1 }
  0xf9   : > { %v3572_v40 = vpop.f32.mrf.mxu0 }
  0xfb   : > { %v3576_v52 = vpop.f32.mrf.mxu0 }
  0xfd   : > { %v3578_v16 = vpop.f32.mrf.mxu0 }
  0xff   : > { %v3580_v23 = vpop.f32.mrf.mxu0 }
 0x106   : > { %v2667_v17 = vpop.f32.mrf.mxu1 }
 0x108   : > { %v930_v56 = vpop.f32.mrf.mxu1 }
 0x10a   : > { %v2668_v34 = vpop.f32.mrf.mxu1 }
 0x10c   : > { %v933_v63 = vpop.f32.mrf.mxu1 }
 0x10f   : > { %v3582_v0 = vpop.f32.mrf.mxu1 }
 0x111   : > { %v2643_v48 = vpop.f32.mrf.mxu0  ;;  %v3584_v2 = vpop.f32.mrf.mxu1 }
 0x112   : > { %v939_v21 = vadd.f32 %v2667_v17, %v2643_v48  ;;  %v923_v17 = vadd.f32 %v3566_v53, %v3572_v40 }
 0x113   : > { %v793_v62 = vpop.f32.mrf.mxu0  ;;  %v3588_v8 = vpop.f32.mrf.mxu1 }
 0x114   : > { %v931_v61 = vadd.f32 %v930_v56, %v793_v62  ;;  %v926_v62 = vadd.f32 %v3570_v43, %v3578_v16 }
 0x115   : > { %v2644_v1 = vpop.f32.mrf.mxu0  ;;  %v3592_v10 = vpop.f32.mrf.mxu1 }
 0x116   : > { %v942_v38 = vadd.f32 %v2668_v34, %v2644_v1  ;;  %v915_v34 = vadd.f32 %v3568_v58, %v3576_v52 }
 0x117   : > { %v796_v5 = vpop.f32.mrf.mxu0 }
 0x118   : > { %v934_v36 = vadd.f32 %v933_v63, %v796_v5  ;;  %v918_v5 = vadd.f32 %v3574_v60, %v3580_v23 }
 0x119   : > { %v3586_v7 = vpop.f32.mrf.mxu0 }
 0x11b   : > { %v3590_v9 = vpop.f32.mrf.mxu0 }
 0x11d   : > { %v2688_v31 = vpop.f32.mrf.mxu0  ;;  %v2715_v11 = vpop.f32.mrf.mxu1 }
 0x11f   : > { %v3594_v15 = vpop.f32.mrf.mxu0  ;;  %v1267_v37 = vpop.f32.mrf.mxu1 }
 0x120   : > { %v1135_v40 = vadd.f32 %v3594_v15, %v918_v5 }
 0x121   : > { %v2691_v18 = vpop.f32.mrf.mxu0  ;;  %v2716_v45 = vpop.f32.mrf.mxu1 }
 0x122   : > { %v1140_v57 = vadd.f32 %v2691_v18, %v939_v21  ;;  %v1137_v18 = vadd.f32 %v2688_v31, %v926_v62  ;;  %v1283_v31 = vadd.f32 %v3592_v10, %v1135_v40 }
 0x123   : > { %v1119_v13 = vpop.f32.mrf.mxu0  ;;  %v1270_v27 = vpop.f32.mrf.mxu1 }
 0x124   : > { %v1285_v23 = vadd.f32 %v3588_v8, %v1137_v18 }
 0x125   : > { %v2692_v51 = vpop.f32.mrf.mxu0 }
 0x126   : > { %v1141_v44 = vadd.f32 %v2692_v51, %v942_v38 }
 0x127   : > { %v1122_v59 = vpop.f32.mrf.mxu0 }
 0x12f   : > { %v3596_v30 = vpop.f32.mrf.mxu1 }
 0x131   : > { %v3598_v54 = vpop.f32.mrf.mxu1 }
 0x132   : > { %3697 = vst [vmem:[#allocation3_spill] sm:$0xff] %v3598_v54 }
 0x133   : > { %v3602_v35 = vpop.f32.mrf.mxu1 }
 0x134   : > { %3698 = vst [vmem:[#allocation4_spill] sm:$0xff] %v3602_v35 }
 0x135   : > { %v3606_v33 = vpop.f32.mrf.mxu1 }
 0x136   : > { %3699 = vst [vmem:[#allocation5_spill] sm:$0xff] %v3606_v33  ;;  %v1288_v33 = vadd.f32 %v2715_v11, %v1140_v57  ;;  %v1136_v11 = vadd.f32 %v3586_v7, %v923_v17 }
 0x137   : > { %v2763_v28 = vpop.f32.mrf.mxu1 }
 0x138   : > { %v1284_v16 = vadd.f32 %v3582_v0, %v1136_v11 }
 0x139   : > { %v3600_v29 = vpop.f32.mrf.mxu0  ;;  %v1580_v20 = vpop.f32.mrf.mxu1 }
 0x13a   : > { %v1445_v15 = vadd.f32 %v3600_v29, %v1284_v16 }
 0x13b   : > { %v3604_v4 = vpop.f32.mrf.mxu0  ;;  %v2764_v50 = vpop.f32.mrf.mxu1 }
 0x13d   : > { %v3608_v47 = vpop.f32.mrf.mxu0  ;;  %v1583_v6 = vpop.f32.mrf.mxu1 }
 0x13f   : > { %v3610_v19 = vpop.f32.mrf.mxu0 }
 0x140   : > { %v1444_v0 = vadd.f32 %v3610_v19, %v1283_v31 }
 0x141   : > { %v2739_v49 = vpop.f32.mrf.mxu0 }
 0x142   : > { %v1449_v54 = vadd.f32 %v2739_v49, %v1288_v33  ;;  %v1446_v33 = vadd.f32 %v3608_v47, %v1285_v23 }
 0x143   : > { %v1428_v22 = vpop.f32.mrf.mxu0 }
 0x145   : > { %v2740_v12 = vpop.f32.mrf.mxu0 }
 0x147   : > { %v1431_v41 = vpop.f32.mrf.mxu0 }
 0x14f   : > { %v3612_v25 = vpop.f32.mrf.mxu1 }
 0x150   : > { %3700 = vst [vmem:[#allocation6_spill] sm:$0xff] %v3612_v25  ;;  %v1139_v25 = vadd.f32 %v1122_v59, %v934_v36 }
 0x151   : > { %v3614_v32 = vpop.f32.mrf.mxu1 }
 0x152   : > { %3701 = vst [vmem:[#allocation7_spill] sm:$0xff] %v3614_v32  ;;  %v1138_v32 = vadd.f32 %v1119_v13, %v931_v61 }
 0x153   : > { %v3618_v3 = vpop.f32.mrf.mxu1 }
 0x154   : > { %3703 = vst [vmem:[#allocation9_spill] sm:$0xff] %v3618_v3  ;;  %v1286_v35 = vadd.f32 %v1267_v37, %v1138_v32  ;;  %v1134_v37 = vadd.f32 %v3590_v9, %v915_v34 }
 0x155   : > { %v3624_v42 = vpop.f32.mrf.mxu1 }
 0x156   : > { %3706 = vst [vmem:[#allocation12_spill] sm:$0xff] %v3624_v42  ;;  %v1447_v63 = vadd.f32 %v1428_v22, %v1286_v35  ;;  %v1282_v59 = vadd.f32 %v3584_v2, %v1134_v37 }
 0x157   : > { %v2811_v26 = vpop.f32.mrf.mxu1  ;;  %v3713_v36 = vld [vmem:[#allocation6_spill] sm:$0xff] }
 0x158   : > { %v1599_v13 = vadd.f32 %v1580_v20, %v1447_v63 }
 0x159   : > { %v3616_v46 = vpop.f32.mrf.mxu0  ;;  %v1877_v3 = vpop.f32.mrf.mxu1 }
 0x15a   : > { %3702 = vst [vmem:[#allocation8_spill] sm:$0xff] %v3616_v46 }
 0x15b   : > { %v3620_v55 = vpop.f32.mrf.mxu0  ;;  %v2812_v48 = vpop.f32.mrf.mxu1  ;;  %v3715_v34 = vld [vmem:[#allocation9_spill] sm:$0xff] }
 0x15c   : > { %3704 = vst [vmem:[#allocation10_spill] sm:$0xff] %v3620_v55  ;;  %v1289_v55 = vadd.f32 %v2716_v45, %v1141_v44  ;;  %v1601_v45 = vadd.f32 %v2763_v28, %v1449_v54  ;;  %v1443_v54 = vadd.f32 %v3604_v4, %v1282_v59  ;;  %v3708_v4 = vld [vmem:[#allocation4_spill] sm:$0xff]  ;;  %v3714_v44 = vld [vmem:[#allocation7_spill] sm:$0xff] }
 0x15d   : > { %v3622_v14 = vpop.f32.mrf.mxu0  ;;  %v1880_v52 = vpop.f32.mrf.mxu1  ;;  %v1598_v47 = vadd.f32 %v3708_v4, %v1446_v33  ;;  %v3716_v62 = vld [vmem:[#allocation12_spill] sm:$0xff] }
 0x15e   : > { %3705 = vst [vmem:[#allocation11_spill] sm:$0xff] %v3622_v14  ;;  %v1287_v14 = vadd.f32 %v1270_v27, %v1139_v25  ;;  %v1450_v42 = vadd.f32 %v2740_v12, %v1289_v55  ;;  %v3707_v25 = vld [vmem:[#allocation3_spill] sm:$0xff] }
 0x15f   : > { %v3626_v24 = vpop.f32.mrf.mxu0  ;;  %v1595_v10 = vadd.f32 %v3707_v25, %v1443_v54 }
 0x160   : > { %v1448_v1 = vadd.f32 %v1431_v41, %v1287_v14  ;;  %v1602_v53 = vadd.f32 %v2764_v50, %v1450_v42  ;;  %v3709_v41 = vld [vmem:[#allocation5_spill] sm:$0xff] }
 0x161   : > { %v2787_v39 = vpop.f32.mrf.mxu0 }
 0x162   : > { %v1600_v27 = vadd.f32 %v1583_v6, %v1448_v1  ;;  %v1743_v51 = vadd.f32 %v2787_v39, %v1601_v45  ;;  %v1597_v6 = vadd.f32 %v3596_v30, %v1445_v15 }
 0x163   : > { %v1722_v46 = vpop.f32.mrf.mxu0  ;;  %v3711_v55 = vld [vmem:[#allocation10_spill] sm:$0xff] }
 0x164   : > { %v1741_v7 = vadd.f32 %v1722_v46, %v1599_v13  ;;  %v1898_v28 = vadd.f32 %v2811_v26, %v1743_v51  ;;  %v1596_v46 = vadd.f32 %v3709_v41, %v1444_v0  ;;  %v1737_v14 = vadd.f32 %v3711_v55, %v1595_v10 }
 0x165   : > { %v2788_v56 = vpop.f32.mrf.mxu0  ;;  %v3712_v42 = vld [vmem:[#allocation11_spill] sm:$0xff] }
 0x166   : > { %v1744_v43 = vadd.f32 %v2788_v56, %v1602_v53  ;;  %v1896_v49 = vadd.f32 %v1877_v3, %v1741_v7  ;;  %v3710_v3 = vld [vmem:[#allocation8_spill] sm:$0xff]  ;;  %v1740_v21 = vadd.f32 %v3712_v42, %v1598_v47  ;;  %v1738_v26 = vadd.f32 %v3626_v24, %v1596_v46 }
 0x167   : > { %v1725_v58 = vpop.f32.mrf.mxu0  ;;  %v1739_v30 = vadd.f32 %v3710_v3, %v1597_v6  ;;  %v1892_v17 = vadd.f32 %v3714_v44, %v1737_v14 }
 0x168   : > { %v1742_v9 = vadd.f32 %v1725_v58, %v1600_v27  ;;  %v1899_v20 = vadd.f32 %v2812_v48, %v1744_v43  ;;  %v1895_v56 = vadd.f32 %v3715_v34, %v1740_v21  ;;  %v1893_v63 = vadd.f32 %v3716_v62, %v1738_v26 }
 0x169   : > { %v1894_v57 = vadd.f32 %v3713_v36, %v1739_v30 }
 0x16a   : > { %v1897_v50 = vadd.f32 %v1880_v52, %v1742_v9 }
 0x16f   : > { %v2835_v60 = vpop.f32.mrf.mxu1 }
 0x170   : > { %v2044_v8 = vadd.f32 %v2835_v60, %v1898_v28 }
 0x171   : > { %v2023_v35 = vpop.f32.mrf.mxu1 }
 0x172   : > { %v2042_v19 = vadd.f32 %v2023_v35, %v1896_v49  ;;  %v2082_v15 = vmul.f32 %v2044_v8, %v2044_v8 }
 0x173   : > { %v2836_v2 = vpop.f32.mrf.mxu1 }
 0x174   : > { %v2045_v22 = vadd.f32 %v2836_v2, %v1899_v20  ;;  %v2080_v59 = vmul.f32 %v2042_v19, %v2042_v19 }
 0x175   : > { %v2026_v29 = vpop.f32.mrf.mxu1 }
 0x176   : > { %v2505_v12 = vpack.c.bf16 %v2045_v22, %v2044_v8  ;;  %v2043_v32 = vadd.f32 %v2026_v29, %v1897_v50  ;;  %v2083_v33 = vmul.f32 %v2045_v22, %v2045_v22 }
 0x178   : > { %2512 = vst [vmem:[%s3654_s30 + $0x18] sm:$0xff] %v2505_v12   ;;  %v2500_v38 = vpack.c.bf16 %v2043_v32, %v2042_v19  ;;  %v2081_v7 = vmul.f32 %v2043_v32, %v2043_v32 }
 0x179   : > { %v2831_v39 = vpop.f32.mrf.mxu0 }
 0x17a   : > { %2511 = vst [vmem:[%s3654_s30 + $0x10] sm:$0xff] %v2500_v38   ;;  %v2040_v1 = vadd.f32 %v2831_v39, %v1894_v57 }
 0x17b   : > { %v2007_v61 = vpop.f32.mrf.mxu0 }
 0x17c   : > { %v2038_v5 = vadd.f32 %v2007_v61, %v1892_v17  ;;  %v2078_v52 = vmul.f32 %v2040_v1, %v2040_v1 }
 0x17d   : > { %v2832_v48 = vpop.f32.mrf.mxu0 }
 0x17e   : > { %v2041_v11 = vadd.f32 %v2832_v48, %v1895_v56  ;;  %v2076_v53 = vmul.f32 %v2038_v5, %v2038_v5 }
 0x17f   : > { %v2010_v37 = vpop.f32.mrf.mxu0 }
 0x180   : > { %v2495_v18 = vpack.c.bf16 %v2041_v11, %v2040_v1  ;;  %v2039_v45 = vadd.f32 %v2010_v37, %v1893_v63  ;;  %v2079_v51 = vmul.f32 %v2041_v11, %v2041_v11 }
 0x182   : > { %2510 = vst [vmem:[%s3654_s30 + $0x8] sm:$0xff] %v2495_v18   ;;  %v2490_v24 = vpack.c.bf16 %v2039_v45, %v2038_v5  ;;  %v2062_v40 = vadd.f32 %v2039_v45, %v2038_v5  ;;  %v2077_v58 = vmul.f32 %v2039_v45, %v2039_v45 }
 0x184   : > { %2491 = vst [vmem:[%s3654_s30] sm:$0xff] %v2490_v24   ;;  %v2063_v13 = vadd.f32 %v2062_v40, %v2040_v1  ;;  %v2084_v27 = vadd.f32 %v2077_v58, %v2076_v53 }
 0x186   : > { %v2064_v43 = vadd.f32 %v2063_v13, %v2041_v11  ;;  %v2085_v16 = vadd.f32 %v2084_v27, %v2078_v52 }
 0x188   : > { %v2065_v60 = vadd.f32 %v2064_v43, %v2042_v19  ;;  %v2086_v23 = vadd.f32 %v2085_v16, %v2079_v51 }
 0x18a   : > { %v2066_v9 = vadd.f32 %v2065_v60, %v2043_v32  ;;  %v2087_v31 = vadd.f32 %v2086_v23, %v2080_v59 }
 0x18c   : > { %v2067_v54 = vadd.f32 %v2066_v9, %v2044_v8  ;;  %v2088_v35 = vadd.f32 %v2087_v31, %v2081_v7 }
 0x18e   : > { %v2068_v28 = vadd.f32 %v2067_v54, %v2045_v22  ;;  %v2089_v20 = vadd.f32 %v2088_v35, %v2082_v15 }
 0x190   : > { %v2069_v0 = vrot.slane %v2068_v28, 4  ;;  %v2090_v2 = vadd.f32 %v2089_v20, %v2083_v33 }
 0x192   : > { %v2070_v49 = vadd.f32 %v2069_v0, %v2068_v28  ;;  %v2091_v50 = vrot.slane %v2090_v2, 4 }
 0x194   : > { %v2071_v6 = vrot.slane %v2070_v49, 2  ;;  %v2092_v25 = vadd.f32 %v2091_v50, %v2090_v2 }
 0x196   : > { %v2072_v10 = vadd.f32 %v2071_v6, %v2070_v49  ;;  %v2093_v29 = vrot.slane %v2092_v25, 2 }
 0x198   : > { %v2073_v4 = vrot.slane %v2072_v10, 1  ;;  %v2094_v47 = vadd.f32 %v2093_v29, %v2092_v25 }
 0x19a   : > { %v2074_v8 = vadd.f32 %v2073_v4, %v2072_v10  ;;  %v2095_v19 = vrot.slane %v2094_v47, 1 }
 0x19c   : > { %2075 = vst [vmem:[%s265_s8] sm:$0x1] %v2074_v8  ;;  %v2096_v22 = vadd.f32 %v2095_v19, %v2094_v47 }
 0x19e   : > { %2097 = vst [vmem:[%s268_s11] sm:$0x1] %v2096_v22 }
 0x19f PF: > { %s17_s21 = sadd.s32 1, %s2944_s21  }
 0x1a0   : > { %p14_p4 = scmp.ge.s32.totalorder %s17_s21, 4  }
 0x1a2   :  { %16 = sbr.rel (!%p14_p4) target bundleno = 1 (0x1), region = 99 }

</bundles_post_ra>
